<compile_context>
chip_gen: v5e
topology: v5e:2x2
jax: 0.10.0
libtpu: 0.0.40
codegen_flags: <defaults>
</compile_context>

<pallas_src>
import jax
import jax.numpy as jnp
from jax.experimental import pallas as pl
from jax.experimental.pallas import tpu as pltpu

EPS = 1e-5  # PyTorch BatchNorm1d default eps


def encoder_kernel(x_ref, wt_ref, bt_ref,
                   w1_ref, b1_ref, w2_ref, b2_ref,
                   w3_ref, b3_ref, out_ref):
    # x_ref block: (B, Tt, C, S) bf16, lane dim = S (lane dense).
    B, Tt, C, S = x_ref.shape
    Ep = out_ref.shape[2]
    cdt = w1_ref.dtype                     # bf16 operand dtype for the MXU dots

    # ---- frozen backbone stand-in: 1x1 conv -> ReLU -> global average pool -------
    # One small 2-D MXU matmul per (b, t) frame (K = C is tiny); pooled features are
    # assembled b-major so the fused FC stage writes (B, Tt, Ep) directly.
    wt = wt_ref[...]                       # (C, F) bf16
    bt = bt_ref[...]                       # (1, F) f32
    rows = []
    for b in range(B):                     # static unroll: B*Tt small per grid step
        for t in range(Tt):
            xt = x_ref[b, t, :, :]                                  # (C, S) bf16
            f = jnp.dot(xt.T, wt, preferred_element_type=jnp.float32)  # (S, F) f32
            f = jnp.maximum(f + bt, 0.0)
            rows.append(jnp.mean(f, axis=0, keepdims=True))         # (1, F) f32
    feat = jnp.concatenate(rows, axis=0)                            # (B*Tt, F) f32

    # ---- fc1 (BN1 folded) -> ReLU -------------------------------------------------
    h1 = jnp.dot(feat.astype(cdt), w1_ref[...],
                 preferred_element_type=jnp.float32) + b1_ref[...]
    h1 = jnp.maximum(h1, 0.0)

    # ---- fc2 (BN2 folded) -> ReLU -------------------------------------------------
    h2 = jnp.dot(h1.astype(cdt), w2_ref[...],
                 preferred_element_type=jnp.float32) + b2_ref[...]
    h2 = jnp.maximum(h2, 0.0)

    # ---- dropout (eval) = identity; fc3 (zero-padded to Ep lanes) ------------------
    o = jnp.dot(h2.astype(cdt), w3_ref[...],
                preferred_element_type=jnp.float32) + b3_ref[...]   # (B*Tt, Ep) f32

    # (B*Tt, Ep) -> (B, Tt, Ep): leading-dim split (Tt % 8 == 0 or Tt == T) -> free.
    out_ref[...] = o.reshape(B, Tt, Ep).astype(out_ref.dtype)


def _round_up(n, m):
    return (n + m - 1) // m * m


def _fold_and_cast(params):
    """Fold eval-mode BatchNorm1d into fc1/fc2 (exact, f32), zero-pad fc3 to a
    lane-dense width, cast matmul operands to bf16 (biases stay f32)."""
    wt, bt, w1, b1, bn1, w2, b2, bn2, w3, b3 = params
    E = w3.shape[1]
    Ep = _round_up(E, 128)

    def fold(w, b, bn):
        gamma, beta, mean, var = bn[0], bn[1], bn[2], bn[3]
        s = gamma * jax.lax.rsqrt(var + EPS)
        return w * s[None, :], (b - mean[None, :]) * s[None, :] + beta[None, :]

    w1f, b1f = fold(w1, b1, bn1)
    w2f, b2f = fold(w2, b2, bn2)
    w3p = jnp.pad(w3, ((0, 0), (0, Ep - E)))
    b3p = jnp.pad(b3, ((0, 0), (0, Ep - E)))

    c, f = jnp.bfloat16, jnp.float32
    return (wt.astype(c), bt.astype(f),
            w1f.astype(c), b1f.astype(f),
            w2f.astype(c), b2f.astype(f),
            w3p.astype(c), b3p.astype(f)), E, Ep


def res_cnn_encoder(x_btchw, params, *, time_tile=8):
    """x_btchw: (B, T, C, H, W) float32 -> (B, T, CNN_embed_dim) float32."""
    B, T, C, H, W = x_btchw.shape
    S = H * W
    (wt, bt, w1, b1, w2, b2, w3, b3), E, Ep = _fold_and_cast(params)

    # Zero-copy lane-dense layout: (B, T, C, S) keeps S = H*W in the lane dim.
    x_k = x_btchw.reshape(B, T, C, S).astype(jnp.bfloat16)

    # Fuse Tt timesteps per grid step (M = B*Tt rows through the FC matmuls).
    if T % time_tile == 0 and time_tile % 8 == 0:
        Tt = time_tile
    else:
        Tt = T                      # single chunk: block dim == full array dim
    grid = (T // Tt,)

    resident = lambda a: pl.BlockSpec(a.shape, lambda i: (0,) * a.ndim)
    # TODO(synk): at production sizes, single-buffer the resident weight specs
    # (pipeline_mode=pl.Buffered(1) or a one-shot DMA into scratch) to halve their VMEM.

    out_pad = pl.pallas_call(
        encoder_kernel,
        out_shape=jax.ShapeDtypeStruct((B, T, Ep), jnp.float32),
        grid_spec=pltpu.PrefetchScalarGridSpec(
            num_scalar_prefetch=0,
            grid=grid,
            in_specs=[
                pl.BlockSpec((B, Tt, C, S), lambda i: (0, i, 0, 0)),   # frames
                resident(wt), resident(bt),                             # trunk stand-in
                resident(w1), resident(b1),                             # fc1 (+ bn1 folded)
                resident(w2), resident(b2),                             # fc2 (+ bn2 folded)
                resident(w3), resident(b3),                             # fc3 (lane padded)
            ],
            out_specs=pl.BlockSpec((B, Tt, Ep), lambda i: (0, i, 0)),
        ),
        compiler_params=pltpu.CompilerParams(
            dimension_semantics=("parallel",),          # timestep chunks independent
            vmem_limit_bytes=48 * 1024 * 1024),         # explicit budget (fits v7x 64 MiB)
    )(x_k, wt, bt, w1, b1, w2, b2, w3, b3)

    # torch.stack(dim=0).transpose_(0,1) is already realised as (B, T, :); drop the pad.
    return out_pad[:, :, :E]


def make_params(key, C, F, H1, H2, E):
    ks = jax.random.split(key, 10)
    wt = jax.random.normal(ks[0], (C, F), jnp.float32) * 0.1
    bt = jax.random.normal(ks[1], (1, F), jnp.float32) * 0.1
    w1 = jax.random.normal(ks[2], (F, H1), jnp.float32) * 0.1
    b1 = jax.random.normal(ks[3], (1, H1), jnp.float32) * 0.1
    w2 = jax.random.normal(ks[4], (H1, H2), jnp.float32) * 0.1
    b2 = jax.random.normal(ks[5], (1, H2), jnp.float32) * 0.1
    w3 = jax.random.normal(ks[6], (H2, E), jnp.float32) * 0.1
    b3 = jax.random.normal(ks[7], (1, E), jnp.float32) * 0.1

    def bn_params(k, n):
        k1, k2, k3, k4 = jax.random.split(k, 4)
        gamma = 1.0 + 0.1 * jax.random.normal(k1, (n,), jnp.float32)
        beta = 0.1 * jax.random.normal(k2, (n,), jnp.float32)
        mean = 0.1 * jax.random.normal(k3, (n,), jnp.float32)
        var = jax.random.uniform(k4, (n,), jnp.float32, 0.5, 1.5)
        return jnp.stack([gamma, beta, mean, var], axis=0)  # (4, n)

    bn1 = bn_params(ks[8], H1)
    bn2 = bn_params(ks[9], H2)
    return (wt, bt, w1, b1, bn1, w2, b2, bn2, w3, b3)


def reference_forward(x_btchw, params):
    """Plain-JAX mirror of the kernel math (same eval semantics and the same bf16
    rounding points) used for the correctness check."""
    B, T, C, H, W = x_btchw.shape
    S = H * W
    (wt, bt, w1, b1, w2, b2, w3, b3), E, _ = _fold_and_cast(params)
    xb = x_btchw.reshape(B, T, C, S).astype(jnp.bfloat16)

    f = jnp.einsum('btcs,cf->btsf', xb, wt, preferred_element_type=jnp.float32)
    f = jnp.maximum(f + bt, 0.0)
    feat = jnp.mean(f, axis=2)                                   # (B, T, F) f32

    def fc(h, w, b):
        return jnp.dot(h.astype(w.dtype), w, preferred_element_type=jnp.float32) + b

    h1 = jnp.maximum(fc(feat, w1, b1), 0.0)
    h2 = jnp.maximum(fc(h1, w2, b2), 0.0)
    o = fc(h2, w3, b3)                                           # dropout (eval) = identity
    return o[..., :E]


if __name__ == "__main__":
    # Small shapes consistent with the module's forward:
    #   x_3d: (B, T, C, H, W); resnet.fc.in_features -> F; fc_hidden1/2 -> H1/H2;
    #   CNN_embed_dim -> E (deliberately not a multiple of 128: exercises lane padding).
    B, T, C, H, W = 2, 16, 4, 16, 16
    F, H1, H2, E = 128, 128, 128, 32

    key = jax.random.PRNGKey(0)
    kx, kp = jax.random.split(key)
    x = jax.random.normal(kx, (B, T, C, H, W), jnp.float32)
    params = make_params(kp, C, F, H1, H2, E)

    out = jax.jit(res_cnn_encoder)(x, params)
    out = jax.block_until_ready(out)
    assert out.shape == (B, T, E), out.shape

    ref = jax.block_until_ready(reference_forward(x, params))
    assert jnp.allclose(out, ref, atol=5e-3, rtol=5e-3), \
        float(jnp.max(jnp.abs(out - ref)))

    print("KERNEL_OK")
</pallas_src>

<mosaic_0001>
module attributes {stable_mosaic.version = 11 : i64} {
  func.func @encoder_kernel(%arg0: i32, %arg1: memref<2x8x4x256xbf16, #tpu.memory_space<vmem>>, %arg2: memref<4x128xbf16, #tpu.memory_space<vmem>>, %arg3: memref<1x128xf32, #tpu.memory_space<vmem>>, %arg4: memref<128x128xbf16, #tpu.memory_space<vmem>>, %arg5: memref<1x128xf32, #tpu.memory_space<vmem>>, %arg6: memref<128x128xbf16, #tpu.memory_space<vmem>>, %arg7: memref<1x128xf32, #tpu.memory_space<vmem>>, %arg8: memref<128x128xbf16, #tpu.memory_space<vmem>>, %arg9: memref<1x128xf32, #tpu.memory_space<vmem>>, %arg10: memref<2x8x128xf32, #tpu.memory_space<vmem>>) attributes {dimension_semantics = [#tpu.dimension_semantics<parallel>], iteration_bounds = array<i64: 2>, scalar_prefetch = 0 : i64, scratch_operands = 0 : i64, tpu.core_type = #tpu.core_type<tc>, window_params = [{transform_indices = @transform_0, window_bounds = array<i64: 2, 8, 4, 256>}, {pipeline_mode = #tpu.pipeline_mode<synchronous>, transform_indices = @transform_1, window_bounds = array<i64: 4, 128>}, {pipeline_mode = #tpu.pipeline_mode<synchronous>, transform_indices = @transform_2, window_bounds = array<i64: 1, 128>}, {pipeline_mode = #tpu.pipeline_mode<synchronous>, transform_indices = @transform_3, window_bounds = array<i64: 128, 128>}, {pipeline_mode = #tpu.pipeline_mode<synchronous>, transform_indices = @transform_4, window_bounds = array<i64: 1, 128>}, {pipeline_mode = #tpu.pipeline_mode<synchronous>, transform_indices = @transform_5, window_bounds = array<i64: 128, 128>}, {pipeline_mode = #tpu.pipeline_mode<synchronous>, transform_indices = @transform_6, window_bounds = array<i64: 1, 128>}, {pipeline_mode = #tpu.pipeline_mode<synchronous>, transform_indices = @transform_7, window_bounds = array<i64: 128, 128>}, {pipeline_mode = #tpu.pipeline_mode<synchronous>, transform_indices = @transform_8, window_bounds = array<i64: 1, 128>}, {transform_indices = @transform_9, window_bounds = array<i64: 2, 8, 128>}]} {
    %c0 = arith.constant 0 : index
    %c0_0 = arith.constant 0 : index
    %0 = vector.load %arg2[%c0, %c0_0] : memref<4x128xbf16, #tpu.memory_space<vmem>>, vector<4x128xbf16>
    %c0_1 = arith.constant 0 : index
    %c0_2 = arith.constant 0 : index
    %1 = vector.load %arg3[%c0_1, %c0_2] : memref<1x128xf32, #tpu.memory_space<vmem>>, vector<1x128xf32>
    %c0_3 = arith.constant 0 : index
    %c0_4 = arith.constant 0 : index
    %c0_5 = arith.constant 0 : index
    %c0_6 = arith.constant 0 : index
    %2 = vector.load %arg1[%c0_3, %c0_4, %c0_5, %c0_6] : memref<2x8x4x256xbf16, #tpu.memory_space<vmem>>, vector<1x1x4x256xbf16>
    %3 = vector.shape_cast %2 : vector<1x1x4x256xbf16> to vector<4x256xbf16>
    %4 = tpu.transpose %3, [1, 0] : vector<4x256xbf16> -> vector<256x4xbf16>
    %cst = arith.constant dense<0.000000e+00> : vector<256x128xf32>
    %5 = tpu.matmul %4, %0, %cst {dimension_numbers = #tpu.dot_dimension_numbers<[1], [0], [0], [1], [0, 0, 1, 1], [], []>} : vector<256x4xbf16>, vector<4x128xbf16>, vector<256x128xf32> -> vector<256x128xf32>
    %6 = vector.broadcast %1 : vector<1x128xf32> to vector<256x128xf32>
    %7 = arith.addf %5, %6 : vector<256x128xf32>
    %cst_7 = arith.constant 0.000000e+00 : f32
    %8 = vector.broadcast %cst_7 : f32 to vector<256x128xf32>
    %9 = arith.maximumf %7, %8 : vector<256x128xf32>
    %cst_8 = arith.constant dense<0.000000e+00> : vector<128xf32>
    %10 = vector.multi_reduction <add>, %9, %cst_8 [0] : vector<256x128xf32> to vector<128xf32>
    %11 = vector.shape_cast %10 : vector<128xf32> to vector<1x128xf32>
    %cst_9 = arith.constant 2.560000e+02 : f32
    %12 = vector.broadcast %cst_9 : f32 to vector<1x128xf32>
    %13 = arith.divf %11, %12 : vector<1x128xf32>
    %c0_10 = arith.constant 0 : index
    %c1 = arith.constant 1 : index
    %c0_11 = arith.constant 0 : index
    %c0_12 = arith.constant 0 : index
    %14 = vector.load %arg1[%c0_10, %c1, %c0_11, %c0_12] : memref<2x8x4x256xbf16, #tpu.memory_space<vmem>>, vector<1x1x4x256xbf16>
    %15 = vector.shape_cast %14 : vector<1x1x4x256xbf16> to vector<4x256xbf16>
    %16 = tpu.transpose %15, [1, 0] : vector<4x256xbf16> -> vector<256x4xbf16>
    %cst_13 = arith.constant dense<0.000000e+00> : vector<256x128xf32>
    %17 = tpu.matmul %16, %0, %cst_13 {dimension_numbers = #tpu.dot_dimension_numbers<[1], [0], [0], [1], [0, 0, 1, 1], [], []>} : vector<256x4xbf16>, vector<4x128xbf16>, vector<256x128xf32> -> vector<256x128xf32>
    %18 = vector.broadcast %1 : vector<1x128xf32> to vector<256x128xf32>
    %19 = arith.addf %17, %18 : vector<256x128xf32>
    %cst_14 = arith.constant 0.000000e+00 : f32
    %20 = vector.broadcast %cst_14 : f32 to vector<256x128xf32>
    %21 = arith.maximumf %19, %20 : vector<256x128xf32>
    %cst_15 = arith.constant dense<0.000000e+00> : vector<128xf32>
    %22 = vector.multi_reduction <add>, %21, %cst_15 [0] : vector<256x128xf32> to vector<128xf32>
    %23 = vector.shape_cast %22 : vector<128xf32> to vector<1x128xf32>
    %cst_16 = arith.constant 2.560000e+02 : f32
    %24 = vector.broadcast %cst_16 : f32 to vector<1x128xf32>
    %25 = arith.divf %23, %24 : vector<1x128xf32>
    %c0_17 = arith.constant 0 : index
    %c2 = arith.constant 2 : index
    %c0_18 = arith.constant 0 : index
    %c0_19 = arith.constant 0 : index
    %26 = vector.load %arg1[%c0_17, %c2, %c0_18, %c0_19] : memref<2x8x4x256xbf16, #tpu.memory_space<vmem>>, vector<1x1x4x256xbf16>
    %27 = vector.shape_cast %26 : vector<1x1x4x256xbf16> to vector<4x256xbf16>
    %28 = tpu.transpose %27, [1, 0] : vector<4x256xbf16> -> vector<256x4xbf16>
    %cst_20 = arith.constant dense<0.000000e+00> : vector<256x128xf32>
    %29 = tpu.matmul %28, %0, %cst_20 {dimension_numbers = #tpu.dot_dimension_numbers<[1], [0], [0], [1], [0, 0, 1, 1], [], []>} : vector<256x4xbf16>, vector<4x128xbf16>, vector<256x128xf32> -> vector<256x128xf32>
    %30 = vector.broadcast %1 : vector<1x128xf32> to vector<256x128xf32>
    %31 = arith.addf %29, %30 : vector<256x128xf32>
    %cst_21 = arith.constant 0.000000e+00 : f32
    %32 = vector.broadcast %cst_21 : f32 to vector<256x128xf32>
    %33 = arith.maximumf %31, %32 : vector<256x128xf32>
    %cst_22 = arith.constant dense<0.000000e+00> : vector<128xf32>
    %34 = vector.multi_reduction <add>, %33, %cst_22 [0] : vector<256x128xf32> to vector<128xf32>
    %35 = vector.shape_cast %34 : vector<128xf32> to vector<1x128xf32>
    %cst_23 = arith.constant 2.560000e+02 : f32
    %36 = vector.broadcast %cst_23 : f32 to vector<1x128xf32>
    %37 = arith.divf %35, %36 : vector<1x128xf32>
    %c0_24 = arith.constant 0 : index
    %c3 = arith.constant 3 : index
    %c0_25 = arith.constant 0 : index
    %c0_26 = arith.constant 0 : index
    %38 = vector.load %arg1[%c0_24, %c3, %c0_25, %c0_26] : memref<2x8x4x256xbf16, #tpu.memory_space<vmem>>, vector<1x1x4x256xbf16>
    %39 = vector.shape_cast %38 : vector<1x1x4x256xbf16> to vector<4x256xbf16>
    %40 = tpu.transpose %39, [1, 0] : vector<4x256xbf16> -> vector<256x4xbf16>
    %cst_27 = arith.constant dense<0.000000e+00> : vector<256x128xf32>
    %41 = tpu.matmul %40, %0, %cst_27 {dimension_numbers = #tpu.dot_dimension_numbers<[1], [0], [0], [1], [0, 0, 1, 1], [], []>} : vector<256x4xbf16>, vector<4x128xbf16>, vector<256x128xf32> -> vector<256x128xf32>
    %42 = vector.broadcast %1 : vector<1x128xf32> to vector<256x128xf32>
    %43 = arith.addf %41, %42 : vector<256x128xf32>
    %cst_28 = arith.constant 0.000000e+00 : f32
    %44 = vector.broadcast %cst_28 : f32 to vector<256x128xf32>
    %45 = arith.maximumf %43, %44 : vector<256x128xf32>
    %cst_29 = arith.constant dense<0.000000e+00> : vector<128xf32>
    %46 = vector.multi_reduction <add>, %45, %cst_29 [0] : vector<256x128xf32> to vector<128xf32>
    %47 = vector.shape_cast %46 : vector<128xf32> to vector<1x128xf32>
    %cst_30 = arith.constant 2.560000e+02 : f32
    %48 = vector.broadcast %cst_30 : f32 to vector<1x128xf32>
    %49 = arith.divf %47, %48 : vector<1x128xf32>
    %c0_31 = arith.constant 0 : index
    %c4 = arith.constant 4 : index
    %c0_32 = arith.constant 0 : index
    %c0_33 = arith.constant 0 : index
    %50 = vector.load %arg1[%c0_31, %c4, %c0_32, %c0_33] : memref<2x8x4x256xbf16, #tpu.memory_space<vmem>>, vector<1x1x4x256xbf16>
    %51 = vector.shape_cast %50 : vector<1x1x4x256xbf16> to vector<4x256xbf16>
    %52 = tpu.transpose %51, [1, 0] : vector<4x256xbf16> -> vector<256x4xbf16>
    %cst_34 = arith.constant dense<0.000000e+00> : vector<256x128xf32>
    %53 = tpu.matmul %52, %0, %cst_34 {dimension_numbers = #tpu.dot_dimension_numbers<[1], [0], [0], [1], [0, 0, 1, 1], [], []>} : vector<256x4xbf16>, vector<4x128xbf16>, vector<256x128xf32> -> vector<256x128xf32>
    %54 = vector.broadcast %1 : vector<1x128xf32> to vector<256x128xf32>
    %55 = arith.addf %53, %54 : vector<256x128xf32>
    %cst_35 = arith.constant 0.000000e+00 : f32
    %56 = vector.broadcast %cst_35 : f32 to vector<256x128xf32>
    %57 = arith.maximumf %55, %56 : vector<256x128xf32>
    %cst_36 = arith.constant dense<0.000000e+00> : vector<128xf32>
    %58 = vector.multi_reduction <add>, %57, %cst_36 [0] : vector<256x128xf32> to vector<128xf32>
    %59 = vector.shape_cast %58 : vector<128xf32> to vector<1x128xf32>
    %cst_37 = arith.constant 2.560000e+02 : f32
    %60 = vector.broadcast %cst_37 : f32 to vector<1x128xf32>
    %61 = arith.divf %59, %60 : vector<1x128xf32>
    %c0_38 = arith.constant 0 : index
    %c5 = arith.constant 5 : index
    %c0_39 = arith.constant 0 : index
    %c0_40 = arith.constant 0 : index
    %62 = vector.load %arg1[%c0_38, %c5, %c0_39, %c0_40] : memref<2x8x4x256xbf16, #tpu.memory_space<vmem>>, vector<1x1x4x256xbf16>
    %63 = vector.shape_cast %62 : vector<1x1x4x256xbf16> to vector<4x256xbf16>
    %64 = tpu.transpose %63, [1, 0] : vector<4x256xbf16> -> vector<256x4xbf16>
    %cst_41 = arith.constant dense<0.000000e+00> : vector<256x128xf32>
    %65 = tpu.matmul %64, %0, %cst_41 {dimension_numbers = #tpu.dot_dimension_numbers<[1], [0], [0], [1], [0, 0, 1, 1], [], []>} : vector<256x4xbf16>, vector<4x128xbf16>, vector<256x128xf32> -> vector<256x128xf32>
    %66 = vector.broadcast %1 : vector<1x128xf32> to vector<256x128xf32>
    %67 = arith.addf %65, %66 : vector<256x128xf32>
    %cst_42 = arith.constant 0.000000e+00 : f32
    %68 = vector.broadcast %cst_42 : f32 to vector<256x128xf32>
    %69 = arith.maximumf %67, %68 : vector<256x128xf32>
    %cst_43 = arith.constant dense<0.000000e+00> : vector<128xf32>
    %70 = vector.multi_reduction <add>, %69, %cst_43 [0] : vector<256x128xf32> to vector<128xf32>
    %71 = vector.shape_cast %70 : vector<128xf32> to vector<1x128xf32>
    %cst_44 = arith.constant 2.560000e+02 : f32
    %72 = vector.broadcast %cst_44 : f32 to vector<1x128xf32>
    %73 = arith.divf %71, %72 : vector<1x128xf32>
    %c0_45 = arith.constant 0 : index
    %c6 = arith.constant 6 : index
    %c0_46 = arith.constant 0 : index
    %c0_47 = arith.constant 0 : index
    %74 = vector.load %arg1[%c0_45, %c6, %c0_46, %c0_47] : memref<2x8x4x256xbf16, #tpu.memory_space<vmem>>, vector<1x1x4x256xbf16>
    %75 = vector.shape_cast %74 : vector<1x1x4x256xbf16> to vector<4x256xbf16>
    %76 = tpu.transpose %75, [1, 0] : vector<4x256xbf16> -> vector<256x4xbf16>
    %cst_48 = arith.constant dense<0.000000e+00> : vector<256x128xf32>
    %77 = tpu.matmul %76, %0, %cst_48 {dimension_numbers = #tpu.dot_dimension_numbers<[1], [0], [0], [1], [0, 0, 1, 1], [], []>} : vector<256x4xbf16>, vector<4x128xbf16>, vector<256x128xf32> -> vector<256x128xf32>
    %78 = vector.broadcast %1 : vector<1x128xf32> to vector<256x128xf32>
    %79 = arith.addf %77, %78 : vector<256x128xf32>
    %cst_49 = arith.constant 0.000000e+00 : f32
    %80 = vector.broadcast %cst_49 : f32 to vector<256x128xf32>
    %81 = arith.maximumf %79, %80 : vector<256x128xf32>
    %cst_50 = arith.constant dense<0.000000e+00> : vector<128xf32>
    %82 = vector.multi_reduction <add>, %81, %cst_50 [0] : vector<256x128xf32> to vector<128xf32>
    %83 = vector.shape_cast %82 : vector<128xf32> to vector<1x128xf32>
    %cst_51 = arith.constant 2.560000e+02 : f32
    %84 = vector.broadcast %cst_51 : f32 to vector<1x128xf32>
    %85 = arith.divf %83, %84 : vector<1x128xf32>
    %c0_52 = arith.constant 0 : index
    %c7 = arith.constant 7 : index
    %c0_53 = arith.constant 0 : index
    %c0_54 = arith.constant 0 : index
    %86 = vector.load %arg1[%c0_52, %c7, %c0_53, %c0_54] : memref<2x8x4x256xbf16, #tpu.memory_space<vmem>>, vector<1x1x4x256xbf16>
    %87 = vector.shape_cast %86 : vector<1x1x4x256xbf16> to vector<4x256xbf16>
    %88 = tpu.transpose %87, [1, 0] : vector<4x256xbf16> -> vector<256x4xbf16>
    %cst_55 = arith.constant dense<0.000000e+00> : vector<256x128xf32>
    %89 = tpu.matmul %88, %0, %cst_55 {dimension_numbers = #tpu.dot_dimension_numbers<[1], [0], [0], [1], [0, 0, 1, 1], [], []>} : vector<256x4xbf16>, vector<4x128xbf16>, vector<256x128xf32> -> vector<256x128xf32>
    %90 = vector.broadcast %1 : vector<1x128xf32> to vector<256x128xf32>
    %91 = arith.addf %89, %90 : vector<256x128xf32>
    %cst_56 = arith.constant 0.000000e+00 : f32
    %92 = vector.broadcast %cst_56 : f32 to vector<256x128xf32>
    %93 = arith.maximumf %91, %92 : vector<256x128xf32>
    %cst_57 = arith.constant dense<0.000000e+00> : vector<128xf32>
    %94 = vector.multi_reduction <add>, %93, %cst_57 [0] : vector<256x128xf32> to vector<128xf32>
    %95 = vector.shape_cast %94 : vector<128xf32> to vector<1x128xf32>
    %cst_58 = arith.constant 2.560000e+02 : f32
    %96 = vector.broadcast %cst_58 : f32 to vector<1x128xf32>
    %97 = arith.divf %95, %96 : vector<1x128xf32>
    %c1_59 = arith.constant 1 : index
    %c0_60 = arith.constant 0 : index
    %c0_61 = arith.constant 0 : index
    %c0_62 = arith.constant 0 : index
    %98 = vector.load %arg1[%c1_59, %c0_60, %c0_61, %c0_62] : memref<2x8x4x256xbf16, #tpu.memory_space<vmem>>, vector<1x1x4x256xbf16>
    %99 = vector.shape_cast %98 : vector<1x1x4x256xbf16> to vector<4x256xbf16>
    %100 = tpu.transpose %99, [1, 0] : vector<4x256xbf16> -> vector<256x4xbf16>
    %cst_63 = arith.constant dense<0.000000e+00> : vector<256x128xf32>
    %101 = tpu.matmul %100, %0, %cst_63 {dimension_numbers = #tpu.dot_dimension_numbers<[1], [0], [0], [1], [0, 0, 1, 1], [], []>} : vector<256x4xbf16>, vector<4x128xbf16>, vector<256x128xf32> -> vector<256x128xf32>
    %102 = vector.broadcast %1 : vector<1x128xf32> to vector<256x128xf32>
    %103 = arith.addf %101, %102 : vector<256x128xf32>
    %cst_64 = arith.constant 0.000000e+00 : f32
    %104 = vector.broadcast %cst_64 : f32 to vector<256x128xf32>
    %105 = arith.maximumf %103, %104 : vector<256x128xf32>
    %cst_65 = arith.constant dense<0.000000e+00> : vector<128xf32>
    %106 = vector.multi_reduction <add>, %105, %cst_65 [0] : vector<256x128xf32> to vector<128xf32>
    %107 = vector.shape_cast %106 : vector<128xf32> to vector<1x128xf32>
    %cst_66 = arith.constant 2.560000e+02 : f32
    %108 = vector.broadcast %cst_66 : f32 to vector<1x128xf32>
    %109 = arith.divf %107, %108 : vector<1x128xf32>
    %c1_67 = arith.constant 1 : index
    %c1_68 = arith.constant 1 : index
    %c0_69 = arith.constant 0 : index
    %c0_70 = arith.constant 0 : index
    %110 = vector.load %arg1[%c1_67, %c1_68, %c0_69, %c0_70] : memref<2x8x4x256xbf16, #tpu.memory_space<vmem>>, vector<1x1x4x256xbf16>
    %111 = vector.shape_cast %110 : vector<1x1x4x256xbf16> to vector<4x256xbf16>
    %112 = tpu.transpose %111, [1, 0] : vector<4x256xbf16> -> vector<256x4xbf16>
    %cst_71 = arith.constant dense<0.000000e+00> : vector<256x128xf32>
    %113 = tpu.matmul %112, %0, %cst_71 {dimension_numbers = #tpu.dot_dimension_numbers<[1], [0], [0], [1], [0, 0, 1, 1], [], []>} : vector<256x4xbf16>, vector<4x128xbf16>, vector<256x128xf32> -> vector<256x128xf32>
    %114 = vector.broadcast %1 : vector<1x128xf32> to vector<256x128xf32>
    %115 = arith.addf %113, %114 : vector<256x128xf32>
    %cst_72 = arith.constant 0.000000e+00 : f32
    %116 = vector.broadcast %cst_72 : f32 to vector<256x128xf32>
    %117 = arith.maximumf %115, %116 : vector<256x128xf32>
    %cst_73 = arith.constant dense<0.000000e+00> : vector<128xf32>
    %118 = vector.multi_reduction <add>, %117, %cst_73 [0] : vector<256x128xf32> to vector<128xf32>
    %119 = vector.shape_cast %118 : vector<128xf32> to vector<1x128xf32>
    %cst_74 = arith.constant 2.560000e+02 : f32
    %120 = vector.broadcast %cst_74 : f32 to vector<1x128xf32>
    %121 = arith.divf %119, %120 : vector<1x128xf32>
    %c1_75 = arith.constant 1 : index
    %c2_76 = arith.constant 2 : index
    %c0_77 = arith.constant 0 : index
    %c0_78 = arith.constant 0 : index
    %122 = vector.load %arg1[%c1_75, %c2_76, %c0_77, %c0_78] : memref<2x8x4x256xbf16, #tpu.memory_space<vmem>>, vector<1x1x4x256xbf16>
    %123 = vector.shape_cast %122 : vector<1x1x4x256xbf16> to vector<4x256xbf16>
    %124 = tpu.transpose %123, [1, 0] : vector<4x256xbf16> -> vector<256x4xbf16>
    %cst_79 = arith.constant dense<0.000000e+00> : vector<256x128xf32>
    %125 = tpu.matmul %124, %0, %cst_79 {dimension_numbers = #tpu.dot_dimension_numbers<[1], [0], [0], [1], [0, 0, 1, 1], [], []>} : vector<256x4xbf16>, vector<4x128xbf16>, vector<256x128xf32> -> vector<256x128xf32>
    %126 = vector.broadcast %1 : vector<1x128xf32> to vector<256x128xf32>
    %127 = arith.addf %125, %126 : vector<256x128xf32>
    %cst_80 = arith.constant 0.000000e+00 : f32
    %128 = vector.broadcast %cst_80 : f32 to vector<256x128xf32>
    %129 = arith.maximumf %127, %128 : vector<256x128xf32>
    %cst_81 = arith.constant dense<0.000000e+00> : vector<128xf32>
    %130 = vector.multi_reduction <add>, %129, %cst_81 [0] : vector<256x128xf32> to vector<128xf32>
    %131 = vector.shape_cast %130 : vector<128xf32> to vector<1x128xf32>
    %cst_82 = arith.constant 2.560000e+02 : f32
    %132 = vector.broadcast %cst_82 : f32 to vector<1x128xf32>
    %133 = arith.divf %131, %132 : vector<1x128xf32>
    %c1_83 = arith.constant 1 : index
    %c3_84 = arith.constant 3 : index
    %c0_85 = arith.constant 0 : index
    %c0_86 = arith.constant 0 : index
    %134 = vector.load %arg1[%c1_83, %c3_84, %c0_85, %c0_86] : memref<2x8x4x256xbf16, #tpu.memory_space<vmem>>, vector<1x1x4x256xbf16>
    %135 = vector.shape_cast %134 : vector<1x1x4x256xbf16> to vector<4x256xbf16>
    %136 = tpu.transpose %135, [1, 0] : vector<4x256xbf16> -> vector<256x4xbf16>
    %cst_87 = arith.constant dense<0.000000e+00> : vector<256x128xf32>
    %137 = tpu.matmul %136, %0, %cst_87 {dimension_numbers = #tpu.dot_dimension_numbers<[1], [0], [0], [1], [0, 0, 1, 1], [], []>} : vector<256x4xbf16>, vector<4x128xbf16>, vector<256x128xf32> -> vector<256x128xf32>
    %138 = vector.broadcast %1 : vector<1x128xf32> to vector<256x128xf32>
    %139 = arith.addf %137, %138 : vector<256x128xf32>
    %cst_88 = arith.constant 0.000000e+00 : f32
    %140 = vector.broadcast %cst_88 : f32 to vector<256x128xf32>
    %141 = arith.maximumf %139, %140 : vector<256x128xf32>
    %cst_89 = arith.constant dense<0.000000e+00> : vector<128xf32>
    %142 = vector.multi_reduction <add>, %141, %cst_89 [0] : vector<256x128xf32> to vector<128xf32>
    %143 = vector.shape_cast %142 : vector<128xf32> to vector<1x128xf32>
    %cst_90 = arith.constant 2.560000e+02 : f32
    %144 = vector.broadcast %cst_90 : f32 to vector<1x128xf32>
    %145 = arith.divf %143, %144 : vector<1x128xf32>
    %c1_91 = arith.constant 1 : index
    %c4_92 = arith.constant 4 : index
    %c0_93 = arith.constant 0 : index
    %c0_94 = arith.constant 0 : index
    %146 = vector.load %arg1[%c1_91, %c4_92, %c0_93, %c0_94] : memref<2x8x4x256xbf16, #tpu.memory_space<vmem>>, vector<1x1x4x256xbf16>
    %147 = vector.shape_cast %146 : vector<1x1x4x256xbf16> to vector<4x256xbf16>
    %148 = tpu.transpose %147, [1, 0] : vector<4x256xbf16> -> vector<256x4xbf16>
    %cst_95 = arith.constant dense<0.000000e+00> : vector<256x128xf32>
    %149 = tpu.matmul %148, %0, %cst_95 {dimension_numbers = #tpu.dot_dimension_numbers<[1], [0], [0], [1], [0, 0, 1, 1], [], []>} : vector<256x4xbf16>, vector<4x128xbf16>, vector<256x128xf32> -> vector<256x128xf32>
    %150 = vector.broadcast %1 : vector<1x128xf32> to vector<256x128xf32>
    %151 = arith.addf %149, %150 : vector<256x128xf32>
    %cst_96 = arith.constant 0.000000e+00 : f32
    %152 = vector.broadcast %cst_96 : f32 to vector<256x128xf32>
    %153 = arith.maximumf %151, %152 : vector<256x128xf32>
    %cst_97 = arith.constant dense<0.000000e+00> : vector<128xf32>
    %154 = vector.multi_reduction <add>, %153, %cst_97 [0] : vector<256x128xf32> to vector<128xf32>
    %155 = vector.shape_cast %154 : vector<128xf32> to vector<1x128xf32>
    %cst_98 = arith.constant 2.560000e+02 : f32
    %156 = vector.broadcast %cst_98 : f32 to vector<1x128xf32>
    %157 = arith.divf %155, %156 : vector<1x128xf32>
    %c1_99 = arith.constant 1 : index
    %c5_100 = arith.constant 5 : index
    %c0_101 = arith.constant 0 : index
    %c0_102 = arith.constant 0 : index
    %158 = vector.load %arg1[%c1_99, %c5_100, %c0_101, %c0_102] : memref<2x8x4x256xbf16, #tpu.memory_space<vmem>>, vector<1x1x4x256xbf16>
    %159 = vector.shape_cast %158 : vector<1x1x4x256xbf16> to vector<4x256xbf16>
    %160 = tpu.transpose %159, [1, 0] : vector<4x256xbf16> -> vector<256x4xbf16>
    %cst_103 = arith.constant dense<0.000000e+00> : vector<256x128xf32>
    %161 = tpu.matmul %160, %0, %cst_103 {dimension_numbers = #tpu.dot_dimension_numbers<[1], [0], [0], [1], [0, 0, 1, 1], [], []>} : vector<256x4xbf16>, vector<4x128xbf16>, vector<256x128xf32> -> vector<256x128xf32>
    %162 = vector.broadcast %1 : vector<1x128xf32> to vector<256x128xf32>
    %163 = arith.addf %161, %162 : vector<256x128xf32>
    %cst_104 = arith.constant 0.000000e+00 : f32
    %164 = vector.broadcast %cst_104 : f32 to vector<256x128xf32>
    %165 = arith.maximumf %163, %164 : vector<256x128xf32>
    %cst_105 = arith.constant dense<0.000000e+00> : vector<128xf32>
    %166 = vector.multi_reduction <add>, %165, %cst_105 [0] : vector<256x128xf32> to vector<128xf32>
    %167 = vector.shape_cast %166 : vector<128xf32> to vector<1x128xf32>
    %cst_106 = arith.constant 2.560000e+02 : f32
    %168 = vector.broadcast %cst_106 : f32 to vector<1x128xf32>
    %169 = arith.divf %167, %168 : vector<1x128xf32>
    %c1_107 = arith.constant 1 : index
    %c6_108 = arith.constant 6 : index
    %c0_109 = arith.constant 0 : index
    %c0_110 = arith.constant 0 : index
    %170 = vector.load %arg1[%c1_107, %c6_108, %c0_109, %c0_110] : memref<2x8x4x256xbf16, #tpu.memory_space<vmem>>, vector<1x1x4x256xbf16>
    %171 = vector.shape_cast %170 : vector<1x1x4x256xbf16> to vector<4x256xbf16>
    %172 = tpu.transpose %171, [1, 0] : vector<4x256xbf16> -> vector<256x4xbf16>
    %cst_111 = arith.constant dense<0.000000e+00> : vector<256x128xf32>
    %173 = tpu.matmul %172, %0, %cst_111 {dimension_numbers = #tpu.dot_dimension_numbers<[1], [0], [0], [1], [0, 0, 1, 1], [], []>} : vector<256x4xbf16>, vector<4x128xbf16>, vector<256x128xf32> -> vector<256x128xf32>
    %174 = vector.broadcast %1 : vector<1x128xf32> to vector<256x128xf32>
    %175 = arith.addf %173, %174 : vector<256x128xf32>
    %cst_112 = arith.constant 0.000000e+00 : f32
    %176 = vector.broadcast %cst_112 : f32 to vector<256x128xf32>
    %177 = arith.maximumf %175, %176 : vector<256x128xf32>
    %cst_113 = arith.constant dense<0.000000e+00> : vector<128xf32>
    %178 = vector.multi_reduction <add>, %177, %cst_113 [0] : vector<256x128xf32> to vector<128xf32>
    %179 = vector.shape_cast %178 : vector<128xf32> to vector<1x128xf32>
    %cst_114 = arith.constant 2.560000e+02 : f32
    %180 = vector.broadcast %cst_114 : f32 to vector<1x128xf32>
    %181 = arith.divf %179, %180 : vector<1x128xf32>
    %c1_115 = arith.constant 1 : index
    %c7_116 = arith.constant 7 : index
    %c0_117 = arith.constant 0 : index
    %c0_118 = arith.constant 0 : index
    %182 = vector.load %arg1[%c1_115, %c7_116, %c0_117, %c0_118] : memref<2x8x4x256xbf16, #tpu.memory_space<vmem>>, vector<1x1x4x256xbf16>
    %183 = vector.shape_cast %182 : vector<1x1x4x256xbf16> to vector<4x256xbf16>
    %184 = tpu.transpose %183, [1, 0] : vector<4x256xbf16> -> vector<256x4xbf16>
    %cst_119 = arith.constant dense<0.000000e+00> : vector<256x128xf32>
    %185 = tpu.matmul %184, %0, %cst_119 {dimension_numbers = #tpu.dot_dimension_numbers<[1], [0], [0], [1], [0, 0, 1, 1], [], []>} : vector<256x4xbf16>, vector<4x128xbf16>, vector<256x128xf32> -> vector<256x128xf32>
    %186 = vector.broadcast %1 : vector<1x128xf32> to vector<256x128xf32>
    %187 = arith.addf %185, %186 : vector<256x128xf32>
    %cst_120 = arith.constant 0.000000e+00 : f32
    %188 = vector.broadcast %cst_120 : f32 to vector<256x128xf32>
    %189 = arith.maximumf %187, %188 : vector<256x128xf32>
    %cst_121 = arith.constant dense<0.000000e+00> : vector<128xf32>
    %190 = vector.multi_reduction <add>, %189, %cst_121 [0] : vector<256x128xf32> to vector<128xf32>
    %191 = vector.shape_cast %190 : vector<128xf32> to vector<1x128xf32>
    %cst_122 = arith.constant 2.560000e+02 : f32
    %192 = vector.broadcast %cst_122 : f32 to vector<1x128xf32>
    %193 = arith.divf %191, %192 : vector<1x128xf32>
    %194 = tpu.concatenate %13, %25, %37, %49, %61, %73, %85, %97, %109, %121, %133, %145, %157, %169, %181, %193 in 0 : vector<1x128xf32>, vector<1x128xf32>, vector<1x128xf32>, vector<1x128xf32>, vector<1x128xf32>, vector<1x128xf32>, vector<1x128xf32>, vector<1x128xf32>, vector<1x128xf32>, vector<1x128xf32>, vector<1x128xf32>, vector<1x128xf32>, vector<1x128xf32>, vector<1x128xf32>, vector<1x128xf32>, vector<1x128xf32> -> vector<16x128xf32>
    %195 = arith.truncf %194 : vector<16x128xf32> to vector<16x128xbf16>
    %c0_123 = arith.constant 0 : index
    %c0_124 = arith.constant 0 : index
    %196 = vector.load %arg4[%c0_123, %c0_124] : memref<128x128xbf16, #tpu.memory_space<vmem>>, vector<128x128xbf16>
    %cst_125 = arith.constant dense<0.000000e+00> : vector<16x128xf32>
    %197 = tpu.matmul %195, %196, %cst_125 {dimension_numbers = #tpu.dot_dimension_numbers<[1], [0], [0], [1], [0, 0, 1, 1], [], []>} : vector<16x128xbf16>, vector<128x128xbf16>, vector<16x128xf32> -> vector<16x128xf32>
    %c0_126 = arith.constant 0 : index
    %c0_127 = arith.constant 0 : index
    %198 = vector.load %arg5[%c0_126, %c0_127] : memref<1x128xf32, #tpu.memory_space<vmem>>, vector<1x128xf32>
    %199 = vector.broadcast %198 : vector<1x128xf32> to vector<16x128xf32>
    %200 = arith.addf %197, %199 : vector<16x128xf32>
    %cst_128 = arith.constant 0.000000e+00 : f32
    %201 = vector.broadcast %cst_128 : f32 to vector<16x128xf32>
    %202 = arith.maximumf %200, %201 : vector<16x128xf32>
    %203 = arith.truncf %202 : vector<16x128xf32> to vector<16x128xbf16>
    %c0_129 = arith.constant 0 : index
    %c0_130 = arith.constant 0 : index
    %204 = vector.load %arg6[%c0_129, %c0_130] : memref<128x128xbf16, #tpu.memory_space<vmem>>, vector<128x128xbf16>
    %cst_131 = arith.constant dense<0.000000e+00> : vector<16x128xf32>
    %205 = tpu.matmul %203, %204, %cst_131 {dimension_numbers = #tpu.dot_dimension_numbers<[1], [0], [0], [1], [0, 0, 1, 1], [], []>} : vector<16x128xbf16>, vector<128x128xbf16>, vector<16x128xf32> -> vector<16x128xf32>
    %c0_132 = arith.constant 0 : index
    %c0_133 = arith.constant 0 : index
    %206 = vector.load %arg7[%c0_132, %c0_133] : memref<1x128xf32, #tpu.memory_space<vmem>>, vector<1x128xf32>
    %207 = vector.broadcast %206 : vector<1x128xf32> to vector<16x128xf32>
    %208 = arith.addf %205, %207 : vector<16x128xf32>
    %cst_134 = arith.constant 0.000000e+00 : f32
    %209 = vector.broadcast %cst_134 : f32 to vector<16x128xf32>
    %210 = arith.maximumf %208, %209 : vector<16x128xf32>
    %211 = arith.truncf %210 : vector<16x128xf32> to vector<16x128xbf16>
    %c0_135 = arith.constant 0 : index
    %c0_136 = arith.constant 0 : index
    %212 = vector.load %arg8[%c0_135, %c0_136] : memref<128x128xbf16, #tpu.memory_space<vmem>>, vector<128x128xbf16>
    %cst_137 = arith.constant dense<0.000000e+00> : vector<16x128xf32>
    %213 = tpu.matmul %211, %212, %cst_137 {dimension_numbers = #tpu.dot_dimension_numbers<[1], [0], [0], [1], [0, 0, 1, 1], [], []>} : vector<16x128xbf16>, vector<128x128xbf16>, vector<16x128xf32> -> vector<16x128xf32>
    %c0_138 = arith.constant 0 : index
    %c0_139 = arith.constant 0 : index
    %214 = vector.load %arg9[%c0_138, %c0_139] : memref<1x128xf32, #tpu.memory_space<vmem>>, vector<1x128xf32>
    %215 = vector.broadcast %214 : vector<1x128xf32> to vector<16x128xf32>
    %216 = arith.addf %213, %215 : vector<16x128xf32>
    %217 = vector.shape_cast %216 : vector<16x128xf32> to vector<2x8x128xf32>
    %c0_140 = arith.constant 0 : index
    %c0_141 = arith.constant 0 : index
    %c0_142 = arith.constant 0 : index
    %218 = vector.load %arg10[%c0_140, %c0_141, %c0_142] : memref<2x8x128xf32, #tpu.memory_space<vmem>>, vector<2x8x128xf32>
    tpu.vector_store %arg10[%c0_140, %c0_141, %c0_142], %217 {strides = array<i32>} : memref<2x8x128xf32, #tpu.memory_space<vmem>>, vector<2x8x128xf32>,
    return
  }
  func.func @transform_0(%arg0: i32) -> (i32, i32, i32, i32) {
    %c0_i32 = arith.constant 0 : i32
    %c0_i32_0 = arith.constant 0 : i32
    %c0_i32_1 = arith.constant 0 : i32
    %c0_i32_2 = arith.constant 0 : i32
    return %c0_i32, %arg0, %c0_i32_0, %c0_i32_1 : i32, i32, i32, i32
  }
  func.func @transform_1(%arg0: i32) -> (i32, i32) {
    %c0_i32 = arith.constant 0 : i32
    %c0_i32_0 = arith.constant 0 : i32
    %c0_i32_1 = arith.constant 0 : i32
    return %c0_i32, %c0_i32_0 : i32, i32
  }
  func.func @transform_2(%arg0: i32) -> (i32, i32) {
    %c0_i32 = arith.constant 0 : i32
    %c0_i32_0 = arith.constant 0 : i32
    %c0_i32_1 = arith.constant 0 : i32
    return %c0_i32, %c0_i32_0 : i32, i32
  }
  func.func @transform_3(%arg0: i32) -> (i32, i32) {
    %c0_i32 = arith.constant 0 : i32
    %c0_i32_0 = arith.constant 0 : i32
    %c0_i32_1 = arith.constant 0 : i32
    return %c0_i32, %c0_i32_0 : i32, i32
  }
  func.func @transform_4(%arg0: i32) -> (i32, i32) {
    %c0_i32 = arith.constant 0 : i32
    %c0_i32_0 = arith.constant 0 : i32
    %c0_i32_1 = arith.constant 0 : i32
    return %c0_i32, %c0_i32_0 : i32, i32
  }
  func.func @transform_5(%arg0: i32) -> (i32, i32) {
    %c0_i32 = arith.constant 0 : i32
    %c0_i32_0 = arith.constant 0 : i32
    %c0_i32_1 = arith.constant 0 : i32
    return %c0_i32, %c0_i32_0 : i32, i32
  }
  func.func @transform_6(%arg0: i32) -> (i32, i32) {
    %c0_i32 = arith.constant 0 : i32
    %c0_i32_0 = arith.constant 0 : i32
    %c0_i32_1 = arith.constant 0 : i32
    return %c0_i32, %c0_i32_0 : i32, i32
  }
  func.func @transform_7(%arg0: i32) -> (i32, i32) {
    %c0_i32 = arith.constant 0 : i32
    %c0_i32_0 = arith.constant 0 : i32
    %c0_i32_1 = arith.constant 0 : i32
    return %c0_i32, %c0_i32_0 : i32, i32
  }
  func.func @transform_8(%arg0: i32) -> (i32, i32) {
    %c0_i32 = arith.constant 0 : i32
    %c0_i32_0 = arith.constant 0 : i32
    %c0_i32_1 = arith.constant 0 : i32
    return %c0_i32, %c0_i32_0 : i32, i32
  }
  func.func @transform_9(%arg0: i32) -> (i32, i32, i32) {
    %c0_i32 = arith.constant 0 : i32
    %c0_i32_0 = arith.constant 0 : i32
    %c0_i32_1 = arith.constant 0 : i32
    return %c0_i32, %arg0, %c0_i32_0 : i32, i32, i32
  }
}

</mosaic_0001>

<bundles_post_ra>
// kernel: res_cnn_encoder.1
= control target key start
LH: loop header
LB: loop body
LE: loop exit
PB: predicated region body
PF: predicated region fallthrough
CT: control target
= control target key end

     0   :  { %14 = vsyncpa [#allocation4], 0  ;;  %s6939_s0 = inlined_call_operand.vmem [shape: bf16[2,16,4,256], index: 0, kind: input, shape index: {}]   ;;  %s6940_s1 = inlined_call_operand.vmem [shape: bf16[4,128], index: 1, kind: input, shape index: {}]   ;;  %s6941_s2 = inlined_call_operand.vmem [shape: f32[1,128], index: 2, kind: input, shape index: {}]   ;;  %s6942_s3 = inlined_call_operand.vmem [shape: bf16[128,128], index: 3, kind: input, shape index: {}]   ;;  %s6943_s4 = inlined_call_operand.vmem [shape: f32[1,128], index: 4, kind: input, shape index: {}]   ;;  %s6944_s5 = inlined_call_operand.vmem [shape: bf16[128,128], index: 5, kind: input, shape index: {}]   ;;  %s6945_s6 = inlined_call_operand.vmem [shape: f32[1,128], index: 6, kind: input, shape index: {}]   ;;  %s6946_s7 = inlined_call_operand.vmem [shape: bf16[128,128], index: 7, kind: input, shape index: {}]   ;;  %s6947_s8 = inlined_call_operand.vmem [shape: f32[1,128], index: 8, kind: input, shape index: {}]   ;;  %s6948_s9 = inlined_call_operand.hbm [shape: f32[2,16,128], index: 9, kind: output, shape index: {}]  }
   0x1   :  { %16 = vsyncpa [#allocation4 + $0x1], 0  ;;  %s5216_s30 = smov 0   ;;  %s5218_s10 = smov 0  }
   0x2   :  { %s5220_s11 = smov 0   ;;  %s5222_s12 = smov 0  }
   0x3 LB: > { %s4635_s13 = sadd.s32 4294967295, %s5160_s12   ;;  %s4636_s14 = sadd.s32 4294967294, %s5160_s12   ;;  %s5160_s12 = sphi %s5222_s12, %s6954_s12   ;;  %s5156_s11 = sphi %s5220_s11, %s6953_s11   ;;  %s5152_s10 = sphi %s5218_s10, %s6952_s10   ;;  %s5148_s30 = sphi %s5216_s30, %s6951_s30  }
   0x4   : > { %s5239_s15 = sadd.s32 1, %s5160_s12   ;;  %s29_s16 = sadd.s32 1, %s5156_s11 }
   0x5   : > { %s26_s17 = ssub.s32 %s5160_s12, %s5239_s15  ;;  %p36_p0 = scmp.ne.s32.totalorder %s5156_s11, %s5152_s10 }
   0x6   : > { %p27_p1 = scmp.eq.s32.totalorder %s26_s17, 0  ;;  %p37_p2 = scmp.eq.s32.totalorder %s5160_s12, 0 }
   0x7   : > { %p234_p3 = scmp.eq.s32.totalorder %s4635_s13, 1  ;;  %p239_p4 = scmp.ne.s32.totalorder %s5152_s10, %s5148_s30 }
   0x8   : > { %s5252_s18 = scalar_select %p27_p1, %s5156_s11, %s29_s16  }
   0x9   : > { %p38_p5 = por %p37_p2, %p36_p0  ;;  %p5254_p6 = por %p234_p3, %p36_p0 }
   0xa   : > { %p240_p7 = scmp.eq.s32.totalorder %s4636_s14, 1  ;;  %p4638_p9 = scmp.ge.s32.totalorder %s5160_s12, 2 }
   0xc   : > { %p5258_p8 = por %p240_p7, %p239_p4  ;;  %280 = sbr.rel (%p4638_p9) target bundleno = 29 (0x1d), region = 48 }
  0x11   : > { %283 = sbr.rel (!%p38_p5) target bundleno = 29 (0x1d), region = 52  ;;  %s285_s21 = sand.u32 (%p38_p5), 1, %s5156_s11  }
  0x12   : > { %s5018_s22 = sshll.u32 (%p38_p5), %s5160_s12, 5  ;;  %s4639_s23 = sshll.u32 (%p38_p5), %s285_s21, 6 }
  0x13   : > { %s291_s26 = scalar_lea.vmem (%p38_p5), %s6939_s0, %s5018_s22  ;;  %s287_s27 = scalar_lea.vmem (%p38_p5), [#allocation2], %s4639_s23 }
  0x14   : > { %v308_v0 = vld [vmem:[%s291_s26] sm:$0xff] (%p38_p5)   ;;  %v312_v1 = vld [vmem:[%s291_s26 + $0x8] sm:$0xff] (%p38_p5)   ;;  %v316_v2 = vld [vmem:[%s291_s26 + $0x10] sm:$0xff] (%p38_p5)  }
  0x15   : > { %309 = vst [vmem:[%s287_s27] sm:$0xff] (%p38_p5), %v308_v0   ;;  %v320_v3 = vld [vmem:[%s291_s26 + $0x18] sm:$0xff] (%p38_p5)   ;;  %v324_v4 = vld [vmem:[%s291_s26 + $0x40] sm:$0xff] (%p38_p5)   ;;  %v328_v5 = vld [vmem:[%s291_s26 + $0x48] sm:$0xff] (%p38_p5)  }
  0x16   : > { %313 = vst [vmem:[%s287_s27 + $0x8] sm:$0xff] %v312_v1   ;;  %v332_v6 = vld [vmem:[%s291_s26 + $0x50] sm:$0xff]   ;;  %v336_v7 = vld [vmem:[%s291_s26 + $0x58] sm:$0xff]  }
  0x17   : > { %317 = vst [vmem:[%s287_s27 + $0x10] sm:$0xff] %v316_v2  }
  0x18   : > { %321 = vst [vmem:[%s287_s27 + $0x18] sm:$0xff] %v320_v3  }
  0x19   : > { %325 = vst [vmem:[%s287_s27 + $0x20] sm:$0xff] %v324_v4  }
  0x1a   : > { %329 = vst [vmem:[%s287_s27 + $0x28] sm:$0xff] %v328_v5  }
  0x1b   : > { %333 = vst [vmem:[%s287_s27 + $0x30] sm:$0xff] %v332_v6  }
  0x1c   : > { %337 = vst [vmem:[%s287_s27 + $0x38] sm:$0xff] %v336_v7  }
  0x1d PF: > { %p4643_p10 = scmp.ge.s32.totalorder %s5160_s12, 1  ;;  %p394_p11 = scmp.lt.s32.totalorder %s5160_s12, 3 }
  0x1f   : > { %p395_p12 = pnand %p4643_p10, %p394_p11 }
  0x20   : > { %s5273_s28 = sand.u32 (!%p395_p12), 1, %s5152_s10   ;;  %s5014_s22 = sshll.u32 (!%p395_p12), %s4635_s13, 3 }
  0x21   : > { %398 = sbr.rel (%p395_p12) target bundleno = 1963 (0x7ab), region = 93  ;;  %s4644_s29 = sshll.u32 (!%p395_p12), %s5273_s28, 6 }
  0x22   : > { %s5276_s14 = scalar_lea.vmem (!%p395_p12), [#allocation2], %s4644_s29  ;;  %s4645_s16 = sshll.u32 (!%p395_p12), %s5273_s28, 4 }
  0x23   : > { %s4564_s25 = scalar_lea.hbm (!%p395_p12), %s6948_s9, %s5014_s22  ;;  %s435_s26 = scalar_lea.vmem (!%p395_p12), [#allocation3], %s4645_s16 }
  0x24   : > { %s4565_s27 = sshll.u32 (!%p395_p12), %s435_s26, 4  ;;  %s4567_s29 = sshll.u32 (!%p395_p12), %s4564_s25, 4  ;;  %s4566_s27 = int_to_ptr.vmem [resolvable:$true] %s4565_s27  ;;  %s4568_s29 = int_to_ptr.hbm [resolvable:$true] %s4567_s29 }
  0x25   : > { %s5112_s17 = sshra.s32 (!%p395_p12), %s4568_s29, 4  ;;  %s5118_s16 = scalar_lea.hbm (!%p395_p12), %s6948_s9, 32  ;;  %s5113_s17 = int_to_ptr.hbm [resolvable:$true] %s5112_s17 }
  0x26   : > { %v440_v8 = vld [vmem:[%s5276_s14] sm:$0xf]  ;;  %v4662_v9 = vld [vmem:[%s5276_s14 + $0x4] sm:$0xf]  ;;  %v4679_v12 = vld [vmem:[%s5276_s14 + $0x8] sm:$0xf]  ;;  %p5119_p2 = scmp.lt.s32.totalorder %s5113_s17, %s6948_s9 }
  0x27   : > { %442 = vst [vmem:[#allocation1] ss:$4 sm:$0xff] %v440_v8  ;;  %v4696_v17 = vld [vmem:[%s5276_s14 + $0xc] sm:$0xf]  ;;  %v4713_v18 = vld [vmem:[%s5276_s14 + $0x10] sm:$0xf] }
  0x28   : > { %v4730_v21 = vld [vmem:[%s5276_s14 + $0x14] sm:$0xf]  ;;  %v438_v24 = vld [vmem:[%s6940_s1] sm:$0x3]  ;;  %vm523_vm0 = vcmask 1041408   ;;  %vm474_vm1 = vcmask 31744  }
  0x29   : > { %v5292_v25 = vsel %vm523_vm0, %v438_v24, 0  ;;  %v4747_v40 = vld [vmem:[%s5276_s14 + $0x18] sm:$0xf]  ;;  %vm4278_vm3 = vcmask 1040384   ;;  %vm4281_vm4 = vcmask 1042432   ;;  %vm4283_vm5 = vcmask 1043456  }
  0x2a   : > { %534 = vmatpush.bf16.msra.mxu0 %v5292_v25  ;;  %1019 = vmatpush.bf16.msra.mxu2 %v5292_v25  ;;  %v5353_v62 = vld [vmem:[%s6941_s2] ss:$0 sm:$0xff]  ;;  %vm4285_vm6 = vcmask 1044480   ;;  %vm4287_vm7 = vcmask 1045504   ;;  %vm4289_vm8 = vcmask 1046528   ;;  %s5114_s13 = scalar_lea.hbm %s5113_s17, 16 }
  0x2b   : > { %780 = vmatpush.bf16.msra.mxu1 %v5292_v25  ;;  %1258 = vmatpush.bf16.msra.mxu3 %v5292_v25  ;;  %p5115_p13 = scmp.ne.s32.totalorder %s5113_s17, %s5114_s13  ;;  %p5120_p3 = scmp.lt.s32.totalorder %s5118_s16, %s5114_s13 }
  0x2d   : > { %p5116_p0 = pnand %p5115_p13, %p5254_p6  ;;  %p5121_p4 = por %p5120_p3, %p5119_p2 }
  0x2e   : > { %v443_v10 = vld.sshfl [vmem:[#allocation1] sm:$0xff pattern:$0x73625140]  ;;  %v444_v11 = vld.sshfl [vmem:[#allocation1 + $0x8] sm:$0xff pattern:$0x73625140]  ;;  %1975 = vmatpush.bf16.msrb.mxu2 %v5292_v25  ;;  %1497 = vmatpush.bf16.msrb.mxu0 %v5292_v25 }
  0x2f   : > { %447 = vxpose.binary.xlu1.c.b16.start.end [1/2] (short) %v444_v11, %v443_v10, 128  ;;  %696 = vst [vmem:[#allocation1] ss:$4 sm:$0xff] %v4662_v9  ;;  %p5117_p1 = pneg %p5116_p0 }
  0x30   : > { %2214 = vmatpush.bf16.msrb.mxu3 %v5292_v25  ;;  %1736 = vmatpush.bf16.msrb.mxu1 %v5292_v25 }
  0x31   : > { %p5122_p5 = pnand %p5121_p4, %p5117_p1 }
  0x36   : > { %v697_v13 = vld.sshfl [vmem:[#allocation1] sm:$0xff pattern:$0x73625140]  ;;  %v698_v14 = vld.sshfl [vmem:[#allocation1 + $0x8] sm:$0xff pattern:$0x73625140] }
  0x37   : > { %935 = vst [vmem:[#allocation1] ss:$4 sm:$0xff] %v4679_v12 }
  0x3e   : > { %v936_v15 = vld.sshfl [vmem:[#allocation1] sm:$0xff pattern:$0x73625140]  ;;  %v937_v16 = vld.sshfl [vmem:[#allocation1 + $0x8] sm:$0xff pattern:$0x73625140] }
  0x3f   : > { %940 = vxpose.binary.xlu0.c.b16.start.end [1/2] (short) %v937_v16, %v936_v15, 128  ;;  %1174 = vst [vmem:[#allocation1] ss:$4 sm:$0xff] %v4696_v17 }
  0x46   : > { %v1175_v19 = vld.sshfl [vmem:[#allocation1] sm:$0xff pattern:$0x73625140]  ;;  %v1176_v20 = vld.sshfl [vmem:[#allocation1 + $0x8] sm:$0xff pattern:$0x73625140] }
  0x47   : > { %1413 = vst [vmem:[#allocation1] ss:$4 sm:$0xff] %v4713_v18 }
  0x4e   : > { %v5284_v22 = vld.sshfl [vmem:[#allocation1] sm:$0xff pattern:$0x73625140]  ;;  %v5286_v23 = vld.sshfl [vmem:[#allocation1 + $0x8] sm:$0xff pattern:$0x73625140] }
  0x4f   : > { %1652 = vst [vmem:[#allocation1] ss:$4 sm:$0xff] %v4730_v21 }
  0x56   : > { %v1653_v38 = vld.sshfl [vmem:[#allocation1] sm:$0xff pattern:$0x73625140]  ;;  %v1654_v39 = vld.sshfl [vmem:[#allocation1 + $0x8] sm:$0xff pattern:$0x73625140] }
  0x57   : > { %1891 = vst [vmem:[#allocation1] ss:$4 sm:$0xff] %v4747_v40 }
  0x5e   : > { %v1892_v43 = vld.sshfl [vmem:[#allocation1] sm:$0xff pattern:$0x73625140]  ;;  %v1893_v44 = vld.sshfl [vmem:[#allocation1 + $0x8] sm:$0xff pattern:$0x73625140] }
  0x5f   : > { %1896 = vxpose.binary.xlu2.c.b16.start.end [1/2] (short) %v1893_v44, %v1892_v43, 128 }
  0xaf   : > { %701 = vxpose.binary.xlu1.c.b16.start.end [1/2] (short) %v698_v14, %v697_v13, 128 }
  0xbf   : > { %1179 = vxpose.binary.xlu0.c.b16.start.end [1/2] (short) %v1176_v20, %v1175_v19, 128 }
  0xdb   : > { %v455_v26 = vpop.trf.xlu1 }
  0xdc   : > { %4646 = vmatmul.msk.bf16.vlgmr.msra.gmra.mxu0 %vm474_vm1, %v455_v26 }
  0xdd   : > { %2453 = vmatpush.bf16.msra.mxu0 %v5292_v25 }
  0xe3   : > { %v456_v27 = vpop.trf.xlu1 }
  0xeb   : > { %v457_v28 = vpop.trf.xlu1  ;;  %v948_v29 = vpop.trf.xlu0 }
  0xec   : > { %4647 = vmatmul.msk.bf16.gmra.mxu0 %vm474_vm1, %v457_v28  ;;  %4680 = vmatmul.msk.bf16.vlgmr.msra.gmra.mxu2 %vm474_vm1, %v948_v29 }
  0xed   : > { %2931 = vmatpush.bf16.msra.mxu2 %v5292_v25 }
  0xf3   : > { %v5307_v30 = vpop.trf.xlu1  ;;  %v5309_v31 = vpop.trf.xlu0 }
  0xfb   : > { %v459_v32 = vpop.trf.xlu1  ;;  %v950_v33 = vpop.trf.xlu0 }
  0xfc   : > { %4648 = vmatmul.msk.bf16.gmra.mxu0 %vm474_vm1, %v459_v32  ;;  %4681 = vmatmul.msk.bf16.gmra.mxu2 %vm474_vm1, %v950_v33 }
 0x103   : > { %v5313_v34 = vpop.trf.xlu1  ;;  %v5315_v35 = vpop.trf.xlu0 }
 0x10b   : > { %v461_v36 = vpop.trf.xlu1  ;;  %v952_v37 = vpop.trf.xlu0 }
 0x10c   : > { %4649 = vmatmul.msk.bf16.gmra.mxu0 %vm474_vm1, %v461_v36  ;;  %4682 = vmatmul.msk.bf16.gmra.mxu2 %vm474_vm1, %v952_v37 }
 0x113   : > { %v5320_v41 = vpop.trf.xlu1  ;;  %v5322_v42 = vpop.trf.xlu0 }
 0x11b   : > { %v463_v45 = vpop.trf.xlu1  ;;  %v954_v46 = vpop.trf.xlu0 }
 0x11c   : > { %4650 = vmatmul.msk.bf16.gmra.mxu0 %vm474_vm1, %v463_v45  ;;  %4683 = vmatmul.msk.bf16.gmra.mxu2 %vm474_vm1, %v954_v46 }
 0x123   : > { %v5326_v47 = vpop.trf.xlu1  ;;  %v5328_v48 = vpop.trf.xlu0 }
 0x12b   : > { %v465_v49 = vpop.trf.xlu1  ;;  %v956_v50 = vpop.trf.xlu0 }
 0x12c   : > { %4651 = vmatmul.msk.bf16.gmra.mxu0 %vm474_vm1, %v465_v49  ;;  %4684 = vmatmul.msk.bf16.gmra.mxu2 %vm474_vm1, %v956_v50 }
 0x12f   : > { %1657 = vxpose.binary.xlu1.c.b16.start.end [1/2] (short) %v1654_v39, %v1653_v38, 128 }
 0x133   : > { %v5332_v51 = vpop.trf.xlu1  ;;  %v5334_v52 = vpop.trf.xlu0 }
 0x13b   : > { %v467_v53 = vpop.trf.xlu1  ;;  %v958_v54 = vpop.trf.xlu0 }
 0x13c   : > { %4652 = vmatmul.msk.bf16.gmra.mxu0 %vm474_vm1, %v467_v53  ;;  %4685 = vmatmul.msk.bf16.gmra.mxu2 %vm474_vm1, %v958_v54 }
 0x13f   : > { %1418 = vxpose.binary.xlu0.c.b16.start.end [1/2] (short) %v5286_v23, %v5284_v22, 128 }
 0x143   : > { %v5340_v55 = vpop.trf.xlu1  ;;  %v5342_v56 = vpop.trf.xlu0 }
 0x14b   : > { %v469_v57 = vpop.trf.xlu1  ;;  %v960_v58 = vpop.trf.xlu0 }
 0x14c   : > { %4653 = vmatmul.msk.bf16.gmra.mxu0 %vm474_vm1, %v469_v57  ;;  %4686 = vmatmul.msk.bf16.gmra.mxu2 %vm474_vm1, %v960_v58 }
 0x153   : > { %v5346_v59 = vpop.trf.xlu1  ;;  %v5348_v60 = vpop.trf.xlu0 }
 0x159   : > { %v536_v61 = vpop.f32.mrf.mxu0 }
 0x15a   : > { %v537_v1 = vadd.f32 %v5353_v62, %v536_v61 }
 0x15b   : > { %v709_v63 = vpop.trf.xlu1  ;;  %v962_v0 = vpop.trf.xlu0 }
 0x15c   : > { %4654 = vmatmul.msk.bf16.gmra.mxu0 %vm474_vm1, %v456_v27  ;;  %4663 = vmatmul.msk.bf16.vlgmr.msra.gmra.mxu1 %vm474_vm1, %v709_v63  ;;  %v616_v3 = vmax.f32 %v537_v1, 0.0 }
 0x15d   : > { %4687 = vmatmul.msk.bf16.gmra.mxu2 %vm474_vm1, %v962_v0  ;;  %2692 = vmatpush.bf16.msra.mxu1 %v5292_v25 }
 0x161   : > { %v538_v2 = vpop.f32.mrf.mxu0 }
 0x162   : > { %v539_v4 = vadd.f32 %v5353_v62, %v538_v2 }
 0x163   : > { %v5361_v5 = vpop.trf.xlu1  ;;  %v5363_v6 = vpop.trf.xlu0 }
 0x164   : > { %v617_v7 = vmax.f32 %v539_v4, 0.0 }
 0x166   : > { %v648_v8 = vadd.f32 %v617_v7, %v616_v3 }
 0x169   : > { %v541_v9 = vpop.f32.mrf.mxu0 }
 0x16a   : > { %v542_v10 = vadd.f32 %v5353_v62, %v541_v9  ;;  %v4764_v9 = vld [vmem:[%s5276_s14 + $0x1c] sm:$0xf] }
 0x16b   : > { %v711_v11 = vpop.trf.xlu1  ;;  %v1187_v12 = vpop.trf.xlu0  ;;  %2130 = vst [vmem:[#allocation1] ss:$4 sm:$0xff] %v4764_v9 }
 0x16c   : > { %v618_v13 = vmax.f32 %v542_v10, 0.0  ;;  %4655 = vmatmul.msk.bf16.gmra.mxu0 %vm474_vm1, %v5307_v30  ;;  %4664 = vmatmul.msk.bf16.gmra.mxu1 %vm474_vm1, %v711_v11 }
 0x16d   : > { %4688 = vmatmul.msk.bf16.gmra.mxu2 %vm474_vm1, %v5309_v31  ;;  %4697 = vmatmul.msk.bf16.vlgmr.msra.gmra.mxu3 %vm474_vm1, %v1187_v12 }
 0x16e   : > { %v649_v14 = vadd.f32 %v648_v8, %v618_v13  ;;  %3170 = vmatpush.bf16.msra.mxu3 %v5292_v25 }
 0x16f   : > { %v1021_v15 = vpop.f32.mrf.mxu2 }
 0x170   : > { %v1022_v21 = vadd.f32 %v5353_v62, %v1021_v15 }
 0x171   : > { %v543_v16 = vpop.f32.mrf.mxu0 }
 0x172   : > { %v544_v17 = vadd.f32 %v5353_v62, %v543_v16  ;;  %v1101_v27 = vmax.f32 %v1022_v21, 0.0 }
 0x173   : > { %v5374_v18 = vpop.trf.xlu1  ;;  %v5376_v19 = vpop.trf.xlu0 }
 0x174   : > { %v619_v20 = vmax.f32 %v544_v17, 0.0 }
 0x176   : > { %v650_v22 = vadd.f32 %v649_v14, %v619_v20 }
 0x177   : > { %v1023_v23 = vpop.f32.mrf.mxu2 }
 0x178   : > { %v1024_v24 = vadd.f32 %v5353_v62, %v1023_v23  ;;  %v2132_v23 = vld.sshfl [vmem:[#allocation1 + $0x8] sm:$0xff pattern:$0x73625140] }
 0x179   : > { %v546_v26 = vpop.f32.mrf.mxu0 }
 0x17a   : > { %v1102_v28 = vmax.f32 %v1024_v24, 0.0  ;;  %v547_v29 = vadd.f32 %v5353_v62, %v546_v26 }
 0x17b   : > { %v713_v30 = vpop.trf.xlu1  ;;  %v1189_v31 = vpop.trf.xlu0 }
 0x17c   : > { %v1133_v32 = vadd.f32 %v1102_v28, %v1101_v27  ;;  %v620_v33 = vmax.f32 %v547_v29, 0.0  ;;  %4656 = vmatmul.msk.bf16.gmra.mxu0 %vm474_vm1, %v5313_v34  ;;  %4665 = vmatmul.msk.bf16.gmra.mxu1 %vm474_vm1, %v713_v30  ;;  %v4781_v28 = vld [vmem:[%s5276_s14 + $0x20] sm:$0xf] }
 0x17d   : > { %4689 = vmatmul.msk.bf16.gmra.mxu2 %vm474_vm1, %v5315_v35  ;;  %4698 = vmatmul.msk.bf16.gmra.mxu3 %vm474_vm1, %v1189_v31 }
 0x17e   : > { %v651_v36 = vadd.f32 %v650_v22, %v620_v33  ;;  %v2131_v22 = vld.sshfl [vmem:[#allocation1] sm:$0xff pattern:$0x73625140] }
 0x17f   : > { %v1026_v37 = vpop.f32.mrf.mxu2  ;;  %2135 = vxpose.binary.xlu2.c.b16.start.end [1/2] (short) %v2132_v23, %v2131_v22, 128  ;;  %2369 = vst [vmem:[#allocation1] ss:$4 sm:$0xff] %v4781_v28 }
 0x180   : > { %v1027_v38 = vadd.f32 %v5353_v62, %v1026_v37 }
 0x181   : > { %v548_v39 = vpop.f32.mrf.mxu0 }
 0x182   : > { %v1103_v40 = vmax.f32 %v1027_v38, 0.0  ;;  %v549_v43 = vadd.f32 %v5353_v62, %v548_v39  ;;  %v4798_v38 = vld [vmem:[%s5276_s14 + $0x24] sm:$0xf] }
 0x183   : > { %v5389_v44 = vpop.trf.xlu1  ;;  %v5391_v45 = vpop.trf.xlu0 }
 0x184   : > { %v1134_v34 = vadd.f32 %v1133_v32, %v1103_v40  ;;  %v621_v46 = vmax.f32 %v549_v43, 0.0 }
 0x186   : > { %v652_v49 = vadd.f32 %v651_v36, %v621_v46  ;;  %v2371_v39 = vld.sshfl [vmem:[#allocation1 + $0x8] sm:$0xff pattern:$0x73625140] }
 0x187   : > { %v1028_v50 = vpop.f32.mrf.mxu2 }
 0x188   : > { %v1029_v35 = vadd.f32 %v5353_v62, %v1028_v50 }
 0x189   : > { %v551_v53 = vpop.f32.mrf.mxu0 }
 0x18a   : > { %v1104_v54 = vmax.f32 %v1029_v35, 0.0  ;;  %v552_v57 = vadd.f32 %v5353_v62, %v551_v53 }
 0x18b   : > { %v715_v58 = vpop.trf.xlu1  ;;  %v1191_v61 = vpop.trf.xlu0 }
 0x18c   : > { %v1135_v63 = vadd.f32 %v1134_v34, %v1104_v54  ;;  %v622_v0 = vmax.f32 %v552_v57, 0.0  ;;  %4657 = vmatmul.msk.bf16.gmra.mxu0 %vm474_vm1, %v5320_v41  ;;  %4666 = vmatmul.msk.bf16.gmra.mxu1 %vm474_vm1, %v715_v58 }
 0x18d   : > { %4690 = vmatmul.msk.bf16.gmra.mxu2 %vm474_vm1, %v5322_v42  ;;  %4699 = vmatmul.msk.bf16.gmra.mxu3 %vm474_vm1, %v1191_v61 }
 0x18e   : > { %v653_v1 = vadd.f32 %v652_v49, %v622_v0 }
 0x18f   : > { %v1031_v2 = vpop.f32.mrf.mxu2 }
 0x190   : > { %v1032_v3 = vadd.f32 %v5353_v62, %v1031_v2 }
 0x191   : > { %v553_v4 = vpop.f32.mrf.mxu0 }
 0x192   : > { %v1105_v7 = vmax.f32 %v1032_v3, 0.0  ;;  %v554_v8 = vadd.f32 %v5353_v62, %v553_v4 }
 0x193   : > { %v5404_v10 = vpop.trf.xlu1  ;;  %v5406_v11 = vpop.trf.xlu0 }
 0x194   : > { %v1136_v41 = vadd.f32 %v1135_v63, %v1105_v7  ;;  %v623_v12 = vmax.f32 %v554_v8, 0.0 }
 0x196   : > { %v654_v13 = vadd.f32 %v653_v1, %v623_v12 }
 0x197   : > { %v1033_v42 = vpop.f32.mrf.mxu2 }
 0x198   : > { %v1034_v14 = vadd.f32 %v5353_v62, %v1033_v42 }
 0x199   : > { %v556_v15 = vpop.f32.mrf.mxu0 }
 0x19a   : > { %v1106_v16 = vmax.f32 %v1034_v14, 0.0  ;;  %v557_v17 = vadd.f32 %v5353_v62, %v556_v15 }
 0x19b   : > { %v717_v20 = vpop.trf.xlu1  ;;  %v1193_v21 = vpop.trf.xlu0 }
 0x19c   : > { %v1137_v24 = vadd.f32 %v1136_v41, %v1106_v16  ;;  %v624_v26 = vmax.f32 %v557_v17, 0.0  ;;  %4658 = vmatmul.msk.bf16.gmra.mxu0 %vm474_vm1, %v5326_v47  ;;  %4667 = vmatmul.msk.bf16.gmra.mxu1 %vm474_vm1, %v717_v20  ;;  %v5443_v20 = vpop.trf.xlu2 }
 0x19d   : > { %4691 = vmatmul.msk.bf16.gmra.mxu2 %vm474_vm1, %v5328_v48  ;;  %4700 = vmatmul.msk.bf16.gmra.mxu3 %vm474_vm1, %v1193_v21  ;;  %v2370_v48 = vld.sshfl [vmem:[#allocation1] sm:$0xff pattern:$0x73625140] }
 0x19e   : > { %v655_v27 = vadd.f32 %v654_v13, %v624_v26  ;;  %2608 = vst [vmem:[#allocation1] ss:$4 sm:$0xff] %v4798_v38 }
 0x19f   : > { %v1036_v29 = vpop.f32.mrf.mxu2 }
 0x1a0   : > { %v1037_v30 = vadd.f32 %v5353_v62, %v1036_v29 }
 0x1a1   : > { %v558_v31 = vpop.f32.mrf.mxu0 }
 0x1a2   : > { %v1107_v32 = vmax.f32 %v1037_v30, 0.0  ;;  %v559_v37 = vadd.f32 %v5353_v62, %v558_v31 }
 0x1a3   : > { %v5418_v33 = vpop.trf.xlu1  ;;  %v5420_v47 = vpop.trf.xlu0 }
 0x1a4   : > { %v1138_v36 = vadd.f32 %v1137_v24, %v1107_v32  ;;  %v625_v43 = vmax.f32 %v559_v37, 0.0  ;;  %v5454_v30 = vpop.trf.xlu2 }
 0x1a6   : > { %v656_v54 = vadd.f32 %v655_v27, %v625_v43 }
 0x1a7   : > { %v1038_v40 = vpop.f32.mrf.mxu2 }
 0x1a8   : > { %v1039_v34 = vadd.f32 %v5353_v62, %v1038_v40 }
 0x1a9   : > { %v561_v46 = vpop.f32.mrf.mxu0 }
 0x1aa   : > { %v1108_v49 = vmax.f32 %v1039_v34, 0.0  ;;  %v562_v50 = vadd.f32 %v5353_v62, %v561_v46 }
 0x1ab   : > { %v719_v35 = vpop.trf.xlu1  ;;  %v1195_v53 = vpop.trf.xlu0 }
 0x1ac   : > { %v1139_v57 = vadd.f32 %v1138_v36, %v1108_v49  ;;  %v626_v58 = vmax.f32 %v562_v50, 0.0  ;;  %4659 = vmatmul.msk.bf16.gmra.mxu0 %vm474_vm1, %v5332_v51  ;;  %4668 = vmatmul.msk.bf16.gmra.mxu1 %vm474_vm1, %v719_v35  ;;  %v5461_v46 = vpop.trf.xlu2 }
 0x1ad   : > { %4692 = vmatmul.msk.bf16.gmra.mxu2 %vm474_vm1, %v5334_v52  ;;  %4701 = vmatmul.msk.bf16.gmra.mxu3 %vm474_vm1, %v1195_v53 }
 0x1ae   : > { %v657_v61 = vadd.f32 %v656_v54, %v626_v58 }
 0x1af   : > { %v1041_v63 = vpop.f32.mrf.mxu2  ;;  %2374 = vxpose.binary.xlu1.c.b16.start.end [1/2] (short) %v2371_v39, %v2370_v48, 128 }
 0x1b0   : > { %v1042_v0 = vadd.f32 %v5353_v62, %v1041_v63 }
 0x1b1   : > { %v563_v1 = vpop.f32.mrf.mxu0 }
 0x1b2   : > { %v1109_v2 = vmax.f32 %v1042_v0, 0.0  ;;  %v564_v51 = vadd.f32 %v5353_v62, %v563_v1 }
 0x1b3   : > { %v5433_v3 = vpop.trf.xlu1  ;;  %v5435_v4 = vpop.trf.xlu0 }
 0x1b4   : > { %v1140_v7 = vadd.f32 %v1139_v57, %v1109_v2  ;;  %v627_v9 = vmax.f32 %v564_v51, 0.0 }
 0x1b6   : > { %v658_v15 = vadd.f32 %v657_v61, %v627_v9  ;;  %v5470_v61 = vpop.trf.xlu2 }
 0x1b7   : > { %v1043_v8 = vpop.f32.mrf.mxu2 }
 0x1b8   : > { %v1044_v52 = vadd.f32 %v5353_v62, %v1043_v8 }
 0x1b9   : > { %v566_v41 = vpop.f32.mrf.mxu0 }
 0x1ba   : > { %v1110_v12 = vmax.f32 %v1044_v52, 0.0  ;;  %v567_v13 = vadd.f32 %v5353_v62, %v566_v41 }
 0x1bb   : > { %v721_v42 = vpop.trf.xlu1  ;;  %v1197_v14 = vpop.trf.xlu0 }
 0x1bc   : > { %v1141_v16 = vadd.f32 %v1140_v7, %v1110_v12  ;;  %v628_v17 = vmax.f32 %v567_v13, 0.0  ;;  %4660 = vmatmul.msk.bf16.gmra.mxu0 %vm474_vm1, %v5340_v55  ;;  %4669 = vmatmul.msk.bf16.gmra.mxu1 %vm474_vm1, %v721_v42 }
 0x1bd   : > { %4693 = vmatmul.msk.bf16.gmra.mxu2 %vm474_vm1, %v5342_v56  ;;  %4702 = vmatmul.msk.bf16.gmra.mxu3 %vm474_vm1, %v1197_v14 }
 0x1be   : > { %v659_v21 = vadd.f32 %v658_v15, %v628_v17  ;;  %v5476_v12 = vpop.trf.xlu2 }
 0x1bf   : > { %v1046_v22 = vpop.f32.mrf.mxu2 }
 0x1c0   : > { %v1047_v23 = vadd.f32 %v5353_v62, %v1046_v22 }
 0x1c1   : > { %v568_v24 = vpop.f32.mrf.mxu0 }
 0x1c2   : > { %v1111_v26 = vmax.f32 %v1047_v23, 0.0  ;;  %v569_v29 = vadd.f32 %v5353_v62, %v568_v24 }
 0x1c3   : > { %v5449_v27 = vpop.trf.xlu1  ;;  %v5451_v28 = vpop.trf.xlu0 }
 0x1c4   : > { %v1142_v55 = vadd.f32 %v1141_v16, %v1111_v26  ;;  %v629_v32 = vmax.f32 %v569_v29, 0.0 }
 0x1c6   : > { %v660_v40 = vadd.f32 %v659_v21, %v629_v32 }
 0x1c7   : > { %v1048_v31 = vpop.f32.mrf.mxu2 }
 0x1c8   : > { %v1049_v56 = vadd.f32 %v5353_v62, %v1048_v31 }
 0x1c9   : > { %v571_v36 = vpop.f32.mrf.mxu0 }
 0x1ca   : > { %v1112_v37 = vmax.f32 %v1049_v56, 0.0  ;;  %v572_v38 = vadd.f32 %v5353_v62, %v571_v36 }
 0x1cb   : > { %v723_v48 = vpop.trf.xlu1  ;;  %v1199_v39 = vpop.trf.xlu0 }
 0x1cc   : > { %v1143_v43 = vadd.f32 %v1142_v55, %v1112_v37  ;;  %v630_v34 = vmax.f32 %v572_v38, 0.0  ;;  %4661 = vmatmul.msk.bf16.gmra.mxu0 %vm474_vm1, %v5346_v59  ;;  %4670 = vmatmul.msk.bf16.gmra.mxu1 %vm474_vm1, %v723_v48 }
 0x1cd   : > { %4694 = vmatmul.msk.bf16.gmra.mxu2 %vm474_vm1, %v5348_v60  ;;  %4703 = vmatmul.msk.bf16.gmra.mxu3 %vm474_vm1, %v1199_v39 }
 0x1ce   : > { %v661_v49 = vadd.f32 %v660_v40, %v630_v34 }
 0x1cf   : > { %v1051_v50 = vpop.f32.mrf.mxu2 }
 0x1d0   : > { %v1052_v35 = vadd.f32 %v5353_v62, %v1051_v50 }
 0x1d1   : > { %v573_v53 = vpop.f32.mrf.mxu0 }
 0x1d2   : > { %v1113_v54 = vmax.f32 %v1052_v35, 0.0  ;;  %v574_v59 = vadd.f32 %v5353_v62, %v573_v53 }
 0x1d3   : > { %v5467_v57 = vpop.trf.xlu0 }
 0x1d4   : > { %v1144_v58 = vadd.f32 %v1143_v43, %v1113_v54  ;;  %v631_v0 = vmax.f32 %v574_v59, 0.0 }
 0x1d6   : > { %v662_v9 = vadd.f32 %v661_v49, %v631_v0 }
 0x1d7   : > { %v1053_v63 = vpop.f32.mrf.mxu2 }
 0x1d8   : > { %v1054_v1 = vadd.f32 %v5353_v62, %v1053_v63 }
 0x1d9   : > { %v576_v60 = vpop.f32.mrf.mxu0  ;;  %v782_v2 = vpop.f32.mrf.mxu1 }
 0x1da   : > { %v1114_v7 = vmax.f32 %v1054_v1, 0.0  ;;  %v577_v51 = vadd.f32 %v5353_v62, %v576_v60  ;;  %v783_v42 = vadd.f32 %v5353_v62, %v782_v2 }
 0x1db   : > { %v1201_v8 = vpop.trf.xlu0 }
 0x1dc   : > { %v1145_v52 = vadd.f32 %v1144_v58, %v1114_v7  ;;  %v632_v41 = vmax.f32 %v577_v51, 0.0  ;;  %4671 = vmatmul.msk.bf16.gmra.mxu1 %vm474_vm1, %v5361_v5  ;;  %v862_v21 = vmax.f32 %v783_v42, 0.0 }
 0x1dd   : > { %4695 = vmatmul.msk.bf16.gmra.mxu2 %vm474_vm1, %v5363_v6  ;;  %4704 = vmatmul.msk.bf16.gmra.mxu3 %vm474_vm1, %v1201_v8  ;;  %v5487_v6 = vpop.trf.xlu2 }
 0x1de   : > { %v663_v13 = vadd.f32 %v662_v9, %v632_v41 }
 0x1e0   : > { %v1056_v14 = vpop.f32.mrf.mxu2 }
 0x1e1   : > { %v1057_v15 = vadd.f32 %v5353_v62, %v1056_v14  ;;  %v578_v16 = vpop.f32.mrf.mxu0  ;;  %v784_v17 = vpop.f32.mrf.mxu1 }
 0x1e2   : > { %v785_v22 = vadd.f32 %v5353_v62, %v784_v17  ;;  %v579_v24 = vadd.f32 %v5353_v62, %v578_v16 }
 0x1e3   : > { %v1115_v23 = vmax.f32 %v1057_v15, 0.0  ;;  %v5484_v5 = vpop.trf.xlu0 }
 0x1e4   : > { %v863_v26 = vmax.f32 %v785_v22, 0.0  ;;  %v633_v31 = vmax.f32 %v579_v24, 0.0 }
 0x1e5   : > { %v1146_v55 = vadd.f32 %v1145_v52, %v1115_v23  ;;  %v5495_v50 = vpop.trf.xlu2 }
 0x1e6   : > { %v894_v29 = vadd.f32 %v863_v26, %v862_v21  ;;  %v664_v43 = vadd.f32 %v663_v13, %v633_v31 }
 0x1e8   : > { %v1058_v32 = vpop.f32.mrf.mxu2 }
 0x1e9   : > { %v1059_v56 = vadd.f32 %v5353_v62, %v1058_v32  ;;  %v581_v36 = vpop.f32.mrf.mxu0  ;;  %v787_v37 = vpop.f32.mrf.mxu1 }
 0x1ea   : > { %v582_v38 = vadd.f32 %v5353_v62, %v581_v36  ;;  %v788_v48 = vadd.f32 %v5353_v62, %v787_v37 }
 0x1eb   : > { %v1116_v39 = vmax.f32 %v1059_v56, 0.0  ;;  %v1426_v40 = vpop.trf.xlu0 }
 0x1ec   : > { %v634_v34 = vmax.f32 %v582_v38, 0.0  ;;  %v864_v49 = vmax.f32 %v788_v48, 0.0  ;;  %4672 = vmatmul.msk.bf16.gmra.mxu1 %vm474_vm1, %v5374_v18  ;;  %4714 = vmatmul.msk.bf16.vlgmr.msrb.gmra.mxu0 %vm474_vm1, %v1426_v40 }
 0x1ed   : > { %v1147_v35 = vadd.f32 %v1146_v55, %v1116_v39  ;;  %4705 = vmatmul.msk.bf16.gmra.mxu3 %vm474_vm1, %v5376_v19  ;;  %4748 = vmatmul.msk.bf16.vlgmr.msrb.gmra.mxu2 %vm474_vm1, %v5443_v20  ;;  %v5508_v7 = vpop.trf.xlu2 }
 0x1ee   : > { %v665_v53 = vadd.f32 %v664_v43, %v634_v34  ;;  %v895_v54 = vadd.f32 %v894_v29, %v864_v49  ;;  %3887 = vmatpush.bf16.msrb.mxu2 %v5292_v25  ;;  %3409 = vmatpush.bf16.msrb.mxu0 %v5292_v25 }
 0x1f0   : > { %v1061_v58 = vpop.f32.mrf.mxu2  ;;  %v1260_v59 = vpop.f32.mrf.mxu3 }
 0x1f1   : > { %v1062_v18 = vadd.f32 %v5353_v62, %v1061_v58  ;;  %v583_v63 = vpop.f32.mrf.mxu0  ;;  %v789_v0 = vpop.f32.mrf.mxu1  ;;  %v1261_v9 = vadd.f32 %v5353_v62, %v1260_v59 }
 0x1f2   : > { %v790_v1 = vadd.f32 %v5353_v62, %v789_v0  ;;  %v584_v19 = vadd.f32 %v5353_v62, %v583_v63 }
 0x1f3   : > { %v1117_v60 = vmax.f32 %v1062_v18, 0.0  ;;  %v5505_v2 = vpop.trf.xlu0  ;;  %v1340_v22 = vmax.f32 %v1261_v9, 0.0 }
 0x1f4   : > { %v865_v20 = vmax.f32 %v790_v1, 0.0  ;;  %v635_v52 = vmax.f32 %v584_v19, 0.0 }
 0x1f5   : > { %v1148_v51 = vadd.f32 %v1147_v35, %v1117_v60  ;;  %v5518_v32 = vpop.trf.xlu2 }
 0x1f6   : > { %v896_v8 = vadd.f32 %v895_v54, %v865_v20  ;;  %v666_v55 = vadd.f32 %v665_v53, %v635_v52 }
 0x1f8   : > { %v1063_v41 = vpop.f32.mrf.mxu2  ;;  %v1262_v13 = vpop.f32.mrf.mxu3 }
 0x1f9   : > { %v1064_v42 = vadd.f32 %v5353_v62, %v1063_v41  ;;  %v1263_v14 = vadd.f32 %v5353_v62, %v1262_v13  ;;  %v586_v15 = vpop.f32.mrf.mxu0  ;;  %v792_v16 = vpop.f32.mrf.mxu1 }
 0x1fa   : > { %v587_v17 = vadd.f32 %v5353_v62, %v586_v15  ;;  %v793_v21 = vadd.f32 %v5353_v62, %v792_v16 }
 0x1fb   : > { %v1118_v23 = vmax.f32 %v1064_v42, 0.0  ;;  %v1341_v24 = vmax.f32 %v1263_v14, 0.0  ;;  %v1428_v26 = vpop.trf.xlu0 }
 0x1fc   : > { %v636_v29 = vmax.f32 %v587_v17, 0.0  ;;  %v866_v31 = vmax.f32 %v793_v21, 0.0  ;;  %4673 = vmatmul.msk.bf16.gmra.mxu1 %vm474_vm1, %v5389_v44  ;;  %4715 = vmatmul.msk.bf16.gmra.mxu0 %vm474_vm1, %v1428_v26  ;;  %v5545_v26 = vld.sshfl [vmem:[#allocation1] sm:$0xff pattern:$0x73625140] }
 0x1fd   : > { %v1149_v56 = vadd.f32 %v1148_v51, %v1118_v23  ;;  %v1372_v36 = vadd.f32 %v1341_v24, %v1340_v22  ;;  %4706 = vmatmul.msk.bf16.gmra.mxu3 %vm474_vm1, %v5391_v45  ;;  %4749 = vmatmul.msk.bf16.gmra.mxu2 %vm474_vm1, %v5461_v46  ;;  %v5530_v46 = vpop.trf.xlu2 }
 0x1fe   : > { %v667_v37 = vadd.f32 %v666_v55, %v636_v29  ;;  %v897_v38 = vadd.f32 %v896_v8, %v866_v31  ;;  %v5547_v55 = vld.sshfl [vmem:[#allocation1 + $0x8] sm:$0xff pattern:$0x73625140] }
 0x200   : > { %v1066_v48 = vpop.f32.mrf.mxu2  ;;  %v1265_v39 = vpop.f32.mrf.mxu3 }
 0x201   : > { %v1067_v40 = vadd.f32 %v5353_v62, %v1066_v48  ;;  %v1266_v44 = vadd.f32 %v5353_v62, %v1265_v39  ;;  %v588_v43 = vpop.f32.mrf.mxu0  ;;  %v794_v34 = vpop.f32.mrf.mxu1 }
 0x202   : > { %v795_v49 = vadd.f32 %v5353_v62, %v794_v34  ;;  %v589_v45 = vadd.f32 %v5353_v62, %v588_v43 }
 0x203   : > { %v1119_v35 = vmax.f32 %v1067_v40, 0.0  ;;  %v1342_v53 = vmax.f32 %v1266_v44, 0.0  ;;  %v5527_v54 = vpop.trf.xlu0 }
 0x204   : > { %v867_v58 = vmax.f32 %v795_v49, 0.0  ;;  %v637_v0 = vmax.f32 %v589_v45, 0.0 }
 0x205   : > { %v1150_v59 = vadd.f32 %v1149_v56, %v1119_v35  ;;  %v1373_v18 = vadd.f32 %v1372_v36, %v1342_v53  ;;  %v5539_v17 = vpop.trf.xlu2 }
 0x206   : > { %v898_v63 = vadd.f32 %v897_v38, %v867_v58  ;;  %v668_v14 = vadd.f32 %v667_v37, %v637_v0 }
 0x208   : > { %v1068_v1 = vpop.f32.mrf.mxu2  ;;  %v1267_v60 = vpop.f32.mrf.mxu3 }
 0x209   : > { %v1069_v19 = vadd.f32 %v5353_v62, %v1068_v1  ;;  %v1268_v20 = vadd.f32 %v5353_v62, %v1267_v60  ;;  %v591_v51 = vpop.f32.mrf.mxu0  ;;  %v797_v8 = vpop.f32.mrf.mxu1 }
 0x20a   : > { %v592_v9 = vadd.f32 %v5353_v62, %v591_v51  ;;  %v798_v52 = vadd.f32 %v5353_v62, %v797_v8 }
 0x20b   : > { %v1120_v41 = vmax.f32 %v1069_v19, 0.0  ;;  %v1343_v13 = vmax.f32 %v1268_v20, 0.0  ;;  %v1430_v42 = vpop.trf.xlu0 }
 0x20c   : > { %v638_v15 = vmax.f32 %v592_v9, 0.0  ;;  %v868_v16 = vmax.f32 %v798_v52, 0.0  ;;  %4674 = vmatmul.msk.bf16.gmra.mxu1 %vm474_vm1, %v5404_v10  ;;  %4716 = vmatmul.msk.bf16.gmra.mxu0 %vm474_vm1, %v1430_v42 }
 0x20d   : > { %v1151_v21 = vadd.f32 %v1150_v59, %v1120_v41  ;;  %v1374_v22 = vadd.f32 %v1373_v18, %v1343_v13  ;;  %4707 = vmatmul.msk.bf16.gmra.mxu3 %vm474_vm1, %v5406_v11  ;;  %4750 = vmatmul.msk.bf16.gmra.mxu2 %vm474_vm1, %v5476_v12  ;;  %v4815_v11 = vld [vmem:[%s5276_s14 + $0x28] sm:$0xf]  ;;  %v5556_v43 = vpop.trf.xlu2 }
 0x20e   : > { %v669_v23 = vadd.f32 %v668_v14, %v638_v15  ;;  %v899_v24 = vadd.f32 %v898_v63, %v868_v16  ;;  %2847 = vst [vmem:[#allocation1] ss:$4 sm:$0xff] %v4815_v11 }
 0x210   : > { %v1071_v10 = vpop.f32.mrf.mxu2  ;;  %v1270_v29 = vpop.f32.mrf.mxu3 }
 0x211   : > { %v1072_v31 = vadd.f32 %v5353_v62, %v1071_v10  ;;  %v1271_v56 = vadd.f32 %v5353_v62, %v1270_v29  ;;  %v593_v36 = vpop.f32.mrf.mxu0  ;;  %v799_v37 = vpop.f32.mrf.mxu1 }
 0x212   : > { %v800_v38 = vadd.f32 %v5353_v62, %v799_v37  ;;  %v594_v40 = vadd.f32 %v5353_v62, %v593_v36 }
 0x213   : > { %v1121_v48 = vmax.f32 %v1072_v31, 0.0  ;;  %v1344_v39 = vmax.f32 %v1271_v56, 0.0  ;;  %v5553_v12 = vpop.trf.xlu0 }
 0x214   : > { %v869_v44 = vmax.f32 %v800_v38, 0.0  ;;  %v639_v53 = vmax.f32 %v594_v40, 0.0 }
 0x215   : > { %v1152_v34 = vadd.f32 %v1151_v21, %v1121_v48  ;;  %v1375_v49 = vadd.f32 %v1374_v22, %v1344_v39  ;;  %v2848_v19 = vld.sshfl [vmem:[#allocation1] sm:$0xff pattern:$0x73625140]  ;;  %v2849_v9 = vld.sshfl [vmem:[#allocation1 + $0x8] sm:$0xff pattern:$0x73625140]  ;;  %v5565_v42 = vpop.trf.xlu2 }
 0x216   : > { %v900_v35 = vadd.f32 %v899_v24, %v869_v44  ;;  %v670_v52 = vadd.f32 %v669_v23, %v639_v53  ;;  %2852 = vxpose.binary.xlu2.c.b16.start.end [1/2] (short) %v2849_v9, %v2848_v19, 128 }
 0x218   : > { %v1073_v45 = vpop.f32.mrf.mxu2  ;;  %v1272_v58 = vpop.f32.mrf.mxu3 }
 0x219   : > { %v1074_v59 = vadd.f32 %v5353_v62, %v1073_v45  ;;  %v1273_v18 = vadd.f32 %v5353_v62, %v1272_v58  ;;  %v596_v63 = vpop.f32.mrf.mxu0  ;;  %v802_v0 = vpop.f32.mrf.mxu1 }
 0x21a   : > { %v597_v1 = vadd.f32 %v5353_v62, %v596_v63  ;;  %v803_v60 = vadd.f32 %v5353_v62, %v802_v0 }
 0x21b   : > { %v1122_v20 = vmax.f32 %v1074_v59, 0.0  ;;  %v1345_v51 = vmax.f32 %v1273_v18, 0.0  ;;  %v1432_v8 = vpop.trf.xlu0 }
 0x21c   : > { %v640_v41 = vmax.f32 %v597_v1, 0.0  ;;  %v870_v13 = vmax.f32 %v803_v60, 0.0  ;;  %4675 = vmatmul.msk.bf16.gmra.mxu1 %vm474_vm1, %v5418_v33  ;;  %4717 = vmatmul.msk.bf16.gmra.mxu0 %vm474_vm1, %v1432_v8 }
 0x21d   : > { %v1153_v14 = vadd.f32 %v1152_v34, %v1122_v20  ;;  %v1376_v15 = vadd.f32 %v1375_v49, %v1345_v51  ;;  %4708 = vmatmul.msk.bf16.gmra.mxu3 %vm474_vm1, %v5420_v47  ;;  %4751 = vmatmul.msk.bf16.gmra.mxu2 %vm474_vm1, %v5495_v50  ;;  %v5577_v38 = vpop.trf.xlu2 }
 0x21e   : > { %v671_v16 = vadd.f32 %v670_v52, %v640_v41  ;;  %v901_v21 = vadd.f32 %v900_v35, %v870_v13 }
 0x220   : > { %v1076_v22 = vpop.f32.mrf.mxu2  ;;  %v1275_v23 = vpop.f32.mrf.mxu3 }
 0x221   : > { %v1077_v24 = vadd.f32 %v5353_v62, %v1076_v22  ;;  %v1276_v33 = vadd.f32 %v5353_v62, %v1275_v23  ;;  %v598_v10 = vpop.f32.mrf.mxu0  ;;  %v804_v29 = vpop.f32.mrf.mxu1 }
 0x222   : > { %v805_v31 = vadd.f32 %v5353_v62, %v804_v29  ;;  %v599_v47 = vadd.f32 %v5353_v62, %v598_v10 }
 0x223   : > { %v1123_v56 = vmax.f32 %v1077_v24, 0.0  ;;  %v1346_v36 = vmax.f32 %v1276_v33, 0.0  ;;  %v5574_v37 = vpop.trf.xlu0 }
 0x224   : > { %v871_v50 = vmax.f32 %v805_v31, 0.0  ;;  %v641_v40 = vmax.f32 %v599_v47, 0.0 }
 0x225   : > { %v1154_v11 = vadd.f32 %v1153_v14, %v1123_v56  ;;  %v1377_v48 = vadd.f32 %v1376_v15, %v1346_v36  ;;  %v5586_v20 = vpop.trf.xlu2 }
 0x226   : > { %v902_v39 = vadd.f32 %v901_v21, %v871_v50  ;;  %v672_v1 = vadd.f32 %v671_v16, %v641_v40 }
 0x228   : > { %v1078_v44 = vpop.f32.mrf.mxu2  ;;  %v1277_v34 = vpop.f32.mrf.mxu3 }
 0x229   : > { %v1079_v49 = vadd.f32 %v5353_v62, %v1078_v44  ;;  %v1278_v35 = vadd.f32 %v5353_v62, %v1277_v34  ;;  %v601_v53 = vpop.f32.mrf.mxu0  ;;  %v807_v45 = vpop.f32.mrf.mxu1 }
 0x22a   : > { %v602_v58 = vadd.f32 %v5353_v62, %v601_v53  ;;  %v808_v59 = vadd.f32 %v5353_v62, %v807_v45 }
 0x22b   : > { %v1124_v18 = vmax.f32 %v1079_v49, 0.0  ;;  %v1347_v63 = vmax.f32 %v1278_v35, 0.0  ;;  %v1434_v0 = vpop.trf.xlu0 }
 0x22c   : > { %v642_v60 = vmax.f32 %v602_v58, 0.0  ;;  %v872_v19 = vmax.f32 %v808_v59, 0.0  ;;  %4676 = vmatmul.msk.bf16.gmra.mxu1 %vm474_vm1, %v5433_v3  ;;  %4718 = vmatmul.msk.bf16.gmra.mxu0 %vm474_vm1, %v1434_v0 }
 0x22d   : > { %v1155_v51 = vadd.f32 %v1154_v11, %v1124_v18  ;;  %v1378_v8 = vadd.f32 %v1377_v48, %v1347_v63  ;;  %4709 = vmatmul.msk.bf16.gmra.mxu3 %vm474_vm1, %v5435_v4  ;;  %4752 = vmatmul.msk.bf16.gmra.mxu2 %vm474_vm1, %v5518_v32  ;;  %v724_v32 = vpop.trf.xlu1  ;;  %v5598_v31 = vpop.trf.xlu2 }
 0x22e   : > { %v673_v9 = vadd.f32 %v672_v1, %v642_v60  ;;  %v903_v52 = vadd.f32 %v902_v39, %v872_v19 }
 0x230   : > { %v1081_v41 = vpop.f32.mrf.mxu2  ;;  %v1280_v13 = vpop.f32.mrf.mxu3 }
 0x231   : > { %v1082_v14 = vadd.f32 %v5353_v62, %v1081_v41  ;;  %v1281_v3 = vadd.f32 %v5353_v62, %v1280_v13  ;;  %v603_v15 = vpop.f32.mrf.mxu0  ;;  %v809_v16 = vpop.f32.mrf.mxu1 }
 0x232   : > { %v810_v21 = vadd.f32 %v5353_v62, %v809_v16  ;;  %v604_v4 = vadd.f32 %v5353_v62, %v603_v15 }
 0x233   : > { %v1125_v22 = vmax.f32 %v1082_v14, 0.0  ;;  %v1348_v23 = vmax.f32 %v1281_v3, 0.0  ;;  %v5595_v24 = vpop.trf.xlu0 }
 0x234   : > { %v873_v33 = vmax.f32 %v810_v21, 0.0  ;;  %v643_v36 = vmax.f32 %v604_v4, 0.0 }
 0x235   : > { %v1156_v10 = vadd.f32 %v1155_v51, %v1125_v22  ;;  %v1379_v29 = vadd.f32 %v1378_v8, %v1348_v23  ;;  %v5607_v18 = vpop.trf.xlu1  ;;  %v5613_v19 = vpop.trf.xlu2 }
 0x236   : > { %v904_v56 = vadd.f32 %v903_v52, %v873_v33  ;;  %v674_v45 = vadd.f32 %v673_v9, %v643_v36 }
 0x238   : > { %v1083_v47 = vpop.f32.mrf.mxu2  ;;  %v1282_v50 = vpop.f32.mrf.mxu3 }
 0x239   : > { %v1084_v11 = vadd.f32 %v5353_v62, %v1083_v47  ;;  %v1283_v48 = vadd.f32 %v5353_v62, %v1282_v50  ;;  %v606_v39 = vpop.f32.mrf.mxu0  ;;  %v812_v40 = vpop.f32.mrf.mxu1 }
 0x23a   : > { %v607_v44 = vadd.f32 %v5353_v62, %v606_v39  ;;  %v813_v34 = vadd.f32 %v5353_v62, %v812_v40 }
 0x23b   : > { %v1126_v49 = vmax.f32 %v1084_v11, 0.0  ;;  %v1349_v35 = vmax.f32 %v1283_v48, 0.0  ;;  %v1436_v53 = vpop.trf.xlu0 }
 0x23c   : > { %v644_v58 = vmax.f32 %v607_v44, 0.0  ;;  %v874_v59 = vmax.f32 %v813_v34, 0.0  ;;  %4677 = vmatmul.msk.bf16.gmra.mxu1 %vm474_vm1, %v5449_v27  ;;  %4719 = vmatmul.msk.bf16.gmra.mxu0 %vm474_vm1, %v1436_v53 }
 0x23d   : > { %v1157_v63 = vadd.f32 %v1156_v10, %v1126_v49  ;;  %v1380_v0 = vadd.f32 %v1379_v29, %v1349_v35  ;;  %4710 = vmatmul.msk.bf16.gmra.mxu3 %vm474_vm1, %v5451_v28  ;;  %4753 = vmatmul.msk.bf16.gmra.mxu2 %vm474_vm1, %v5539_v17  ;;  %v5621_v16 = vpop.trf.xlu1  ;;  %v5623_v4 = vpop.trf.xlu2 }
 0x23e   : > { %v675_v1 = vadd.f32 %v674_v45, %v644_v58  ;;  %v905_v60 = vadd.f32 %v904_v56, %v874_v59 }
 0x240   : > { %v1086_v51 = vpop.f32.mrf.mxu2  ;;  %v1285_v8 = vpop.f32.mrf.mxu3 }
 0x241   : > { %v1087_v27 = vadd.f32 %v5353_v62, %v1086_v51  ;;  %v1286_v9 = vadd.f32 %v5353_v62, %v1285_v8  ;;  %v608_v52 = vpop.f32.mrf.mxu0  ;;  %v814_v41 = vpop.f32.mrf.mxu1 }
 0x242   : > { %v815_v13 = vadd.f32 %v5353_v62, %v814_v41  ;;  %v609_v17 = vadd.f32 %v5353_v62, %v608_v52 }
 0x243   : > { %v1127_v14 = vmax.f32 %v1087_v27, 0.0  ;;  %v1350_v3 = vmax.f32 %v1286_v9, 0.0  ;;  %v5618_v28 = vpop.trf.xlu0 }
 0x244   : > { %v875_v15 = vmax.f32 %v815_v13, 0.0  ;;  %v645_v33 = vmax.f32 %v609_v17, 0.0 }
 0x245   : > { %v1158_v21 = vadd.f32 %v1157_v63, %v1127_v14  ;;  %v1381_v22 = vadd.f32 %v1380_v0, %v1350_v3  ;;  %v5631_v53 = vpop.trf.xlu1  ;;  %v5639_v0 = vpop.trf.xlu2 }
 0x246   : > { %v906_v23 = vadd.f32 %v905_v60, %v875_v15  ;;  %v676_v34 = vadd.f32 %v675_v1, %v645_v33 }
 0x248   : > { %v1088_v10 = vpop.f32.mrf.mxu2  ;;  %v1287_v29 = vpop.f32.mrf.mxu3 }
 0x249   : > { %v1089_v56 = vadd.f32 %v5353_v62, %v1088_v10  ;;  %v1288_v36 = vadd.f32 %v5353_v62, %v1287_v29  ;;  %v611_v47 = vpop.f32.mrf.mxu0  ;;  %v817_v50 = vpop.f32.mrf.mxu1 }
 0x24a   : > { %v612_v11 = vadd.f32 %v5353_v62, %v611_v47  ;;  %v818_v48 = vadd.f32 %v5353_v62, %v817_v50 }
 0x24b   : > { %v1128_v39 = vmax.f32 %v1089_v56, 0.0  ;;  %v1351_v40 = vmax.f32 %v1288_v36, 0.0  ;;  %v1438_v44 = vpop.trf.xlu0 }
 0x24c   : > { %v646_v49 = vmax.f32 %v612_v11, 0.0  ;;  %v876_v35 = vmax.f32 %v818_v48, 0.0  ;;  %4678 = vmatmul.msk.bf16.gmra.mxu1 %vm474_vm1, %v724_v32  ;;  %4720 = vmatmul.msk.bf16.gmra.mxu0 %vm474_vm1, %v1438_v44 }
 0x24d   : > { %v1159_v45 = vadd.f32 %v1158_v21, %v1128_v39  ;;  %v1382_v58 = vadd.f32 %v1381_v22, %v1351_v40  ;;  %4711 = vmatmul.msk.bf16.gmra.mxu3 %vm474_vm1, %v5467_v57  ;;  %4754 = vmatmul.msk.bf16.gmra.mxu2 %vm474_vm1, %v5565_v42  ;;  %v5646_v42 = vpop.trf.xlu1  ;;  %v5648_v17 = vpop.trf.xlu2 }
 0x24e   : > { %v5637_v59 = vadd.f32 %v676_v34, %v646_v49  ;;  %v907_v63 = vadd.f32 %v906_v23, %v876_v35  ;;  %v5654_v23 = vld [vmem:[%s6941_s2] ss:$0 sm:$0xff] }
 0x250   : > { %v1091_v1 = vpop.f32.mrf.mxu2  ;;  %v1290_v60 = vpop.f32.mrf.mxu3 }
 0x251   : > { %v1092_v32 = vadd.f32 %v5353_v62, %v1091_v1  ;;  %v1291_v51 = vadd.f32 %v5353_v62, %v1290_v60  ;;  %v819_v8 = vpop.f32.mrf.mxu1  ;;  %v5670_v49 = vpop.f32.mrf.mxu0 }
 0x252   : > { %v820_v27 = vadd.f32 %v5353_v62, %v819_v8 }
 0x253   : > { %v1129_v9 = vmax.f32 %v1092_v32, 0.0  ;;  %v1352_v52 = vmax.f32 %v1291_v51, 0.0  ;;  %v5644_v57 = vpop.trf.xlu0 }
 0x254   : > { %v877_v41 = vmax.f32 %v820_v27, 0.0 }
 0x255   : > { %v1160_v13 = vadd.f32 %v1159_v45, %v1129_v9  ;;  %v1383_v14 = vadd.f32 %v1382_v58, %v1352_v52  ;;  %v5668_v40 = vpop.trf.xlu2 }
 0x256   : > { %v908_v3 = vadd.f32 %v907_v63, %v877_v41 }
 0x258   : > { %v1093_v15 = vpop.f32.mrf.mxu2  ;;  %v1292_v21 = vpop.f32.mrf.mxu3 }
 0x259   : > { %v1094_v22 = vadd.f32 %v5353_v62, %v1093_v15  ;;  %v1293_v33 = vadd.f32 %v5654_v23, %v1292_v21  ;;  %v822_v10 = vpop.f32.mrf.mxu1  ;;  %v5661_v62 = vpop.trf.xlu1 }
 0x25a   : > { %v823_v29 = vadd.f32 %v5654_v23, %v822_v10 }
 0x25b   : > { %v1130_v56 = vmax.f32 %v1094_v22, 0.0  ;;  %v1353_v36 = vmax.f32 %v1293_v33, 0.0  ;;  %v1440_v47 = vpop.trf.xlu0 }
 0x25c   : > { %v878_v50 = vmax.f32 %v823_v29, 0.0  ;;  %4721 = vmatmul.msk.bf16.gmra.mxu0 %vm474_vm1, %v1440_v47  ;;  %4731 = vmatmul.msk.bf16.vlgmr.msrb.gmra.mxu1 %vm474_vm1, %v5607_v18 }
 0x25d   : > { %v1161_v11 = vadd.f32 %v1160_v13, %v1130_v56  ;;  %v1384_v48 = vadd.f32 %v1383_v14, %v1353_v36  ;;  %4712 = vmatmul.msk.bf16.gmra.mxu3 %vm474_vm1, %v5484_v5  ;;  %4755 = vmatmul.msk.bf16.gmra.mxu2 %vm474_vm1, %v5586_v20  ;;  %v5677_v8 = vpop.trf.xlu2 }
 0x25e   : > { %v909_v39 = vadd.f32 %v908_v3, %v878_v50  ;;  %3648 = vmatpush.bf16.msrb.mxu1 %v5292_v25 }
 0x260   : > { %v1096_v44 = vpop.f32.mrf.mxu2  ;;  %v1295_v34 = vpop.f32.mrf.mxu3 }
 0x261   : > { %v1097_v18 = vadd.f32 %v5654_v23, %v1096_v44  ;;  %v1296_v35 = vadd.f32 %v5654_v23, %v1295_v34  ;;  %v824_v45 = vpop.f32.mrf.mxu1  ;;  %v5675_v20 = vpop.trf.xlu1 }
 0x262   : > { %v825_v58 = vadd.f32 %v5654_v23, %v824_v45 }
 0x263   : > { %v1131_v5 = vmax.f32 %v1097_v18, 0.0  ;;  %v1354_v63 = vmax.f32 %v1296_v35, 0.0 }
 0x264   : > { %v879_v1 = vmax.f32 %v825_v58, 0.0 }
 0x265   : > { %v1162_v60 = vadd.f32 %v1161_v11, %v1131_v5  ;;  %v1385_v32 = vadd.f32 %v1384_v48, %v1354_v63 }
 0x266   : > { %v910_v51 = vadd.f32 %v909_v39, %v879_v1 }
 0x268   : > { %v1098_v27 = vpop.f32.mrf.mxu2  ;;  %v1297_v9 = vpop.f32.mrf.mxu3 }
 0x269   : > { %v1099_v52 = vadd.f32 %v5654_v23, %v1098_v27  ;;  %v1298_v41 = vadd.f32 %v5654_v23, %v1297_v9  ;;  %v827_v13 = vpop.f32.mrf.mxu1  ;;  %v1499_v14 = vpop.f32.mrf.mxu0 }
 0x26a   : > { %v828_v3 = vadd.f32 %v5654_v23, %v827_v13  ;;  %v5686_v33 = vpop.trf.xlu1  ;;  %v1500_v36 = vadd.f32 %v5654_v23, %v1499_v14 }
 0x26b   : > { %v1132_v15 = vmax.f32 %v1099_v52, 0.0  ;;  %v1355_v21 = vmax.f32 %v1298_v41, 0.0 }
 0x26c   : > { %v880_v22 = vmax.f32 %v828_v3, 0.0  ;;  %4722 = vmatmul.msk.bf16.gmra.mxu0 %vm474_vm1, %v5505_v2  ;;  %4732 = vmatmul.msk.bf16.gmra.mxu1 %vm474_vm1, %v5631_v53  ;;  %v5696_v2 = vpop.trf.xlu2  ;;  %v1579_v39 = vmax.f32 %v1500_v36, 0.0 }
 0x26d   : > { %v5688_v10 = vadd.f32 %v1162_v60, %v1132_v15  ;;  %v1386_v29 = vadd.f32 %v1385_v32, %v1355_v21  ;;  %4756 = vmatmul.msk.bf16.gmra.mxu2 %vm474_vm1, %v5454_v30  ;;  %4765 = vmatmul.msk.bf16.vlgmr.msrb.gmra.mxu3 %vm474_vm1, %v5613_v19 }
 0x26e   : > { %v911_v56 = vadd.f32 %v910_v51, %v880_v22  ;;  %4126 = vmatpush.bf16.msrb.mxu3 %v5292_v25 }
 0x270   : > { %v1300_v47 = vpop.f32.mrf.mxu3  ;;  %v1977_v53 = vpop.f32.mrf.mxu2 }
 0x271   : > { %v1301_v50 = vadd.f32 %v5654_v23, %v1300_v47  ;;  %v829_v11 = vpop.f32.mrf.mxu1  ;;  %v1501_v48 = vpop.f32.mrf.mxu0  ;;  %v1978_v5 = vadd.f32 %v5654_v23, %v1977_v53 }
 0x272   : > { %v830_v44 = vadd.f32 %v5654_v23, %v829_v11  ;;  %v1502_v30 = vadd.f32 %v5654_v23, %v1501_v48  ;;  %v5701_v35 = vpop.trf.xlu1 }
 0x273   : > { %v1356_v34 = vmax.f32 %v1301_v50, 0.0  ;;  %v2057_v13 = vmax.f32 %v1978_v5, 0.0 }
 0x274   : > { %v881_v19 = vmax.f32 %v830_v44, 0.0  ;;  %v1580_v18 = vmax.f32 %v1502_v30, 0.0  ;;  %v5704_v63 = vpop.trf.xlu2 }
 0x275   : > { %v1387_v45 = vadd.f32 %v1386_v29, %v1356_v34 }
 0x276   : > { %v912_v25 = vadd.f32 %v911_v56, %v881_v19  ;;  %v1611_v58 = vadd.f32 %v1580_v18, %v1579_v39 }
 0x278   : > { %v1302_v1 = vpop.f32.mrf.mxu3  ;;  %v1979_v60 = vpop.f32.mrf.mxu2 }
 0x279   : > { %v1303_v32 = vadd.f32 %v5654_v23, %v1302_v1  ;;  %v1980_v51 = vadd.f32 %v5654_v23, %v1979_v60  ;;  %v832_v27 = vpop.f32.mrf.mxu1  ;;  %v1504_v9 = vpop.f32.mrf.mxu0  ;;  %v4832_v60 = vld [vmem:[%s5276_s14 + $0x2c] sm:$0xf] }
 0x27a   : > { %v833_v52 = vadd.f32 %v5654_v23, %v832_v27  ;;  %v1505_v41 = vadd.f32 %v5654_v23, %v1504_v9  ;;  %v5718_v56 = vpop.trf.xlu1  ;;  %3086 = vst [vmem:[#allocation1] ss:$4 sm:$0xff] %v4832_v60 }
 0x27b   : > { %v1357_v14 = vmax.f32 %v1303_v32, 0.0  ;;  %v2058_v3 = vmax.f32 %v1980_v51, 0.0 }
 0x27c   : > { %v882_v15 = vmax.f32 %v833_v52, 0.0  ;;  %v1581_v21 = vmax.f32 %v1505_v41, 0.0  ;;  %4723 = vmatmul.msk.bf16.gmra.mxu0 %vm474_vm1, %v5527_v54  ;;  %4733 = vmatmul.msk.bf16.gmra.mxu1 %vm474_vm1, %v5661_v62  ;;  %v5720_v53 = vpop.trf.xlu2 }
 0x27d   : > { %v1388_v22 = vadd.f32 %v1387_v45, %v1357_v14  ;;  %v2089_v29 = vadd.f32 %v2058_v3, %v2057_v13  ;;  %4757 = vmatmul.msk.bf16.gmra.mxu2 %vm474_vm1, %v5470_v61  ;;  %4766 = vmatmul.msk.bf16.gmra.mxu3 %vm474_vm1, %v5639_v0 }
 0x27e   : > { %v913_v36 = vadd.f32 %v912_v25, %v882_v15  ;;  %v1612_v47 = vadd.f32 %v1611_v58, %v1581_v21 }
 0x280   : > { %v1305_v50 = vpop.f32.mrf.mxu3  ;;  %v1982_v11 = vpop.f32.mrf.mxu2 }
 0x281   : > { %v1306_v54 = vadd.f32 %v5654_v23, %v1305_v50  ;;  %v1983_v62 = vadd.f32 %v5654_v23, %v1982_v11  ;;  %v834_v48 = vpop.f32.mrf.mxu1  ;;  %v1506_v39 = vpop.f32.mrf.mxu0 }
 0x282   : > { %v835_v61 = vadd.f32 %v5654_v23, %v834_v48  ;;  %v1507_v44 = vadd.f32 %v5654_v23, %v1506_v39  ;;  %v5726_v5 = vpop.trf.xlu1  ;;  %v3088_v48 = vld.sshfl [vmem:[#allocation1 + $0x8] sm:$0xff pattern:$0x73625140] }
 0x283   : > { %v1358_v0 = vmax.f32 %v1306_v54, 0.0  ;;  %v2059_v30 = vmax.f32 %v1983_v62, 0.0  ;;  %v3087_v62 = vld.sshfl [vmem:[#allocation1] sm:$0xff pattern:$0x73625140] }
 0x284   : > { %v883_v34 = vmax.f32 %v835_v61, 0.0  ;;  %v1582_v19 = vmax.f32 %v1507_v44, 0.0  ;;  %v5728_v1 = vpop.trf.xlu2  ;;  %3091 = vxpose.binary.xlu0.c.b16.start.end [1/2] (short) %v3088_v48, %v3087_v62, 128  ;;  %v4883_v62 = vld [vmem:[%s5276_s14 + $0x38] sm:$0xf] }
 0x285   : > { %v1389_v18 = vadd.f32 %v1388_v22, %v1358_v0  ;;  %v2090_v45 = vadd.f32 %v2089_v29, %v2059_v30  ;;  %v4849_v29 = vld [vmem:[%s5276_s14 + $0x30] sm:$0xf] }
 0x286   : > { %v914_v25 = vadd.f32 %v913_v36, %v883_v34  ;;  %v1613_v58 = vadd.f32 %v1612_v47, %v1582_v19  ;;  %3325 = vst [vmem:[#allocation1] ss:$4 sm:$0xff] %v4849_v29 }
 0x288   : > { %v1307_v32 = vpop.f32.mrf.mxu3  ;;  %v1984_v51 = vpop.f32.mrf.mxu2 }
 0x289   : > { %v1308_v27 = vadd.f32 %v5654_v23, %v1307_v32  ;;  %v1985_v9 = vadd.f32 %v5654_v23, %v1984_v51  ;;  %v837_v52 = vpop.f32.mrf.mxu1  ;;  %v1509_v41 = vpop.f32.mrf.mxu0 }
 0x28a   : > { %v838_v13 = vadd.f32 %v5654_v23, %v837_v52  ;;  %v1510_v14 = vadd.f32 %v5654_v23, %v1509_v41  ;;  %v5750_v19 = vpop.trf.xlu1 }
 0x28b   : > { %v1359_v3 = vmax.f32 %v1308_v27, 0.0  ;;  %v2060_v15 = vmax.f32 %v1985_v9, 0.0 }
 0x28c   : > { %v884_v21 = vmax.f32 %v838_v13, 0.0  ;;  %v1583_v22 = vmax.f32 %v1510_v14, 0.0  ;;  %4724 = vmatmul.msk.bf16.gmra.mxu0 %vm474_vm1, %v5553_v12  ;;  %4734 = vmatmul.msk.bf16.gmra.mxu1 %vm474_vm1, %v5686_v33  ;;  %v5744_v54 = vpop.trf.xlu2 }
 0x28d   : > { %v1390_v36 = vadd.f32 %v1389_v18, %v1359_v3  ;;  %v2091_v47 = vadd.f32 %v2090_v45, %v2060_v15  ;;  %4758 = vmatmul.msk.bf16.gmra.mxu2 %vm474_vm1, %v5487_v6  ;;  %4767 = vmatmul.msk.bf16.gmra.mxu3 %vm474_vm1, %v5668_v40  ;;  %v5753_v27 = vld.sshfl [vmem:[#allocation1] sm:$0xff pattern:$0x73625140]  ;;  %v5755_v9 = vld.sshfl [vmem:[#allocation1 + $0x8] sm:$0xff pattern:$0x73625140] }
 0x28e   : > { %v915_v50 = vadd.f32 %v914_v25, %v884_v21  ;;  %v1614_v11 = vadd.f32 %v1613_v58, %v1583_v22  ;;  %v4866_v25 = vld [vmem:[%s5276_s14 + $0x34] sm:$0xf] }
 0x28f   : > { %3564 = vst [vmem:[#allocation1] ss:$4 sm:$0xff] %v4866_v25 }
 0x290   : > { %v1310_v12 = vpop.f32.mrf.mxu3  ;;  %v1987_v39 = vpop.f32.mrf.mxu2 }
 0x291   : > { %v1311_v33 = vadd.f32 %v5654_v23, %v1310_v12  ;;  %v1988_v61 = vadd.f32 %v5654_v23, %v1987_v39  ;;  %v839_v44 = vpop.f32.mrf.mxu1  ;;  %v1511_v6 = vpop.f32.mrf.mxu0 }
 0x292   : > { %v840_v0 = vadd.f32 %v5654_v23, %v839_v44  ;;  %v1512_v40 = vadd.f32 %v5654_v23, %v1511_v6  ;;  %v5772_v39 = vpop.trf.xlu1 }
 0x293   : > { %v1360_v30 = vmax.f32 %v1311_v33, 0.0  ;;  %v2061_v34 = vmax.f32 %v1988_v61, 0.0 }
 0x294   : > { %v885_v18 = vmax.f32 %v840_v0, 0.0  ;;  %v1584_v45 = vmax.f32 %v1512_v40, 0.0  ;;  %v5757_v52 = vpop.trf.xlu2 }
 0x295   : > { %v1391_v58 = vadd.f32 %v1390_v36, %v1360_v30  ;;  %v2092_v60 = vadd.f32 %v2091_v47, %v2061_v34 }
 0x296   : > { %v916_v32 = vadd.f32 %v915_v50, %v885_v18  ;;  %v1615_v51 = vadd.f32 %v1614_v11, %v1584_v45  ;;  %2613 = vxpose.binary.xlu2.c.b16.start.end [1/2] (short) %v5547_v55, %v5545_v26, 128  ;;  %v5778_v44 = vld.sshfl [vmem:[#allocation1 + $0x8] sm:$0xff pattern:$0x73625140] }
 0x298   : > { %v1312_v41 = vpop.f32.mrf.mxu3  ;;  %v1989_v13 = vpop.f32.mrf.mxu2 }
 0x299   : > { %v1313_v14 = vadd.f32 %v5654_v23, %v1312_v41  ;;  %v1990_v3 = vadd.f32 %v5654_v23, %v1989_v13  ;;  %v842_v15 = vpop.f32.mrf.mxu1  ;;  %v1514_v21 = vpop.f32.mrf.mxu0 }
 0x29a   : > { %v843_v22 = vadd.f32 %v5654_v23, %v842_v15  ;;  %v1515_v29 = vadd.f32 %v5654_v23, %v1514_v21  ;;  %v1677_v41 = vpop.trf.xlu1 }
 0x29b   : > { %v1361_v36 = vmax.f32 %v1313_v14, 0.0  ;;  %v2062_v47 = vmax.f32 %v1990_v3, 0.0 }
 0x29c   : > { %v886_v50 = vmax.f32 %v843_v22, 0.0  ;;  %v1585_v11 = vmax.f32 %v1515_v29, 0.0  ;;  %4725 = vmatmul.msk.bf16.gmra.mxu0 %vm474_vm1, %v5574_v37  ;;  %4735 = vmatmul.msk.bf16.gmra.mxu1 %vm474_vm1, %v5718_v56  ;;  %v5776_v37 = vld.sshfl [vmem:[#allocation1] sm:$0xff pattern:$0x73625140]  ;;  %v5780_v56 = vpop.trf.xlu2 }
 0x29d   : > { %v1392_v48 = vadd.f32 %v1391_v58, %v1361_v36  ;;  %v2093_v12 = vadd.f32 %v2092_v60, %v2062_v47  ;;  %4759 = vmatmul.msk.bf16.gmra.mxu2 %vm474_vm1, %v5508_v7  ;;  %4768 = vmatmul.msk.bf16.gmra.mxu3 %vm474_vm1, %v5696_v2  ;;  %3803 = vst [vmem:[#allocation1] ss:$4 sm:$0xff] %v4883_v62 }
 0x29e   : > { %v917_v33 = vadd.f32 %v916_v32, %v886_v50  ;;  %v1616_v61 = vadd.f32 %v1615_v51, %v1585_v11 }
 0x2a0   : > { %v1315_v6 = vpop.f32.mrf.mxu3  ;;  %v1992_v0 = vpop.f32.mrf.mxu2 }
 0x2a1   : > { %v1316_v7 = vadd.f32 %v5654_v23, %v1315_v6  ;;  %v1993_v2 = vadd.f32 %v5654_v23, %v1992_v0  ;;  %v844_v40 = vpop.f32.mrf.mxu1  ;;  %v1516_v30 = vpop.f32.mrf.mxu0 }
 0x2a2   : > { %v845_v34 = vadd.f32 %v5654_v23, %v844_v40  ;;  %v1517_v18 = vadd.f32 %v5654_v23, %v1516_v30 }
 0x2a3   : > { %v1362_v26 = vmax.f32 %v1316_v7, 0.0  ;;  %v2063_v55 = vmax.f32 %v1993_v2, 0.0 }
 0x2a4   : > { %v887_v45 = vmax.f32 %v845_v34, 0.0  ;;  %v1586_v25 = vmax.f32 %v1517_v18, 0.0  ;;  %v5786_v13 = vpop.trf.xlu2 }
 0x2a5   : > { %v1393_v58 = vadd.f32 %v1392_v48, %v1362_v26  ;;  %v2094_v60 = vadd.f32 %v2093_v12, %v2063_v55 }
 0x2a6   : > { %v918_v32 = vadd.f32 %v917_v33, %v887_v45  ;;  %v1617_v51 = vadd.f32 %v1616_v61, %v1586_v25 }
 0x2a8   : > { %v1317_v14 = vpop.f32.mrf.mxu3  ;;  %v1994_v3 = vpop.f32.mrf.mxu2 }
 0x2a9   : > { %v1318_v15 = vadd.f32 %v5654_v23, %v1317_v14  ;;  %v1995_v21 = vadd.f32 %v5654_v23, %v1994_v3  ;;  %v847_v22 = vpop.f32.mrf.mxu1  ;;  %v1519_v29 = vpop.f32.mrf.mxu0 }
 0x2aa   : > { %v848_v36 = vadd.f32 %v5654_v23, %v847_v22  ;;  %v1520_v47 = vadd.f32 %v5654_v23, %v1519_v29 }
 0x2ab   : > { %v1363_v50 = vmax.f32 %v1318_v15, 0.0  ;;  %v2064_v11 = vmax.f32 %v1995_v21, 0.0 }
 0x2ac   : > { %v888_v62 = vmax.f32 %v848_v36, 0.0  ;;  %v1587_v48 = vmax.f32 %v1520_v47, 0.0  ;;  %4726 = vmatmul.msk.bf16.gmra.mxu0 %vm474_vm1, %v5595_v24  ;;  %4736 = vmatmul.msk.bf16.gmra.mxu1 %vm474_vm1, %v5750_v19  ;;  %v5800_v0 = vpop.trf.xlu2 }
 0x2ad   : > { %v1394_v12 = vadd.f32 %v1393_v58, %v1363_v50  ;;  %v2095_v33 = vadd.f32 %v2094_v60, %v2064_v11  ;;  %4760 = vmatmul.msk.bf16.gmra.mxu2 %vm474_vm1, %v5530_v46  ;;  %4769 = vmatmul.msk.bf16.gmra.mxu3 %vm474_vm1, %v5720_v53  ;;  %v5806_v46 = vpop.trf.xlu1 }
 0x2ae   : > { %v919_v61 = vadd.f32 %v918_v32, %v888_v62  ;;  %v1618_v6 = vadd.f32 %v1617_v51, %v1587_v48 }
 0x2b0   : > { %v1320_v7 = vpop.f32.mrf.mxu3  ;;  %v1997_v2 = vpop.f32.mrf.mxu2 }
 0x2b1   : > { %v1321_v40 = vadd.f32 %v5654_v23, %v1320_v7  ;;  %v1998_v24 = vadd.f32 %v5654_v23, %v1997_v2  ;;  %v849_v30 = vpop.f32.mrf.mxu1  ;;  %v1521_v19 = vpop.f32.mrf.mxu0 }
 0x2b2   : > { %v850_v34 = vadd.f32 %v5654_v23, %v849_v30  ;;  %v1522_v18 = vadd.f32 %v5654_v23, %v1521_v19 }
 0x2b3   : > { %v1364_v26 = vmax.f32 %v1321_v40, 0.0  ;;  %v2065_v53 = vmax.f32 %v1998_v24, 0.0  ;;  %v614_v40 = vadd.f32 %v5654_v23, %v5670_v49 }
 0x2b4   : > { %v889_v55 = vmax.f32 %v850_v34, 0.0  ;;  %v1588_v45 = vmax.f32 %v1522_v18, 0.0  ;;  %v5808_v51 = vpop.trf.xlu2 }
 0x2b5   : > { %v1395_v25 = vadd.f32 %v1394_v12, %v1364_v26  ;;  %v2096_v58 = vadd.f32 %v2095_v33, %v2065_v53  ;;  %v1679_v12 = vpop.trf.xlu1  ;;  %v647_v53 = vmax.f32 %v614_v40, 0.0  ;;  %v1164_v40 = vrot.slane %v5688_v10, 4 }
 0x2b6   : > { %v920_v60 = vadd.f32 %v919_v61, %v889_v55  ;;  %v1619_v32 = vadd.f32 %v1618_v6, %v1588_v45 }
 0x2b8   : > { %v1322_v14 = vpop.f32.mrf.mxu3  ;;  %v1999_v3 = vpop.f32.mrf.mxu2 }
 0x2b9   : > { %v1323_v15 = vadd.f32 %v5654_v23, %v1322_v14  ;;  %v2000_v21 = vadd.f32 %v5654_v23, %v1999_v3  ;;  %v852_v22 = vpop.f32.mrf.mxu1  ;;  %v1524_v29 = vpop.f32.mrf.mxu0  ;;  %v678_v3 = vadd.f32 %v5637_v59, %v647_v53 }
 0x2ba   : > { %v853_v36 = vadd.f32 %v5654_v23, %v852_v22  ;;  %v1525_v47 = vadd.f32 %v5654_v23, %v1524_v29 }
 0x2bb   : > { %v1365_v50 = vmax.f32 %v1323_v15, 0.0  ;;  %v2066_v11 = vmax.f32 %v2000_v21, 0.0  ;;  %v5162_v15 = vmov 256.0  }
 0x2bc   : > { %v890_v62 = vmax.f32 %v853_v36, 0.0  ;;  %v1589_v48 = vmax.f32 %v1525_v47, 0.0  ;;  %4727 = vmatmul.msk.bf16.gmra.mxu0 %vm474_vm1, %v5618_v28  ;;  %4737 = vmatmul.msk.bf16.gmra.mxu1 %vm474_vm1, %v1677_v41  ;;  %v5821_v2 = vpop.trf.xlu2  ;;  %5091 = vrcp.f32 %v5162_v15 }
 0x2bd   : > { %v1396_v33 = vadd.f32 %v1395_v25, %v1365_v50  ;;  %v2097_v61 = vadd.f32 %v2096_v58, %v2066_v11  ;;  %4761 = vmatmul.msk.bf16.gmra.mxu2 %vm474_vm1, %v5556_v43  ;;  %4770 = vmatmul.msk.bf16.gmra.mxu3 %vm474_vm1, %v5744_v54  ;;  %v5829_v25 = vpop.trf.xlu1 }
 0x2be   : > { %v921_v6 = vadd.f32 %v920_v60, %v890_v62  ;;  %v1620_v7 = vadd.f32 %v1619_v32, %v1589_v48 }
 0x2c0   : > { %v1325_v24 = vpop.f32.mrf.mxu3  ;;  %v2002_v28 = vpop.f32.mrf.mxu2 }
 0x2c1   : > { %v1326_v41 = vadd.f32 %v5654_v23, %v1325_v24  ;;  %v2003_v30 = vadd.f32 %v5654_v23, %v2002_v28  ;;  %v854_v19 = vpop.f32.mrf.mxu1  ;;  %v1526_v34 = vpop.f32.mrf.mxu0 }
 0x2c2   : > { %v855_v43 = vadd.f32 %v5654_v23, %v854_v19  ;;  %v1527_v18 = vadd.f32 %v5654_v23, %v1526_v34 }
 0x2c3   : > { %v1366_v54 = vmax.f32 %v1326_v41, 0.0  ;;  %v2067_v26 = vmax.f32 %v2003_v30, 0.0  ;;  %v5848_v41 = vpop.eup %5091 }
 0x2c4   : > { %v891_v55 = vmax.f32 %v855_v43, 0.0  ;;  %v1590_v45 = vmax.f32 %v1527_v18, 0.0  ;;  %v5831_v14 = vpop.trf.xlu2  ;;  %v686_v18 = vmul.f32 256.0, %v5848_v41  ;;  %vm690_vm2 = vweird.f32 %v5848_v41 }
 0x2c5   : > { %v1397_v49 = vadd.f32 %v1396_v33, %v1366_v54  ;;  %v2098_v58 = vadd.f32 %v2097_v61, %v2067_v26  ;;  %v679_v61 = vrot.slane %v678_v3, 4  ;;  %v5841_v59 = vpop.trf.xlu1  ;;  %v1165_v54 = vadd.f32 %v1164_v40, %v5688_v10 }
 0x2c6   : > { %v922_v60 = vadd.f32 %v921_v6, %v891_v55  ;;  %v1621_v32 = vadd.f32 %v1620_v7, %v1590_v45 }
 0x2c8   : > { %v1327_v21 = vpop.f32.mrf.mxu3  ;;  %v2004_v22 = vpop.f32.mrf.mxu2 }
 0x2c9   : > { %v1328_v29 = vadd.f32 %v5654_v23, %v1327_v21  ;;  %v2005_v36 = vadd.f32 %v5654_v23, %v2004_v22  ;;  %v857_v47 = vpop.f32.mrf.mxu1  ;;  %v1529_v50 = vpop.f32.mrf.mxu0  ;;  %v687_v21 = vsub.f32 1.0, %v686_v18  ;;  %v1166_v22 = vrot.slane %v1165_v54, 2 }
 0x2ca   : > { %v858_v11 = vadd.f32 %v5654_v23, %v857_v47  ;;  %v1530_v62 = vadd.f32 %v5654_v23, %v1529_v50  ;;  %v1441_v50 = vpop.trf.xlu0 }
 0x2cb   : > { %v1367_v48 = vmax.f32 %v1328_v29, 0.0  ;;  %v2068_v33 = vmax.f32 %v2005_v36, 0.0 }
 0x2cc   : > { %v892_v6 = vmax.f32 %v858_v11, 0.0  ;;  %v1591_v7 = vmax.f32 %v1530_v62, 0.0  ;;  %4728 = vmatmul.msk.bf16.gmra.mxu0 %vm474_vm1, %v5644_v57  ;;  %4738 = vmatmul.msk.bf16.gmra.mxu1 %vm474_vm1, %v1679_v12  ;;  %v5850_v34 = vpop.trf.xlu2  ;;  %v680_v57 = vadd.f32 %v679_v61, %v678_v3 }
 0x2cd   : > { %v1398_v24 = vadd.f32 %v1397_v49, %v1367_v48  ;;  %v2099_v28 = vadd.f32 %v2098_v58, %v2068_v33  ;;  %4762 = vmatmul.msk.bf16.gmra.mxu2 %vm474_vm1, %v5577_v38  ;;  %4771 = vmatmul.msk.bf16.gmra.mxu3 %vm474_vm1, %v5780_v56  ;;  %v5858_v15 = vpop.trf.xlu1 }
 0x2ce   : > { %v923_v30 = vadd.f32 %v922_v60, %v892_v6  ;;  %v1622_v19 = vadd.f32 %v1621_v32, %v1591_v7  ;;  %v681_v60 = vrot.slane %v680_v57, 2  ;;  %v688_v6 = vmul.f32 %v5848_v41, %v687_v21 }
 0x2cf   : > { %v1167_v7 = vadd.f32 %v1166_v22, %v1165_v54 }
 0x2d0   : > { %v1330_v12 = vpop.f32.mrf.mxu3  ;;  %v2007_v43 = vpop.f32.mrf.mxu2  ;;  %v682_v62 = vadd.f32 %v681_v60, %v680_v57 }
 0x2d1   : > { %v1331_v26 = vadd.f32 %v5654_v23, %v1330_v12  ;;  %v2008_v38 = vadd.f32 %v5654_v23, %v2007_v43  ;;  %v859_v53 = vpop.f32.mrf.mxu1  ;;  %v1531_v55 = vpop.f32.mrf.mxu0 }
 0x2d2   : > { %v860_v56 = vadd.f32 %v5654_v23, %v859_v53  ;;  %v1532_v45 = vadd.f32 %v5654_v23, %v1531_v55  ;;  %v689_v53 = vadd.f32 %v5848_v41, %v688_v6  ;;  %v1168_v55 = vrot.slane %v1167_v7, 1 }
 0x2d3   : > { %v1368_v49 = vmax.f32 %v1331_v26, 0.0  ;;  %v2069_v58 = vmax.f32 %v2008_v38, 0.0  ;;  %v683_v26 = vrot.slane %v682_v62, 1 }
 0x2d4   : > { %v893_v32 = vmax.f32 %v860_v56, 0.0  ;;  %v1592_v3 = vmax.f32 %v1532_v45, 0.0  ;;  %v5860_v11 = vpop.trf.xlu2 }
 0x2d5   : > { %v1399_v10 = vadd.f32 %v1398_v24, %v1368_v49  ;;  %v2100_v29 = vadd.f32 %v2099_v28, %v2069_v58  ;;  %v5869_v54 = vpop.trf.xlu1 }
 0x2d6   : > { %v924_v36 = vadd.f32 %v923_v30, %v893_v32  ;;  %v1623_v47 = vadd.f32 %v1622_v19, %v1592_v3  ;;  %v684_v32 = vadd.f32 %v683_v26, %v682_v62 }
 0x2d8   : > { %v925_v48 = vrot.slane %v924_v36, 4  ;;  %v1332_v33 = vpop.f32.mrf.mxu3  ;;  %v2009_v61 = vpop.f32.mrf.mxu2 }
 0x2d9   : > { %v1333_v40 = vadd.f32 %v5654_v23, %v1332_v33  ;;  %v2010_v12 = vadd.f32 %v5654_v23, %v2009_v61  ;;  %v1534_v43 = vpop.f32.mrf.mxu0  ;;  %v1738_v18 = vpop.f32.mrf.mxu1 }
 0x2da   : > { %v926_v24 = vadd.f32 %v925_v48, %v924_v36  ;;  %v1535_v28 = vadd.f32 %v5654_v23, %v1534_v43  ;;  %v1739_v60 = vadd.f32 %v5654_v23, %v1738_v18 }
 0x2db   : > { %v1369_v30 = vmax.f32 %v1333_v40, 0.0  ;;  %v2070_v19 = vmax.f32 %v2010_v12, 0.0 }
 0x2dc   : > { %v927_v38 = vrot.slane %v926_v24, 2  ;;  %v1593_v57 = vmax.f32 %v1535_v28, 0.0  ;;  %4729 = vmatmul.msk.bf16.gmra.mxu0 %vm474_vm1, %v1441_v50  ;;  %4739 = vmatmul.msk.bf16.gmra.mxu1 %vm474_vm1, %v5621_v16  ;;  %v5878_v16 = vpop.trf.xlu2 }
 0x2dd   : > { %v1400_v56 = vadd.f32 %v1399_v10, %v1369_v30  ;;  %v2101_v45 = vadd.f32 %v2100_v29, %v2070_v19  ;;  %4763 = vmatmul.msk.bf16.gmra.mxu2 %vm474_vm1, %v5598_v31  ;;  %4772 = vmatmul.msk.bf16.gmra.mxu3 %vm474_vm1, %v5800_v0  ;;  %v5881_v10 = vsel %vm690_vm2, %v5848_v41, %v689_v53  ;;  %v5889_v43 = vpop.trf.xlu1 }
 0x2de   : > { %v928_v49 = vadd.f32 %v927_v38, %v926_v24  ;;  %v1624_v58 = vadd.f32 %v1623_v47, %v1593_v57  ;;  %v1169_v29 = vadd.f32 %v1168_v55, %v1167_v7  ;;  %v1818_v47 = vmax.f32 %v1739_v60, 0.0 }
 0x2df   : > { %v692_v40 = vmul.f32 %v5881_v10, %v684_v32 }
 0x2e0   : > { %v929_v3 = vrot.slane %v928_v49, 1  ;;  %v1335_v21 = vpop.f32.mrf.mxu3  ;;  %v2012_v22 = vpop.f32.mrf.mxu2  ;;  %v1170_v18 = vmul.f32 %v1169_v29, %v5881_v10 }
 0x2e1   : > { %v1336_v31 = vadd.f32 %v5654_v23, %v1335_v21  ;;  %v2013_v0 = vadd.f32 %v5654_v23, %v2012_v22  ;;  %v1536_v36 = vpop.f32.mrf.mxu0  ;;  %v1740_v50 = vpop.f32.mrf.mxu1 }
 0x2e2   : > { %v930_v48 = vadd.f32 %v929_v3, %v928_v49  ;;  %v1537_v33 = vadd.f32 %v5654_v23, %v1536_v36  ;;  %v1741_v61 = vadd.f32 %v5654_v23, %v1740_v50 }
 0x2e3   : > { %v1370_v62 = vmax.f32 %v1336_v31, 0.0  ;;  %v2071_v6 = vmax.f32 %v2013_v0, 0.0 }
 0x2e4   : > { %v931_v41 = vmul.f32 %v930_v48, %v5881_v10  ;;  %v1594_v7 = vmax.f32 %v1537_v33, 0.0  ;;  %v1819_v12 = vmax.f32 %v1741_v61, 0.0  ;;  %v5896_v57 = vpop.trf.xlu2 }
 0x2e5   : > { %v1401_v24 = vadd.f32 %v1400_v56, %v1370_v62  ;;  %v2102_v28 = vadd.f32 %v2101_v45, %v2071_v6  ;;  %v5910_v36 = vpop.trf.xlu1 }
 0x2e6   : > { %v4279_v30 = vsel %vm4278_vm3, %v692_v40, %v931_v41  ;;  %v1625_v19 = vadd.f32 %v1624_v58, %v1594_v7  ;;  %v1850_v26 = vadd.f32 %v1819_v12, %v1818_v47 }
 0x2e7   : > { %v5894_v38 = vsel %vm523_vm0, %v4279_v30, %v1170_v18 }
 0x2e8   : > { %v1337_v53 = vpop.f32.mrf.mxu3  ;;  %v2014_v55 = vpop.f32.mrf.mxu2 }
 0x2e9   : > { %v1338_v49 = vadd.f32 %v5654_v23, %v1337_v53  ;;  %v2015_v60 = vadd.f32 %v5654_v23, %v2014_v55  ;;  %v1539_v32 = vpop.f32.mrf.mxu0  ;;  %v1743_v3 = vpop.f32.mrf.mxu1 }
 0x2ea   : > { %v1540_v56 = vadd.f32 %v5654_v23, %v1539_v32  ;;  %v1744_v45 = vadd.f32 %v5654_v23, %v1743_v3 }
 0x2eb   : > { %v1371_v21 = vmax.f32 %v1338_v49, 0.0  ;;  %v2072_v58 = vmax.f32 %v2015_v60, 0.0 }
 0x2ec   : > { %v1595_v22 = vmax.f32 %v1540_v56, 0.0  ;;  %v1820_v29 = vmax.f32 %v1744_v45, 0.0  ;;  %4740 = vmatmul.msk.bf16.gmra.mxu1 %vm474_vm1, %v5646_v42  ;;  %4782 = vmatmul.msk.bf16.vlgmr.msra.gmra.mxu0 %vm474_vm1, %v5841_v59  ;;  %v5912_v33 = vpop.trf.xlu2 }
 0x2ed   : > { %v1402_v31 = vadd.f32 %v1401_v24, %v1371_v21  ;;  %v2103_v0 = vadd.f32 %v2102_v28, %v2072_v58  ;;  %4773 = vmatmul.msk.bf16.gmra.mxu3 %vm474_vm1, %v5623_v4  ;;  %4816 = vmatmul.msk.bf16.vlgmr.msra.gmra.mxu2 %vm474_vm1, %v5821_v2  ;;  %v5918_v55 = vpop.trf.xlu1 }
 0x2ee   : > { %v1626_v50 = vadd.f32 %v1625_v19, %v1595_v22  ;;  %v1851_v48 = vadd.f32 %v1850_v26, %v1820_v29 }
 0x2ef   : > { %v1403_v47 = vrot.slane %v1402_v31, 4 }
 0x2f0   : > { %v2017_v61 = vpop.f32.mrf.mxu2  ;;  %v2216_v42 = vpop.f32.mrf.mxu3 }
 0x2f1   : > { %v1404_v62 = vadd.f32 %v1403_v47, %v1402_v31  ;;  %v2018_v59 = vadd.f32 %v5654_v23, %v2017_v61  ;;  %v1541_v6 = vpop.f32.mrf.mxu0  ;;  %v1745_v40 = vpop.f32.mrf.mxu1  ;;  %v2217_v53 = vadd.f32 %v5654_v23, %v2216_v42 }
 0x2f2   : > { %v1542_v41 = vadd.f32 %v5654_v23, %v1541_v6  ;;  %v1746_v4 = vadd.f32 %v5654_v23, %v1745_v40 }
 0x2f3   : > { %v1405_v7 = vrot.slane %v1404_v62, 2  ;;  %v2073_v2 = vmax.f32 %v2018_v59, 0.0 }
 0x2f4   : > { %v1596_v12 = vmax.f32 %v1542_v41, 0.0  ;;  %v1821_v18 = vmax.f32 %v1746_v4, 0.0  ;;  %v5920_v49 = vpop.trf.xlu2 }
 0x2f5   : > { %v1406_v24 = vadd.f32 %v1405_v7, %v1404_v62  ;;  %v2104_v28 = vadd.f32 %v2103_v0, %v2073_v2  ;;  %v2296_v0 = vmax.f32 %v2217_v53, 0.0 }
 0x2f6   : > { %v1627_v30 = vadd.f32 %v1626_v50, %v1596_v12  ;;  %v1852_v19 = vadd.f32 %v1851_v48, %v1821_v18 }
 0x2f7   : > { %v1407_v26 = vrot.slane %v1406_v24, 1 }
 0x2f8   : > { %v2019_v60 = vpop.f32.mrf.mxu2  ;;  %v2218_v32 = vpop.f32.mrf.mxu3 }
 0x2f9   : > { %v1408_v3 = vadd.f32 %v1407_v26, %v1406_v24  ;;  %v2020_v56 = vadd.f32 %v5654_v23, %v2019_v60  ;;  %v2219_v45 = vadd.f32 %v5654_v23, %v2218_v32  ;;  %v1544_v21 = vpop.f32.mrf.mxu0  ;;  %v1748_v58 = vpop.f32.mrf.mxu1 }
 0x2fa   : > { %v1545_v22 = vadd.f32 %v5654_v23, %v1544_v21  ;;  %v1749_v29 = vadd.f32 %v5654_v23, %v1748_v58 }
 0x2fb   : > { %v1409_v31 = vmul.f32 %v1408_v3, %v5881_v10  ;;  %v2074_v50 = vmax.f32 %v2020_v56, 0.0  ;;  %v2297_v48 = vmax.f32 %v2219_v45, 0.0 }
 0x2fc   : > { %v1597_v47 = vmax.f32 %v1545_v22, 0.0  ;;  %v1822_v61 = vmax.f32 %v1749_v29, 0.0  ;;  %4741 = vmatmul.msk.bf16.gmra.mxu1 %vm474_vm1, %v5675_v20  ;;  %4783 = vmatmul.msk.bf16.gmra.mxu0 %vm474_vm1, %v5869_v54  ;;  %v5939_v41 = vpop.trf.xlu2 }
 0x2fd   : > { %v5933_v42 = vsel %vm4281_vm4, %v5894_v38, %v1409_v31  ;;  %v2105_v62 = vadd.f32 %v2104_v28, %v2074_v50  ;;  %v2328_v59 = vadd.f32 %v2297_v48, %v2296_v0  ;;  %4774 = vmatmul.msk.bf16.gmra.mxu3 %vm474_vm1, %v5648_v17  ;;  %4817 = vmatmul.msk.bf16.gmra.mxu2 %vm474_vm1, %v5850_v34  ;;  %v5945_v28 = vpop.trf.xlu1 }
 0x2fe   : > { %v1628_v6 = vadd.f32 %v1627_v30, %v1597_v47  ;;  %v1853_v40 = vadd.f32 %v1852_v19, %v1822_v61  ;;  %v4900_v61 = vld [vmem:[%s5276_s14 + $0x3c] sm:$0xf]  ;;  %s4554_s14 = scalar_lea.sflag [#allocation4], %s5273_s28 }
 0x300   : > { %v2022_v20 = vpop.f32.mrf.mxu2  ;;  %v2221_v4 = vpop.f32.mrf.mxu3 }
 0x301   : > { %v2023_v54 = vadd.f32 %v5654_v23, %v2022_v20  ;;  %v2222_v7 = vadd.f32 %v5654_v23, %v2221_v4  ;;  %v1546_v38 = vpop.f32.mrf.mxu0  ;;  %v1750_v2 = vpop.f32.mrf.mxu1  ;;  %v3804_v4 = vld.sshfl [vmem:[#allocation1] sm:$0xff pattern:$0x73625140] }
 0x302   : > { %v1547_v12 = vadd.f32 %v5654_v23, %v1546_v38  ;;  %v1751_v18 = vadd.f32 %v5654_v23, %v1750_v2 }
 0x303   : > { %v2075_v17 = vmax.f32 %v2023_v54, 0.0  ;;  %v2298_v24 = vmax.f32 %v2222_v7, 0.0 }
 0x304   : > { %v1598_v34 = vmax.f32 %v1547_v12, 0.0  ;;  %v1823_v30 = vmax.f32 %v1751_v18, 0.0  ;;  %v5947_v32 = vpop.trf.xlu2 }
 0x305   : > { %v2106_v19 = vadd.f32 %v2105_v62, %v2075_v17  ;;  %v2329_v26 = vadd.f32 %v2328_v59, %v2298_v24 }
 0x306   : > { %v1629_v53 = vadd.f32 %v1628_v6, %v1598_v34  ;;  %v1854_v60 = vadd.f32 %v1853_v40, %v1823_v30 }
 0x308   : > { %v2024_v3 = vpop.f32.mrf.mxu2  ;;  %v2223_v56 = vpop.f32.mrf.mxu3 }
 0x309   : > { %v2025_v45 = vadd.f32 %v5654_v23, %v2024_v3  ;;  %v2224_v21 = vadd.f32 %v5654_v23, %v2223_v56  ;;  %v1549_v58 = vpop.f32.mrf.mxu0  ;;  %v1753_v22 = vpop.f32.mrf.mxu1 }
 0x30a   : > { %v1550_v29 = vadd.f32 %v5654_v23, %v1549_v58  ;;  %v1754_v31 = vadd.f32 %v5654_v23, %v1753_v22  ;;  %v5962_v23 = vpop.trf.xlu1 }
 0x30b   : > { %v2076_v0 = vmax.f32 %v2025_v45, 0.0  ;;  %v2299_v50 = vmax.f32 %v2224_v21, 0.0 }
 0x30c   : > { %v1599_v48 = vmax.f32 %v1550_v29, 0.0  ;;  %v1824_v47 = vmax.f32 %v1754_v31, 0.0  ;;  %4742 = vmatmul.msk.bf16.gmra.mxu1 %vm474_vm1, %v5701_v35  ;;  %4784 = vmatmul.msk.bf16.gmra.mxu0 %vm474_vm1, %v5910_v36  ;;  %v5964_v20 = vpop.trf.xlu2  ;;  %v3805_v35 = vld.sshfl [vmem:[#allocation1 + $0x8] sm:$0xff pattern:$0x73625140] }
 0x30d   : > { %v2107_v62 = vadd.f32 %v2106_v19, %v2076_v0  ;;  %v2330_v59 = vadd.f32 %v2329_v26, %v2299_v50  ;;  %4775 = vmatmul.msk.bf16.gmra.mxu3 %vm474_vm1, %v5677_v8  ;;  %4818 = vmatmul.msk.bf16.gmra.mxu2 %vm474_vm1, %v5878_v16  ;;  %4042 = vst [vmem:[#allocation1] ss:$4 sm:$0xff] %v4900_v61  ;;  %v5969_v36 = vld [vmem:[%s6941_s2] ss:$0 sm:$0xff] }
 0x30e   : > { %v1630_v6 = vadd.f32 %v1629_v53, %v1599_v48  ;;  %v1855_v40 = vadd.f32 %v1854_v60, %v1824_v47  ;;  %3808 = vxpose.binary.xlu0.c.b16.start.end [1/2] (short) %v3805_v35, %v3804_v4, 128 }
 0x310   : > { %v2027_v54 = vpop.f32.mrf.mxu2  ;;  %v2226_v7 = vpop.f32.mrf.mxu3 }
 0x311   : > { %v2028_v8 = vadd.f32 %v5969_v36, %v2027_v54  ;;  %v2227_v16 = vadd.f32 %v5969_v36, %v2226_v7  ;;  %v1551_v38 = vpop.f32.mrf.mxu0  ;;  %v1755_v2 = vpop.f32.mrf.mxu1 }
 0x312   : > { %v1552_v12 = vadd.f32 %v5969_v36, %v1551_v38  ;;  %v1756_v18 = vadd.f32 %v5969_v36, %v1755_v2  ;;  %v2390_v3 = vpop.trf.xlu1 }
 0x313   : > { %v2077_v17 = vmax.f32 %v2028_v8, 0.0  ;;  %v2300_v24 = vmax.f32 %v2227_v16, 0.0 }
 0x314   : > { %v1600_v34 = vmax.f32 %v1552_v12, 0.0  ;;  %v1825_v30 = vmax.f32 %v1756_v18, 0.0  ;;  %v5975_v56 = vpop.trf.xlu2 }
 0x315   : > { %v2108_v19 = vadd.f32 %v2107_v62, %v2077_v17  ;;  %v2331_v26 = vadd.f32 %v2330_v59, %v2300_v24 }
 0x316   : > { %v1631_v53 = vadd.f32 %v1630_v6, %v1600_v34  ;;  %v1856_v60 = vadd.f32 %v1855_v40, %v1825_v30  ;;  %3330 = vxpose.binary.xlu2.c.b16.start.end [1/2] (short) %v5755_v9, %v5753_v27, 128 }
 0x318   : > { %v2029_v45 = vpop.f32.mrf.mxu2  ;;  %v2228_v21 = vpop.f32.mrf.mxu3 }
 0x319   : > { %v2030_v58 = vadd.f32 %v5969_v36, %v2029_v45  ;;  %v2229_v22 = vadd.f32 %v5969_v36, %v2228_v21  ;;  %v1554_v29 = vpop.f32.mrf.mxu0  ;;  %v1758_v31 = vpop.f32.mrf.mxu1 }
 0x31a   : > { %v1555_v0 = vadd.f32 %v5969_v36, %v1554_v29  ;;  %v1759_v50 = vadd.f32 %v5969_v36, %v1758_v31  ;;  %v5997_v12 = vpop.trf.xlu1 }
 0x31b   : > { %v2078_v48 = vmax.f32 %v2030_v58, 0.0  ;;  %v2301_v47 = vmax.f32 %v2229_v22, 0.0 }
 0x31c   : > { %v1601_v61 = vmax.f32 %v1555_v0, 0.0  ;;  %v1826_v62 = vmax.f32 %v1759_v50, 0.0  ;;  %4743 = vmatmul.msk.bf16.gmra.mxu1 %vm474_vm1, %v5726_v5  ;;  %4785 = vmatmul.msk.bf16.gmra.mxu0 %vm474_vm1, %v5945_v28  ;;  %v5991_v35 = vpop.trf.xlu2 }
 0x31d   : > { %v2109_v59 = vadd.f32 %v2108_v19, %v2078_v48  ;;  %v2332_v6 = vadd.f32 %v2331_v26, %v2301_v47  ;;  %4776 = vmatmul.msk.bf16.gmra.mxu3 %vm474_vm1, %v5704_v63  ;;  %4819 = vmatmul.msk.bf16.gmra.mxu2 %vm474_vm1, %v5912_v33 }
 0x31e   : > { %v1632_v40 = vadd.f32 %v1631_v53, %v1601_v61  ;;  %v1857_v4 = vadd.f32 %v1856_v60, %v1826_v62 }
 0x320   : > { %v2032_v54 = vpop.f32.mrf.mxu2  ;;  %v2231_v5 = vpop.f32.mrf.mxu3 }
 0x321   : > { %v2033_v7 = vadd.f32 %v5969_v36, %v2032_v54  ;;  %v2232_v28 = vadd.f32 %v5969_v36, %v2231_v5  ;;  %v1556_v8 = vpop.f32.mrf.mxu0  ;;  %v1760_v16 = vpop.f32.mrf.mxu1 }
 0x322   : > { %v1557_v63 = vadd.f32 %v5969_v36, %v1556_v8  ;;  %v1761_v38 = vadd.f32 %v5969_v36, %v1760_v16  ;;  %v2392_v61 = vpop.trf.xlu1 }
 0x323   : > { %v2079_v33 = vmax.f32 %v2033_v7, 0.0  ;;  %v2302_v2 = vmax.f32 %v2232_v28, 0.0 }
 0x324   : > { %v1602_v18 = vmax.f32 %v1557_v63, 0.0  ;;  %v1827_v27 = vmax.f32 %v1761_v38, 0.0  ;;  %v5999_v30 = vpop.trf.xlu2 }
 0x325   : > { %v2110_v9 = vadd.f32 %v2109_v59, %v2079_v33  ;;  %v2333_v17 = vadd.f32 %v2332_v6, %v2302_v2 }
 0x326   : > { %v1633_v24 = vadd.f32 %v1632_v40, %v1602_v18  ;;  %v1858_v34 = vadd.f32 %v1857_v4, %v1827_v27 }
 0x328   : > { %v2034_v19 = vpop.f32.mrf.mxu2  ;;  %v2233_v26 = vpop.f32.mrf.mxu3 }
 0x329   : > { %v2035_v53 = vadd.f32 %v5969_v36, %v2034_v19  ;;  %v2234_v60 = vadd.f32 %v5969_v36, %v2233_v26  ;;  %v1559_v45 = vpop.f32.mrf.mxu0  ;;  %v1763_v21 = vpop.f32.mrf.mxu1 }
 0x32a   : > { %v1560_v58 = vadd.f32 %v5969_v36, %v1559_v45  ;;  %v1764_v22 = vadd.f32 %v5969_v36, %v1763_v21  ;;  %v6018_v18 = vpop.trf.xlu1 }
 0x32b   : > { %v2080_v29 = vmax.f32 %v2035_v53, 0.0  ;;  %v2303_v31 = vmax.f32 %v2234_v60, 0.0 }
 0x32c   : > { %v1603_v0 = vmax.f32 %v1560_v58, 0.0  ;;  %v1828_v50 = vmax.f32 %v1764_v22, 0.0  ;;  %4744 = vmatmul.msk.bf16.gmra.mxu1 %vm474_vm1, %v5772_v39  ;;  %4786 = vmatmul.msk.bf16.gmra.mxu0 %vm474_vm1, %v2390_v3  ;;  %v6012_v6 = vpop.trf.xlu2 }
 0x32d   : > { %v2111_v48 = vadd.f32 %v2110_v9, %v2080_v29  ;;  %v2334_v47 = vadd.f32 %v2333_v17, %v2303_v31  ;;  %4777 = vmatmul.msk.bf16.gmra.mxu3 %vm474_vm1, %v5728_v1  ;;  %4820 = vmatmul.msk.bf16.gmra.mxu2 %vm474_vm1, %v5939_v41 }
 0x32e   : > { %v1634_v62 = vadd.f32 %v1633_v24, %v1603_v0  ;;  %v1859_v59 = vadd.f32 %v1858_v34, %v1828_v50 }
 0x330   : > { %v2037_v40 = vpop.f32.mrf.mxu2  ;;  %v2236_v4 = vpop.f32.mrf.mxu3 }
 0x331   : > { %v2038_v54 = vadd.f32 %v5969_v36, %v2037_v40  ;;  %v2237_v39 = vadd.f32 %v5969_v36, %v2236_v4  ;;  %v1561_v3 = vpop.f32.mrf.mxu0  ;;  %v1765_v5 = vpop.f32.mrf.mxu1 }
 0x332   : > { %v1562_v7 = vadd.f32 %v5969_v36, %v1561_v3  ;;  %v1766_v1 = vadd.f32 %v5969_v36, %v1765_v5  ;;  %v6029_v29 = vpop.trf.xlu0  ;;  %v2394_v5 = vpop.trf.xlu1 }
 0x333   : > { %v2081_v28 = vmax.f32 %v2038_v54, 0.0  ;;  %v2304_v8 = vmax.f32 %v2237_v39, 0.0 }
 0x334   : > { %v1604_v41 = vmax.f32 %v1562_v7, 0.0  ;;  %v1829_v16 = vmax.f32 %v1766_v1, 0.0  ;;  %v6020_v27 = vpop.trf.xlu2 }
 0x335   : > { %v2112_v63 = vadd.f32 %v2111_v48, %v2081_v28  ;;  %v2335_v38 = vadd.f32 %v2334_v47, %v2304_v8 }
 0x336   : > { %v1635_v33 = vadd.f32 %v1634_v62, %v1604_v41  ;;  %v1860_v2 = vadd.f32 %v1859_v59, %v1829_v16 }
 0x338   : > { %v2039_v9 = vpop.f32.mrf.mxu2  ;;  %v2238_v17 = vpop.f32.mrf.mxu3 }
 0x339   : > { %v2040_v24 = vadd.f32 %v5969_v36, %v2039_v9  ;;  %v2239_v34 = vadd.f32 %v5969_v36, %v2238_v17  ;;  %v1564_v19 = vpop.f32.mrf.mxu0  ;;  %v1768_v26 = vpop.f32.mrf.mxu1 }
 0x33a   : > { %v1565_v53 = vadd.f32 %v5969_v36, %v1564_v19  ;;  %v1769_v60 = vadd.f32 %v5969_v36, %v1768_v26  ;;  %v6041_v1 = vpop.trf.xlu0 }
 0x33b   : > { %v2082_v45 = vmax.f32 %v2040_v24, 0.0  ;;  %v2305_v21 = vmax.f32 %v2239_v34, 0.0 }
 0x33c   : > { %v1605_v58 = vmax.f32 %v1565_v53, 0.0  ;;  %v1830_v22 = vmax.f32 %v1769_v60, 0.0  ;;  %4745 = vmatmul.msk.bf16.gmra.mxu1 %vm474_vm1, %v5806_v46  ;;  %4787 = vmatmul.msk.bf16.gmra.mxu0 %vm474_vm1, %v2392_v61  ;;  %v6035_v47 = vpop.trf.xlu2 }
 0x33d   : > { %v2113_v31 = vadd.f32 %v2112_v63, %v2082_v45  ;;  %v2336_v0 = vadd.f32 %v2335_v38, %v2305_v21  ;;  %4778 = vmatmul.msk.bf16.gmra.mxu3 %vm474_vm1, %v5757_v52  ;;  %4821 = vmatmul.msk.bf16.gmra.mxu2 %vm474_vm1, %v5964_v20 }
 0x33e   : > { %v1636_v50 = vadd.f32 %v1635_v33, %v1605_v58  ;;  %v1861_v48 = vadd.f32 %v1860_v2, %v1830_v22 }
 0x340   : > { %v2042_v62 = vpop.f32.mrf.mxu2  ;;  %v2241_v59 = vpop.f32.mrf.mxu3 }
 0x341   : > { %v2043_v46 = vadd.f32 %v5969_v36, %v2042_v62  ;;  %v2242_v61 = vadd.f32 %v5969_v36, %v2241_v59  ;;  %v1566_v40 = vpop.f32.mrf.mxu0  ;;  %v1770_v4 = vpop.f32.mrf.mxu1 }
 0x342   : > { %v1567_v54 = vadd.f32 %v5969_v36, %v1566_v40  ;;  %v1771_v39 = vadd.f32 %v5969_v36, %v1770_v4  ;;  %v6052_v21 = vpop.trf.xlu0 }
 0x343   : > { %v2083_v52 = vmax.f32 %v2043_v46, 0.0  ;;  %v2306_v3 = vmax.f32 %v2242_v61, 0.0 }
 0x344   : > { %v1606_v20 = vmax.f32 %v1567_v54, 0.0  ;;  %v1831_v7 = vmax.f32 %v1771_v39, 0.0  ;;  %v6043_v63 = vpop.trf.xlu2 }
 0x345   : > { %v2114_v28 = vadd.f32 %v2113_v31, %v2083_v52  ;;  %v2337_v8 = vadd.f32 %v2336_v0, %v2306_v3  ;;  %v6058_v31 = vpop.trf.xlu1 }
 0x346   : > { %v1637_v41 = vadd.f32 %v1636_v50, %v1606_v20  ;;  %v1862_v16 = vadd.f32 %v1861_v48, %v1831_v7 }
 0x348   : > { %v2044_v38 = vpop.f32.mrf.mxu2  ;;  %v2243_v33 = vpop.f32.mrf.mxu3 }
 0x349   : > { %v2045_v2 = vadd.f32 %v5969_v36, %v2044_v38  ;;  %v2244_v9 = vadd.f32 %v5969_v36, %v2243_v33  ;;  %v1569_v17 = vpop.f32.mrf.mxu0  ;;  %v1773_v24 = vpop.f32.mrf.mxu1 }
 0x34a   : > { %v1570_v34 = vadd.f32 %v5969_v36, %v1569_v17  ;;  %v1774_v19 = vadd.f32 %v5969_v36, %v1773_v24  ;;  %v6066_v3 = vpop.trf.xlu0 }
 0x34b   : > { %v2084_v26 = vmax.f32 %v2045_v2, 0.0  ;;  %v2307_v53 = vmax.f32 %v2244_v9, 0.0 }
 0x34c   : > { %v1607_v60 = vmax.f32 %v1570_v34, 0.0  ;;  %v1832_v45 = vmax.f32 %v1774_v19, 0.0  ;;  %4746 = vmatmul.msk.bf16.gmra.mxu1 %vm474_vm1, %v5829_v25  ;;  %4788 = vmatmul.msk.bf16.gmra.mxu0 %vm474_vm1, %v2394_v5  ;;  %v6060_v48 = vpop.trf.xlu2 }
 0x34d   : > { %v2115_v58 = vadd.f32 %v2114_v28, %v2084_v26  ;;  %v2338_v22 = vadd.f32 %v2337_v8, %v2307_v53  ;;  %4779 = vmatmul.msk.bf16.gmra.mxu3 %vm474_vm1, %v5786_v13  ;;  %4822 = vmatmul.msk.bf16.gmra.mxu2 %vm474_vm1, %v5991_v35  ;;  %v2396_v8 = vpop.trf.xlu1 }
 0x34e   : > { %v1638_v0 = vadd.f32 %v1637_v41, %v1607_v60  ;;  %v1863_v50 = vadd.f32 %v1862_v16, %v1832_v45 }
 0x350   : > { %v2047_v62 = vpop.f32.mrf.mxu2  ;;  %v2246_v25 = vpop.f32.mrf.mxu3 }
 0x351   : > { %v2048_v59 = vadd.f32 %v5969_v36, %v2047_v62  ;;  %v2247_v46 = vadd.f32 %v5969_v36, %v2246_v25  ;;  %v1571_v61 = vpop.f32.mrf.mxu0  ;;  %v1775_v40 = vpop.f32.mrf.mxu1 }
 0x352   : > { %v1572_v4 = vadd.f32 %v5969_v36, %v1571_v61  ;;  %v1776_v13 = vadd.f32 %v5969_v36, %v1775_v40  ;;  %v6077_v45 = vpop.trf.xlu0 }
 0x353   : > { %v2085_v54 = vmax.f32 %v2048_v59, 0.0  ;;  %v2308_v35 = vmax.f32 %v2247_v46, 0.0 }
 0x354   : > { %v1608_v39 = vmax.f32 %v1572_v4, 0.0  ;;  %v1833_v52 = vmax.f32 %v1776_v13, 0.0  ;;  %v6068_v41 = vpop.trf.xlu2 }
 0x355   : > { %v2116_v5 = vadd.f32 %v2115_v58, %v2085_v54  ;;  %v2339_v20 = vadd.f32 %v2338_v22, %v2308_v35 }
 0x356   : > { %v1639_v7 = vadd.f32 %v1638_v0, %v1608_v39  ;;  %v1864_v28 = vadd.f32 %v1863_v50, %v1833_v52 }
 0x358   : > { %v2049_v16 = vpop.f32.mrf.mxu2  ;;  %v2248_v38 = vpop.f32.mrf.mxu3 }
 0x359   : > { %v2050_v33 = vadd.f32 %v5969_v36, %v2049_v16  ;;  %v2249_v2 = vadd.f32 %v5969_v36, %v2248_v38  ;;  %v1574_v9 = vpop.f32.mrf.mxu0  ;;  %v1778_v17 = vpop.f32.mrf.mxu1 }
 0x35a   : > { %v1575_v24 = vadd.f32 %v5969_v36, %v1574_v9  ;;  %v1779_v34 = vadd.f32 %v5969_v36, %v1778_v17  ;;  %v6089_v39 = vpop.trf.xlu0 }
 0x35b   : > { %v2086_v19 = vmax.f32 %v2050_v33, 0.0  ;;  %v2309_v26 = vmax.f32 %v2249_v2, 0.0 }
 0x35c   : > { %v1609_v53 = vmax.f32 %v1575_v24, 0.0  ;;  %v1834_v60 = vmax.f32 %v1779_v34, 0.0  ;;  %4789 = vmatmul.msk.bf16.gmra.mxu0 %vm474_vm1, %v2396_v8  ;;  %4799 = vmatmul.msk.bf16.vlgmr.msra.gmra.mxu1 %vm474_vm1, %v6035_v47  ;;  %v6083_v62 = vpop.trf.xlu2 }
 0x35d   : > { %v2117_v58 = vadd.f32 %v2116_v5, %v2086_v19  ;;  %v2340_v22 = vadd.f32 %v2339_v20, %v2309_v26  ;;  %4780 = vmatmul.msk.bf16.gmra.mxu3 %vm474_vm1, %v5808_v51  ;;  %4823 = vmatmul.msk.bf16.gmra.mxu2 %vm474_vm1, %v6012_v6 }
 0x35e   : > { %v1640_v0 = vadd.f32 %v1639_v7, %v1609_v53  ;;  %v1865_v50 = vadd.f32 %v1864_v28, %v1834_v60 }
 0x360   : > { %v2052_v25 = vpop.f32.mrf.mxu2  ;;  %v2251_v59 = vpop.f32.mrf.mxu3 }
 0x361   : > { %v2053_v46 = vadd.f32 %v5969_v36, %v2052_v25  ;;  %v2252_v47 = vadd.f32 %v5969_v36, %v2251_v59  ;;  %v1576_v61 = vpop.f32.mrf.mxu0  ;;  %v1780_v40 = vpop.f32.mrf.mxu1 }
 0x362   : > { %v1577_v4 = vadd.f32 %v5969_v36, %v1576_v61  ;;  %v1781_v13 = vadd.f32 %v5969_v36, %v1780_v40 }
 0x363   : > { %v2087_v51 = vmax.f32 %v2053_v46, 0.0  ;;  %v2310_v54 = vmax.f32 %v2252_v47, 0.0 }
 0x364   : > { %v1610_v35 = vmax.f32 %v1577_v4, 0.0  ;;  %v1835_v6 = vmax.f32 %v1781_v13, 0.0  ;;  %v6091_v28 = vpop.trf.xlu2 }
 0x365   : > { %v2118_v52 = vadd.f32 %v2117_v58, %v2087_v51  ;;  %v2341_v5 = vadd.f32 %v2340_v22, %v2310_v54  ;;  %v6100_v58 = vpop.trf.xlu0 }
 0x366   : > { %v1641_v20 = vadd.f32 %v1640_v0, %v1610_v35  ;;  %v1866_v7 = vadd.f32 %v1865_v50, %v1835_v6 }
 0x368   : > { %v1642_v8 = vrot.slane %v1641_v20, 4  ;;  %v2054_v16 = vpop.f32.mrf.mxu2  ;;  %v2253_v38 = vpop.f32.mrf.mxu3 }
 0x369   : > { %v2055_v33 = vadd.f32 %v5969_v36, %v2054_v16  ;;  %v2254_v2 = vadd.f32 %v5969_v36, %v2253_v38  ;;  %v1783_v9 = vpop.f32.mrf.mxu1  ;;  %v2455_v17 = vpop.f32.mrf.mxu0 }
 0x36a   : > { %v1643_v24 = vadd.f32 %v1642_v8, %v1641_v20  ;;  %v1784_v34 = vadd.f32 %v5969_v36, %v1783_v9  ;;  %v2456_v59 = vadd.f32 %v5969_v36, %v2455_v17 }
 0x36b   : > { %v2088_v19 = vmax.f32 %v2055_v33, 0.0  ;;  %v2311_v26 = vmax.f32 %v2254_v2, 0.0 }
 0x36c   : > { %v1644_v53 = vrot.slane %v1643_v24, 2  ;;  %v1836_v60 = vmax.f32 %v1784_v34, 0.0  ;;  %4790 = vmatmul.msk.bf16.gmra.mxu0 %vm474_vm1, %v5858_v15  ;;  %4800 = vmatmul.msk.bf16.gmra.mxu1 %vm474_vm1, %v6060_v48  ;;  %v6109_v46 = vpop.trf.xlu2  ;;  %v2535_v51 = vmax.f32 %v2456_v59, 0.0 }
 0x36d   : > { %v6102_v22 = vadd.f32 %v2118_v52, %v2088_v19  ;;  %v2342_v0 = vadd.f32 %v2341_v5, %v2311_v26  ;;  %4824 = vmatmul.msk.bf16.gmra.mxu2 %vm474_vm1, %v5831_v14  ;;  %4833 = vmatmul.msk.bf16.vlgmr.msra.gmra.mxu3 %vm474_vm1, %v6029_v29  ;;  %v6115_v5 = vpop.trf.xlu0 }
 0x36e   : > { %v1645_v50 = vadd.f32 %v1644_v53, %v1643_v24  ;;  %v1867_v25 = vadd.f32 %v1866_v7, %v1836_v60 }
 0x370   : > { %v1646_v15 = vrot.slane %v1645_v50, 1  ;;  %v2256_v47 = vpop.f32.mrf.mxu3  ;;  %v2933_v48 = vpop.f32.mrf.mxu2 }
 0x371   : > { %v2257_v61 = vadd.f32 %v5969_v36, %v2256_v47  ;;  %v1785_v40 = vpop.f32.mrf.mxu1  ;;  %v2457_v4 = vpop.f32.mrf.mxu0  ;;  %v2934_v38 = vadd.f32 %v5969_v36, %v2933_v48 }
 0x372   : > { %v1647_v13 = vadd.f32 %v1646_v15, %v1645_v50  ;;  %v1786_v14 = vadd.f32 %v5969_v36, %v1785_v40  ;;  %v2458_v54 = vadd.f32 %v5969_v36, %v2457_v4 }
 0x373   : > { %v2312_v29 = vmax.f32 %v2257_v61, 0.0 }
 0x374   : > { %v1648_v35 = vmul.f32 %v1647_v13, %v5881_v10  ;;  %v1837_v6 = vmax.f32 %v1786_v14, 0.0  ;;  %v2536_v52 = vmax.f32 %v2458_v54, 0.0  ;;  %v6122_v33 = vpop.trf.xlu2 }
 0x375   : > { %v2343_v20 = vadd.f32 %v2342_v0, %v2312_v29  ;;  %v6132_v59 = vpop.trf.xlu0 }
 0x376   : > { %v6119_v7 = vsel %vm4283_vm5, %v5933_v42, %v1648_v35  ;;  %v1868_v8 = vadd.f32 %v1867_v25, %v1837_v6  ;;  %v2567_v16 = vadd.f32 %v2536_v52, %v2535_v51  ;;  %v3013_v42 = vmax.f32 %v2934_v38, 0.0 }
 0x378   : > { %v2258_v2 = vpop.f32.mrf.mxu3  ;;  %v2935_v9 = vpop.f32.mrf.mxu2 }
 0x379   : > { %v2259_v17 = vadd.f32 %v5969_v36, %v2258_v2  ;;  %v2936_v24 = vadd.f32 %v5969_v36, %v2935_v9  ;;  %v1788_v34 = vpop.f32.mrf.mxu1  ;;  %v2460_v19 = vpop.f32.mrf.mxu0 }
 0x37a   : > { %v1789_v26 = vadd.f32 %v5969_v36, %v1788_v34  ;;  %v2461_v53 = vadd.f32 %v5969_v36, %v2460_v19 }
 0x37b   : > { %v2313_v60 = vmax.f32 %v2259_v17, 0.0  ;;  %v3014_v0 = vmax.f32 %v2936_v24, 0.0 }
 0x37c   : > { %v1838_v50 = vmax.f32 %v1789_v26, 0.0  ;;  %v2537_v25 = vmax.f32 %v2461_v53, 0.0  ;;  %4791 = vmatmul.msk.bf16.gmra.mxu0 %vm474_vm1, %v5889_v43  ;;  %4801 = vmatmul.msk.bf16.gmra.mxu1 %vm474_vm1, %v6083_v62  ;;  %v6138_v40 = vpop.trf.xlu2 }
 0x37d   : > { %v2344_v15 = vadd.f32 %v2343_v20, %v2313_v60  ;;  %v3045_v47 = vadd.f32 %v3014_v0, %v3013_v42  ;;  %4825 = vmatmul.msk.bf16.gmra.mxu2 %vm474_vm1, %v5860_v11  ;;  %4834 = vmatmul.msk.bf16.gmra.mxu3 %vm474_vm1, %v6052_v21  ;;  %v6144_v52 = vpop.trf.xlu0 }
 0x37e   : > { %v1869_v48 = vadd.f32 %v1868_v8, %v1838_v50  ;;  %v2568_v61 = vadd.f32 %v2567_v16, %v2537_v25 }
 0x380   : > { %v2261_v4 = vpop.f32.mrf.mxu3  ;;  %v2938_v13 = vpop.f32.mrf.mxu2 }
 0x381   : > { %v2262_v43 = vadd.f32 %v5969_v36, %v2261_v4  ;;  %v2939_v62 = vadd.f32 %v5969_v36, %v2938_v13  ;;  %v1790_v51 = vpop.f32.mrf.mxu1  ;;  %v2462_v14 = vpop.f32.mrf.mxu0 }
 0x382   : > { %v1791_v54 = vadd.f32 %v5969_v36, %v1790_v51  ;;  %v2463_v29 = vadd.f32 %v5969_v36, %v2462_v14 }
 0x383   : > { %v2314_v11 = vmax.f32 %v2262_v43, 0.0  ;;  %v3015_v35 = vmax.f32 %v2939_v62, 0.0 }
 0x384   : > { %v1839_v6 = vmax.f32 %v1791_v54, 0.0  ;;  %v2538_v21 = vmax.f32 %v2463_v29, 0.0  ;;  %v6146_v2 = vpop.trf.xlu2 }
 0x385   : > { %v2345_v20 = vadd.f32 %v2344_v15, %v2314_v11  ;;  %v3046_v8 = vadd.f32 %v3045_v47, %v3015_v35  ;;  %v6156_v15 = vpop.trf.xlu0 }
 0x386   : > { %v1870_v16 = vadd.f32 %v1869_v48, %v1839_v6  ;;  %v2569_v38 = vadd.f32 %v2568_v61, %v2538_v21 }
 0x388   : > { %v2263_v9 = vpop.f32.mrf.mxu3  ;;  %v2940_v17 = vpop.f32.mrf.mxu2 }
 0x389   : > { %v2264_v24 = vadd.f32 %v5969_v36, %v2263_v9  ;;  %v2941_v34 = vadd.f32 %v5969_v36, %v2940_v17  ;;  %v1793_v19 = vpop.f32.mrf.mxu1  ;;  %v2465_v26 = vpop.f32.mrf.mxu0 }
 0x38a   : > { %v1794_v53 = vadd.f32 %v5969_v36, %v1793_v19  ;;  %v2466_v42 = vadd.f32 %v5969_v36, %v2465_v26 }
 0x38b   : > { %v2315_v60 = vmax.f32 %v2264_v24, 0.0  ;;  %v3016_v0 = vmax.f32 %v2941_v34, 0.0 }
 0x38c   : > { %v1840_v50 = vmax.f32 %v1794_v53, 0.0  ;;  %v2539_v25 = vmax.f32 %v2466_v42, 0.0  ;;  %4792 = vmatmul.msk.bf16.gmra.mxu0 %vm474_vm1, %v5918_v55  ;;  %4802 = vmatmul.msk.bf16.gmra.mxu1 %vm474_vm1, %v6109_v46 }
 0x38d   : > { %v2346_v47 = vadd.f32 %v2345_v20, %v2315_v60  ;;  %v3047_v48 = vadd.f32 %v3046_v8, %v3016_v0  ;;  %4826 = vmatmul.msk.bf16.gmra.mxu2 %vm474_vm1, %v5896_v57  ;;  %4835 = vmatmul.msk.bf16.gmra.mxu3 %vm474_vm1, %v6077_v45  ;;  %v6168_v45 = vpop.trf.xlu2  ;;  %v6170_v6 = vpop.trf.xlu0 }
 0x38e   : > { %v1871_v61 = vadd.f32 %v1870_v16, %v1840_v50  ;;  %v2570_v4 = vadd.f32 %v2569_v38, %v2539_v25  ;;  %3569 = vxpose.binary.xlu0.c.b16.start.end [1/2] (short) %v5778_v44, %v5776_v37, 128 }
 0x390   : > { %v2266_v13 = vpop.f32.mrf.mxu3  ;;  %v2943_v43 = vpop.f32.mrf.mxu2 }
 0x391   : > { %v2267_v55 = vadd.f32 %v5969_v36, %v2266_v13  ;;  %v2944_v46 = vadd.f32 %v5969_v36, %v2943_v43  ;;  %v1795_v62 = vpop.f32.mrf.mxu1  ;;  %v2467_v51 = vpop.f32.mrf.mxu0  ;;  %v4044_v13 = vld.sshfl [vmem:[#allocation1 + $0x8] sm:$0xff pattern:$0x73625140] }
 0x392   : > { %v1796_v14 = vadd.f32 %v5969_v36, %v1795_v62  ;;  %v2468_v57 = vadd.f32 %v5969_v36, %v2467_v51 }
 0x393   : > { %v2316_v54 = vmax.f32 %v2267_v55, 0.0  ;;  %v3017_v29 = vmax.f32 %v2944_v46, 0.0 }
 0x394   : > { %v1841_v11 = vmax.f32 %v1796_v14, 0.0  ;;  %v2540_v35 = vmax.f32 %v2468_v57, 0.0 }
 0x395   : > { %v2347_v21 = vadd.f32 %v2346_v47, %v2316_v54  ;;  %v3048_v37 = vadd.f32 %v3047_v48, %v3017_v29  ;;  %v6180_v0 = vpop.trf.xlu0  ;;  %v6186_v47 = vpop.trf.xlu2 }
 0x396   : > { %v1872_v44 = vadd.f32 %v1871_v61, %v1841_v11  ;;  %v2571_v20 = vadd.f32 %v2570_v4, %v2540_v35  ;;  %v4043_v4 = vld.sshfl [vmem:[#allocation1] sm:$0xff pattern:$0x73625140] }
 0x397   : > { %4047 = vxpose.binary.xlu1.c.b16.start.end [1/2] (short) %v4044_v13, %v4043_v4, 128 }
 0x398   : > { %v2268_v8 = vpop.f32.mrf.mxu3  ;;  %v2945_v16 = vpop.f32.mrf.mxu2 }
 0x399   : > { %v2269_v38 = vadd.f32 %v5969_v36, %v2268_v8  ;;  %v2946_v9 = vadd.f32 %v5969_v36, %v2945_v16  ;;  %v1798_v17 = vpop.f32.mrf.mxu1  ;;  %v2470_v24 = vpop.f32.mrf.mxu0 }
 0x39a   : > { %v1799_v34 = vadd.f32 %v5969_v36, %v1798_v17  ;;  %v2471_v19 = vadd.f32 %v5969_v36, %v2470_v24 }
 0x39b   : > { %v2317_v26 = vmax.f32 %v2269_v38, 0.0  ;;  %v3018_v53 = vmax.f32 %v2946_v9, 0.0 }
 0x39c   : > { %v1842_v42 = vmax.f32 %v1799_v34, 0.0  ;;  %v2541_v60 = vmax.f32 %v2471_v19, 0.0  ;;  %4793 = vmatmul.msk.bf16.gmra.mxu0 %vm474_vm1, %v5962_v23  ;;  %4803 = vmatmul.msk.bf16.gmra.mxu1 %vm474_vm1, %v6138_v40 }
 0x39d   : > { %v2348_v50 = vadd.f32 %v2347_v21, %v2317_v26  ;;  %v3049_v25 = vadd.f32 %v3048_v37, %v3018_v53  ;;  %4827 = vmatmul.msk.bf16.gmra.mxu2 %vm474_vm1, %v5920_v49  ;;  %4836 = vmatmul.msk.bf16.gmra.mxu3 %vm474_vm1, %v6100_v58  ;;  %v6192_v29 = vpop.trf.xlu0 }
 0x39e   : > { %v1873_v48 = vadd.f32 %v1872_v44, %v1842_v42  ;;  %v2572_v61 = vadd.f32 %v2571_v20, %v2541_v60  ;;  %v2633_v44 = vpop.trf.xlu2 }
 0x3a0   : > { %v2271_v23 = vpop.f32.mrf.mxu3  ;;  %v2948_v43 = vpop.f32.mrf.mxu2 }
 0x3a1   : > { %v2272_v40 = vadd.f32 %v5969_v36, %v2271_v23  ;;  %v2949_v55 = vadd.f32 %v5969_v36, %v2948_v43  ;;  %v1800_v46 = vpop.f32.mrf.mxu1  ;;  %v2472_v62 = vpop.f32.mrf.mxu0 }
 0x3a2   : > { %v1801_v49 = vadd.f32 %v5969_v36, %v1800_v46  ;;  %v2473_v51 = vadd.f32 %v5969_v36, %v2472_v62 }
 0x3a3   : > { %v2318_v58 = vmax.f32 %v2272_v40, 0.0  ;;  %v3019_v14 = vmax.f32 %v2949_v55, 0.0 }
 0x3a4   : > { %v1843_v57 = vmax.f32 %v1801_v49, 0.0  ;;  %v2542_v54 = vmax.f32 %v2473_v51, 0.0 }
 0x3a5   : > { %v2349_v11 = vadd.f32 %v2348_v50, %v2318_v58  ;;  %v3050_v35 = vadd.f32 %v3049_v25, %v3019_v14  ;;  %v6202_v60 = vpop.trf.xlu0 }
 0x3a6   : > { %v1874_v21 = vadd.f32 %v1873_v48, %v1843_v57  ;;  %v2573_v37 = vadd.f32 %v2572_v61, %v2542_v54  ;;  %v6212_v46 = vpop.trf.xlu2 }
 0x3a8   : > { %v2273_v20 = vpop.f32.mrf.mxu3  ;;  %v2950_v8 = vpop.f32.mrf.mxu2 }
 0x3a9   : > { %v2274_v16 = vadd.f32 %v5969_v36, %v2273_v20  ;;  %v2951_v38 = vadd.f32 %v5969_v36, %v2950_v8  ;;  %v1803_v9 = vpop.f32.mrf.mxu1  ;;  %v2475_v17 = vpop.f32.mrf.mxu0 }
 0x3aa   : > { %v1804_v24 = vadd.f32 %v5969_v36, %v1803_v9  ;;  %v2476_v34 = vadd.f32 %v5969_v36, %v2475_v17 }
 0x3ab   : > { %v2319_v19 = vmax.f32 %v2274_v16, 0.0  ;;  %v3020_v26 = vmax.f32 %v2951_v38, 0.0 }
 0x3ac   : > { %v1844_v53 = vmax.f32 %v1804_v24, 0.0  ;;  %v2543_v42 = vmax.f32 %v2476_v34, 0.0  ;;  %4794 = vmatmul.msk.bf16.gmra.mxu0 %vm474_vm1, %v5997_v12  ;;  %4804 = vmatmul.msk.bf16.gmra.mxu1 %vm474_vm1, %v6168_v45 }
 0x3ad   : > { %v2350_v50 = vadd.f32 %v2349_v11, %v2319_v19  ;;  %v3051_v25 = vadd.f32 %v3050_v35, %v3020_v26  ;;  %4828 = vmatmul.msk.bf16.gmra.mxu2 %vm474_vm1, %v5947_v32  ;;  %4837 = vmatmul.msk.bf16.gmra.mxu3 %vm474_vm1, %v6132_v59  ;;  %v6214_v51 = vpop.trf.xlu0 }
 0x3ae   : > { %v1875_v48 = vadd.f32 %v1874_v21, %v1844_v53  ;;  %v2574_v61 = vadd.f32 %v2573_v37, %v2543_v42  ;;  %v2635_v19 = vpop.trf.xlu2 }
 0x3b0   : > { %v2276_v4 = vpop.f32.mrf.mxu3  ;;  %v2953_v13 = vpop.f32.mrf.mxu2 }
 0x3b1   : > { %v2277_v23 = vadd.f32 %v5969_v36, %v2276_v4  ;;  %v2954_v12 = vadd.f32 %v5969_v36, %v2953_v13  ;;  %v1805_v43 = vpop.f32.mrf.mxu1  ;;  %v2477_v45 = vpop.f32.mrf.mxu0 }
 0x3b2   : > { %v1806_v40 = vadd.f32 %v5969_v36, %v1805_v43  ;;  %v2478_v55 = vadd.f32 %v5969_v36, %v2477_v45 }
 0x3b3   : > { %v2320_v32 = vmax.f32 %v2277_v23, 0.0  ;;  %v3021_v62 = vmax.f32 %v2954_v12, 0.0 }
 0x3b4   : > { %v1845_v49 = vmax.f32 %v1806_v40, 0.0  ;;  %v2544_v59 = vmax.f32 %v2478_v55, 0.0 }
 0x3b5   : > { %v2351_v58 = vadd.f32 %v2350_v50, %v2320_v32  ;;  %v3052_v14 = vadd.f32 %v3051_v25, %v3021_v62 }
 0x3b6   : > { %v1876_v57 = vadd.f32 %v1875_v48, %v1845_v49  ;;  %v2575_v54 = vadd.f32 %v2574_v61, %v2544_v59  ;;  %v6233_v55 = vpop.trf.xlu2 }
 0x3b8   : > { %v2278_v11 = vpop.f32.mrf.mxu3  ;;  %v2955_v35 = vpop.f32.mrf.mxu2 }
 0x3b9   : > { %v2279_v21 = vadd.f32 %v5969_v36, %v2278_v11  ;;  %v2956_v37 = vadd.f32 %v5969_v36, %v2955_v35  ;;  %v1808_v20 = vpop.f32.mrf.mxu1  ;;  %v2480_v8 = vpop.f32.mrf.mxu0 }
 0x3ba   : > { %v1809_v16 = vadd.f32 %v5969_v36, %v1808_v20  ;;  %v2481_v38 = vadd.f32 %v5969_v36, %v2480_v8  ;;  %v6223_v26 = vpop.trf.xlu0 }
 0x3bb   : > { %v2321_v9 = vmax.f32 %v2279_v21, 0.0  ;;  %v3022_v17 = vmax.f32 %v2956_v37, 0.0 }
 0x3bc   : > { %v1846_v24 = vmax.f32 %v1809_v16, 0.0  ;;  %v2545_v34 = vmax.f32 %v2481_v38, 0.0  ;;  %4795 = vmatmul.msk.bf16.gmra.mxu0 %vm474_vm1, %v6018_v18  ;;  %4805 = vmatmul.msk.bf16.gmra.mxu1 %vm474_vm1, %v2633_v44 }
 0x3bd   : > { %v2352_v53 = vadd.f32 %v2351_v58, %v2321_v9  ;;  %v3053_v42 = vadd.f32 %v3052_v14, %v3022_v17  ;;  %4829 = vmatmul.msk.bf16.gmra.mxu2 %vm474_vm1, %v5975_v56  ;;  %4838 = vmatmul.msk.bf16.gmra.mxu3 %vm474_vm1, %v6156_v15 }
 0x3be   : > { %v1877_v50 = vadd.f32 %v1876_v57, %v1846_v24  ;;  %v2576_v25 = vadd.f32 %v2575_v54, %v2545_v34  ;;  %v6244_v9 = vpop.trf.xlu2  ;;  %v2120_v24 = vrot.slane %v6102_v22, 4 }
 0x3c0   : > { %v2281_v48 = vpop.f32.mrf.mxu3  ;;  %v2958_v61 = vpop.f32.mrf.mxu2 }
 0x3c1   : > { %v2282_v4 = vadd.f32 %v5969_v36, %v2281_v48  ;;  %v2959_v18 = vadd.f32 %v5969_v36, %v2958_v61  ;;  %v1810_v44 = vpop.f32.mrf.mxu1  ;;  %v2482_v13 = vpop.f32.mrf.mxu0 }
 0x3c2   : > { %v1811_v23 = vadd.f32 %v5969_v36, %v1810_v44  ;;  %v2483_v12 = vadd.f32 %v5969_v36, %v2482_v13  ;;  %v6235_v15 = vpop.trf.xlu0 }
 0x3c3   : > { %v2322_v43 = vmax.f32 %v2282_v4, 0.0  ;;  %v3023_v45 = vmax.f32 %v2959_v18, 0.0 }
 0x3c4   : > { %v1847_v56 = vmax.f32 %v1811_v23, 0.0  ;;  %v2546_v40 = vmax.f32 %v2483_v12, 0.0 }
 0x3c5   : > { %v2353_v32 = vadd.f32 %v2352_v53, %v2322_v43  ;;  %v3054_v62 = vadd.f32 %v3053_v42, %v3023_v45 }
 0x3c6   : > { %v1878_v49 = vadd.f32 %v1877_v50, %v1847_v56  ;;  %v2577_v59 = vadd.f32 %v2576_v25, %v2546_v40  ;;  %v6258_v43 = vpop.trf.xlu2 }
 0x3c8   : > { %v2283_v58 = vpop.f32.mrf.mxu3  ;;  %v2960_v14 = vpop.f32.mrf.mxu2 }
 0x3c9   : > { %v2284_v57 = vadd.f32 %v5969_v36, %v2283_v58  ;;  %v2961_v54 = vadd.f32 %v5969_v36, %v2960_v14  ;;  %v1813_v11 = vpop.f32.mrf.mxu1  ;;  %v2485_v35 = vpop.f32.mrf.mxu0 }
 0x3ca   : > { %v1814_v21 = vadd.f32 %v5969_v36, %v1813_v11  ;;  %v2486_v37 = vadd.f32 %v5969_v36, %v2485_v35  ;;  %v6246_v17 = vpop.trf.xlu0 }
 0x3cb   : > { %v2323_v20 = vmax.f32 %v2284_v57, 0.0  ;;  %v3024_v8 = vmax.f32 %v2961_v54, 0.0 }
 0x3cc   : > { %v1848_v16 = vmax.f32 %v1814_v21, 0.0  ;;  %v2547_v38 = vmax.f32 %v2486_v37, 0.0  ;;  %4796 = vmatmul.msk.bf16.gmra.mxu0 %vm474_vm1, %v6058_v31  ;;  %4806 = vmatmul.msk.bf16.gmra.mxu1 %vm474_vm1, %v2635_v19  ;;  %v2121_v19 = vadd.f32 %v2120_v24, %v6102_v22 }
 0x3cd   : > { %v2354_v34 = vadd.f32 %v2353_v32, %v2323_v20  ;;  %v3055_v53 = vadd.f32 %v3054_v62, %v3024_v8  ;;  %4830 = vmatmul.msk.bf16.gmra.mxu2 %vm474_vm1, %v5999_v30  ;;  %4839 = vmatmul.msk.bf16.gmra.mxu3 %vm474_vm1, %v6180_v0 }
 0x3ce   : > { %v1879_v42 = vadd.f32 %v1878_v49, %v1848_v16  ;;  %v2578_v50 = vadd.f32 %v2577_v59, %v2547_v38  ;;  %v2122_v56 = vrot.slane %v2121_v19, 2  ;;  %v2397_v49 = vpop.trf.xlu1 }
 0x3d0   : > { %v2286_v25 = vpop.f32.mrf.mxu3  ;;  %v2963_v31 = vpop.f32.mrf.mxu2  ;;  %v2123_v57 = vadd.f32 %v2122_v56, %v2121_v19 }
 0x3d1   : > { %v2287_v48 = vadd.f32 %v5969_v36, %v2286_v25  ;;  %v2964_v61 = vadd.f32 %v5969_v36, %v2963_v31  ;;  %v1815_v4 = vpop.f32.mrf.mxu1  ;;  %v2487_v18 = vpop.f32.mrf.mxu0 }
 0x3d2   : > { %v1816_v44 = vadd.f32 %v5969_v36, %v1815_v4  ;;  %v2488_v13 = vadd.f32 %v5969_v36, %v2487_v18  ;;  %v6260_v45 = vpop.trf.xlu0  ;;  %v6265_v36 = vld [vmem:[%s6941_s2] ss:$0 sm:$0xff] }
 0x3d3   : > { %v2324_v30 = vmax.f32 %v2287_v48, 0.0  ;;  %v3025_v23 = vmax.f32 %v2964_v61, 0.0 }
 0x3d4   : > { %v1849_v12 = vmax.f32 %v1816_v44, 0.0  ;;  %v2548_v0 = vmax.f32 %v2488_v13, 0.0 }
 0x3d5   : > { %v2355_v22 = vadd.f32 %v2354_v34, %v2324_v30  ;;  %v3056_v40 = vadd.f32 %v3055_v53, %v3025_v23  ;;  %v6273_v34 = vpop.trf.xlu2 }
 0x3d6   : > { %v1880_v32 = vadd.f32 %v1879_v42, %v1849_v12  ;;  %v2579_v62 = vadd.f32 %v2578_v50, %v2548_v0  ;;  %v2124_v42 = vrot.slane %v2123_v57, 1 }
 0x3d8   : > { %v1881_v59 = vrot.slane %v1880_v32, 4  ;;  %v2288_v58 = vpop.f32.mrf.mxu3  ;;  %v2965_v14 = vpop.f32.mrf.mxu2  ;;  %v2125_v18 = vadd.f32 %v2124_v42, %v2123_v57 }
 0x3d9   : > { %v2289_v54 = vadd.f32 %v6265_v36, %v2288_v58  ;;  %v2966_v11 = vadd.f32 %v6265_v36, %v2965_v14  ;;  %v2490_v35 = vpop.f32.mrf.mxu0  ;;  %v2694_v21 = vpop.f32.mrf.mxu1 }
 0x3da   : > { %v1882_v37 = vadd.f32 %v1881_v59, %v1880_v32  ;;  %v2491_v20 = vadd.f32 %v6265_v36, %v2490_v35  ;;  %v6275_v53 = vpop.trf.xlu0  ;;  %v2695_v48 = vadd.f32 %v6265_v36, %v2694_v21  ;;  %v2126_v58 = vmul.f32 %v2125_v18, %v5881_v10 }
 0x3db   : > { %v2325_v8 = vmax.f32 %v2289_v54, 0.0  ;;  %v3026_v16 = vmax.f32 %v2966_v11, 0.0 }
 0x3dc   : > { %v1883_v38 = vrot.slane %v1882_v37, 2  ;;  %v2549_v24 = vmax.f32 %v2491_v20, 0.0  ;;  %4797 = vmatmul.msk.bf16.gmra.mxu0 %vm474_vm1, %v2397_v49  ;;  %4807 = vmatmul.msk.bf16.gmra.mxu1 %vm474_vm1, %v6043_v63  ;;  %v2774_v0 = vmax.f32 %v2695_v48, 0.0 }
 0x3dd   : > { %v2356_v50 = vadd.f32 %v2355_v22, %v2325_v8  ;;  %v3057_v25 = vadd.f32 %v3056_v40, %v3026_v16  ;;  %4831 = vmatmul.msk.bf16.gmra.mxu2 %vm474_vm1, %v6020_v27  ;;  %4840 = vmatmul.msk.bf16.gmra.mxu3 %vm474_vm1, %v6202_v60  ;;  %v6287_v49 = vpop.trf.xlu2 }
 0x3de   : > { %v1884_v31 = vadd.f32 %v1883_v38, %v1882_v37  ;;  %v2580_v19 = vadd.f32 %v2579_v62, %v2549_v24 }
 0x3e0   : > { %v1885_v61 = vrot.slane %v1884_v31, 1  ;;  %v2291_v4 = vpop.f32.mrf.mxu3  ;;  %v2968_v63 = vpop.f32.mrf.mxu2 }
 0x3e1   : > { %v2292_v44 = vadd.f32 %v6265_v36, %v2291_v4  ;;  %v2969_v13 = vadd.f32 %v6265_v36, %v2968_v63  ;;  %v2492_v30 = vpop.f32.mrf.mxu0  ;;  %v2696_v23 = vpop.f32.mrf.mxu1 }
 0x3e2   : > { %v1886_v12 = vadd.f32 %v1885_v61, %v1884_v31  ;;  %v2493_v27 = vadd.f32 %v6265_v36, %v2492_v30  ;;  %v2697_v60 = vadd.f32 %v6265_v36, %v2696_v23  ;;  %v6289_v59 = vpop.trf.xlu0 }
 0x3e3   : > { %v2326_v56 = vmax.f32 %v2292_v44, 0.0  ;;  %v3027_v22 = vmax.f32 %v2969_v13, 0.0 }
 0x3e4   : > { %v1887_v40 = vmul.f32 %v1886_v12, %v5881_v10  ;;  %v2550_v32 = vmax.f32 %v2493_v27, 0.0  ;;  %v2775_v62 = vmax.f32 %v2697_v60, 0.0 }
 0x3e5   : > { %v2357_v14 = vadd.f32 %v2356_v50, %v2326_v56  ;;  %v3058_v57 = vadd.f32 %v3057_v25, %v3027_v22  ;;  %v6311_v63 = vpop.trf.xlu2 }
 0x3e6   : > { %v4286_v54 = vsel %vm4285_vm6, %v6119_v7, %v1887_v40  ;;  %v2581_v11 = vadd.f32 %v2580_v19, %v2550_v32  ;;  %v2806_v35 = vadd.f32 %v2775_v62, %v2774_v0 }
 0x3e7   : > { %v6295_v21 = vsel %vm4287_vm7, %v4286_v54, %v2126_v58 }
 0x3e8   : > { %v2293_v37 = vpop.f32.mrf.mxu3  ;;  %v2970_v20 = vpop.f32.mrf.mxu2 }
 0x3e9   : > { %v2294_v8 = vadd.f32 %v6265_v36, %v2293_v37  ;;  %v2971_v16 = vadd.f32 %v6265_v36, %v2970_v20  ;;  %v2495_v38 = vpop.f32.mrf.mxu0  ;;  %v2699_v24 = vpop.f32.mrf.mxu1 }
 0x3ea   : > { %v2496_v42 = vadd.f32 %v6265_v36, %v2495_v38  ;;  %v2700_v50 = vadd.f32 %v6265_v36, %v2699_v24  ;;  %v6305_v48 = vpop.trf.xlu0 }
 0x3eb   : > { %v2327_v25 = vmax.f32 %v2294_v8, 0.0  ;;  %v3028_v31 = vmax.f32 %v2971_v16, 0.0 }
 0x3ec   : > { %v2551_v7 = vmax.f32 %v2496_v42, 0.0  ;;  %v2776_v19 = vmax.f32 %v2700_v50, 0.0  ;;  %4808 = vmatmul.msk.bf16.gmra.mxu1 %vm474_vm1, %v6068_v41  ;;  %4850 = vmatmul.msk.bf16.vlgmr.msrb.gmra.mxu0 %vm474_vm1, %v6244_v9 }
 0x3ed   : > { %v2358_v61 = vadd.f32 %v2357_v14, %v2327_v25  ;;  %v3059_v4 = vadd.f32 %v3058_v57, %v3028_v31  ;;  %4841 = vmatmul.msk.bf16.gmra.mxu3 %vm474_vm1, %v6041_v1  ;;  %4884 = vmatmul.msk.bf16.vlgmr.msrb.gmra.mxu2 %vm474_vm1, %v6223_v26 }
 0x3ee   : > { %v2582_v18 = vadd.f32 %v2581_v11, %v2551_v7  ;;  %v2807_v44 = vadd.f32 %v2806_v35, %v2776_v19  ;;  %v6319_v11 = vpop.trf.xlu2 }
 0x3ef   : > { %v2359_v13 = vrot.slane %v2358_v61, 4 }
 0x3f0   : > { %v2973_v30 = vpop.f32.mrf.mxu2  ;;  %v3172_v41 = vpop.f32.mrf.mxu3 }
 0x3f1   : > { %v2360_v23 = vadd.f32 %v2359_v13, %v2358_v61  ;;  %v2974_v9 = vadd.f32 %v6265_v36, %v2973_v30  ;;  %v2497_v12 = vpop.f32.mrf.mxu0  ;;  %v2701_v0 = vpop.f32.mrf.mxu1  ;;  %v3173_v54 = vadd.f32 %v6265_v36, %v3172_v41 }
 0x3f2   : > { %v2498_v27 = vadd.f32 %v6265_v36, %v2497_v12  ;;  %v2702_v60 = vadd.f32 %v6265_v36, %v2701_v0  ;;  %v6316_v40 = vpop.trf.xlu0 }
 0x3f3   : > { %v2361_v1 = vrot.slane %v2360_v23, 2  ;;  %v3029_v56 = vmax.f32 %v2974_v9, 0.0  ;;  %v3252_v31 = vmax.f32 %v3173_v54, 0.0 }
 0x3f4   : > { %v2552_v22 = vmax.f32 %v2498_v27, 0.0  ;;  %v2777_v26 = vmax.f32 %v2702_v60, 0.0 }
 0x3f5   : > { %v2362_v32 = vadd.f32 %v2361_v1, %v2360_v23  ;;  %v3060_v62 = vadd.f32 %v3059_v4, %v3029_v56 }
 0x3f6   : > { %v2583_v58 = vadd.f32 %v2582_v18, %v2552_v22  ;;  %v2808_v14 = vadd.f32 %v2807_v44, %v2777_v26  ;;  %v3344_v56 = vpop.trf.xlu2 }
 0x3f7   : > { %v2363_v57 = vrot.slane %v2362_v32, 1 }
 0x3f8   : > { %v2975_v35 = vpop.f32.mrf.mxu2  ;;  %v3174_v37 = vpop.f32.mrf.mxu3 }
 0x3f9   : > { %v2364_v20 = vadd.f32 %v2363_v57, %v2362_v32  ;;  %v2976_v8 = vadd.f32 %v6265_v36, %v2975_v35  ;;  %v3175_v16 = vadd.f32 %v6265_v36, %v3174_v37  ;;  %v2500_v38 = vpop.f32.mrf.mxu0  ;;  %v2704_v24 = vpop.f32.mrf.mxu1 }
 0x3fa   : > { %v2501_v42 = vadd.f32 %v6265_v36, %v2500_v38  ;;  %v2705_v50 = vadd.f32 %v6265_v36, %v2704_v24  ;;  %v6330_v18 = vpop.trf.xlu0 }
 0x3fb   : > { %v2365_v25 = vmul.f32 %v2364_v20, %v5881_v10  ;;  %v3030_v7 = vmax.f32 %v2976_v8, 0.0  ;;  %v3253_v19 = vmax.f32 %v3175_v16, 0.0 }
 0x3fc   : > { %v2553_v61 = vmax.f32 %v2501_v42, 0.0  ;;  %v2778_v4 = vmax.f32 %v2705_v50, 0.0  ;;  %4809 = vmatmul.msk.bf16.gmra.mxu1 %vm474_vm1, %v6091_v28  ;;  %4851 = vmatmul.msk.bf16.gmra.mxu0 %vm474_vm1, %v6273_v34 }
 0x3fd   : > { %v3061_v44 = vadd.f32 %v3060_v62, %v3030_v7  ;;  %v3284_v13 = vadd.f32 %v3253_v19, %v3252_v31  ;;  %4842 = vmatmul.msk.bf16.gmra.mxu3 %vm474_vm1, %v6066_v3  ;;  %4885 = vmatmul.msk.bf16.gmra.mxu2 %vm474_vm1, %v6246_v17  ;;  %v6338_v30 = vsel %vm4289_vm8, %v6295_v21, %v2365_v25 }
 0x3fe   : > { %v2584_v41 = vadd.f32 %v2583_v58, %v2553_v61  ;;  %v2809_v23 = vadd.f32 %v2808_v14, %v2778_v4  ;;  %v6360_v61 = vpop.trf.xlu2 }
 0x400   : > { %v2978_v28 = vpop.f32.mrf.mxu2  ;;  %v3177_v9 = vpop.f32.mrf.mxu3 }
 0x401   : > { %v2979_v34 = vadd.f32 %v6265_v36, %v2978_v28  ;;  %v3178_v12 = vadd.f32 %v6265_v36, %v3177_v9  ;;  %v2502_v0 = vpop.f32.mrf.mxu0  ;;  %v2706_v27 = vpop.f32.mrf.mxu1 }
 0x402   : > { %v2503_v60 = vadd.f32 %v6265_v36, %v2502_v0  ;;  %v2707_v3 = vadd.f32 %v6265_v36, %v2706_v27  ;;  %v6344_v26 = vpop.trf.xlu0 }
 0x403   : > { %v3031_v1 = vmax.f32 %v2979_v34, 0.0  ;;  %v3254_v17 = vmax.f32 %v3178_v12, 0.0 }
 0x404   : > { %v2554_v22 = vmax.f32 %v2503_v60, 0.0  ;;  %v2779_v21 = vmax.f32 %v2707_v3, 0.0 }
 0x405   : > { %v3062_v32 = vadd.f32 %v3061_v44, %v3031_v1  ;;  %v3285_v62 = vadd.f32 %v3284_v13, %v3254_v17 }
 0x406   : > { %v2585_v58 = vadd.f32 %v2584_v41, %v2554_v22  ;;  %v2810_v14 = vadd.f32 %v2809_v23, %v2779_v21  ;;  %v3346_v22 = vpop.trf.xlu2 }
 0x408   : > { %v2980_v57 = vpop.f32.mrf.mxu2  ;;  %v3179_v54 = vpop.f32.mrf.mxu3 }
 0x409   : > { %v2981_v35 = vadd.f32 %v6265_v36, %v2980_v57  ;;  %v3180_v37 = vadd.f32 %v6265_v36, %v3179_v54  ;;  %v2505_v20 = vpop.f32.mrf.mxu0  ;;  %v2709_v8 = vpop.f32.mrf.mxu1 }
 0x40a   : > { %v2506_v16 = vadd.f32 %v6265_v36, %v2505_v20  ;;  %v2710_v38 = vadd.f32 %v6265_v36, %v2709_v8  ;;  %v6354_v31 = vpop.trf.xlu0 }
 0x40b   : > { %v3032_v24 = vmax.f32 %v2981_v35, 0.0  ;;  %v3255_v42 = vmax.f32 %v3180_v37, 0.0 }
 0x40c   : > { %v2555_v50 = vmax.f32 %v2506_v16, 0.0  ;;  %v2780_v25 = vmax.f32 %v2710_v38, 0.0  ;;  %4810 = vmatmul.msk.bf16.gmra.mxu1 %vm474_vm1, %v6122_v33  ;;  %4852 = vmatmul.msk.bf16.gmra.mxu0 %vm474_vm1, %v6311_v63 }
 0x40d   : > { %v3063_v7 = vadd.f32 %v3062_v32, %v3032_v24  ;;  %v3286_v19 = vadd.f32 %v3285_v62, %v3255_v42  ;;  %4843 = vmatmul.msk.bf16.gmra.mxu3 %vm474_vm1, %v6089_v39  ;;  %4886 = vmatmul.msk.bf16.gmra.mxu2 %vm474_vm1, %v6275_v53 }
 0x40e   : > { %v2586_v4 = vadd.f32 %v2585_v58, %v2555_v50  ;;  %v2811_v44 = vadd.f32 %v2810_v14, %v2780_v25 }
 0x410   : > { %v2983_v13 = vpop.f32.mrf.mxu2  ;;  %v3182_v41 = vpop.f32.mrf.mxu3 }
 0x411   : > { %v2984_v33 = vadd.f32 %v6265_v36, %v2983_v13  ;;  %v3183_v63 = vadd.f32 %v6265_v36, %v3182_v41  ;;  %v2507_v23 = vpop.f32.mrf.mxu0  ;;  %v2711_v28 = vpop.f32.mrf.mxu1 }
 0x412   : > { %v2508_v9 = vadd.f32 %v6265_v36, %v2507_v23  ;;  %v2712_v34 = vadd.f32 %v6265_v36, %v2711_v28  ;;  %v6366_v27 = vpop.trf.xlu0 }
 0x413   : > { %v3033_v39 = vmax.f32 %v2984_v33, 0.0  ;;  %v3256_v12 = vmax.f32 %v3183_v63, 0.0 }
 0x414   : > { %v2556_v0 = vmax.f32 %v2508_v9, 0.0  ;;  %v2781_v53 = vmax.f32 %v2712_v34, 0.0 }
 0x415   : > { %v3064_v60 = vadd.f32 %v3063_v7, %v3033_v39  ;;  %v3287_v3 = vadd.f32 %v3286_v19, %v3256_v12 }
 0x416   : > { %v2587_v1 = vadd.f32 %v2586_v4, %v2556_v0  ;;  %v2812_v17 = vadd.f32 %v2811_v44, %v2781_v53 }
 0x418   : > { %v2985_v21 = vpop.f32.mrf.mxu2  ;;  %v3184_v32 = vpop.f32.mrf.mxu3 }
 0x419   : > { %v2986_v62 = vadd.f32 %v6265_v36, %v2985_v21  ;;  %v3185_v58 = vadd.f32 %v6265_v36, %v3184_v32  ;;  %v2510_v14 = vpop.f32.mrf.mxu0  ;;  %v2714_v57 = vpop.f32.mrf.mxu1 }
 0x41a   : > { %v2511_v54 = vadd.f32 %v6265_v36, %v2510_v14  ;;  %v2715_v35 = vadd.f32 %v6265_v36, %v2714_v57  ;;  %v6375_v38 = vpop.trf.xlu0 }
 0x41b   : > { %v3034_v37 = vmax.f32 %v2986_v62, 0.0  ;;  %v3257_v20 = vmax.f32 %v3185_v58, 0.0 }
 0x41c   : > { %v2557_v8 = vmax.f32 %v2511_v54, 0.0  ;;  %v2782_v16 = vmax.f32 %v2715_v35, 0.0  ;;  %4811 = vmatmul.msk.bf16.gmra.mxu1 %vm474_vm1, %v6146_v2  ;;  %4853 = vmatmul.msk.bf16.gmra.mxu0 %vm474_vm1, %v3344_v56 }
 0x41d   : > { %v3065_v24 = vadd.f32 %v3064_v60, %v3034_v37  ;;  %v3288_v42 = vadd.f32 %v3287_v3, %v3257_v20  ;;  %4844 = vmatmul.msk.bf16.gmra.mxu3 %vm474_vm1, %v6115_v5  ;;  %4887 = vmatmul.msk.bf16.gmra.mxu2 %vm474_vm1, %v6305_v48  ;;  %v6385_v5 = vpop.trf.xlu2 }
 0x41e   : > { %v2588_v50 = vadd.f32 %v2587_v1, %v2557_v8  ;;  %v2813_v25 = vadd.f32 %v2812_v17, %v2782_v16 }
 0x420   : > { %v2988_v7 = vpop.f32.mrf.mxu2  ;;  %v3187_v19 = vpop.f32.mrf.mxu3 }
 0x421   : > { %v2989_v4 = vadd.f32 %v6265_v36, %v2988_v7  ;;  %v3188_v2 = vadd.f32 %v6265_v36, %v3187_v19  ;;  %v2512_v44 = vpop.f32.mrf.mxu0  ;;  %v2716_v56 = vpop.f32.mrf.mxu1 }
 0x422   : > { %v2513_v13 = vadd.f32 %v6265_v36, %v2512_v44  ;;  %v2717_v41 = vadd.f32 %v6265_v36, %v2716_v56  ;;  %v6387_v28 = vpop.trf.xlu0 }
 0x423   : > { %v3035_v33 = vmax.f32 %v2989_v4, 0.0  ;;  %v3258_v63 = vmax.f32 %v3188_v2, 0.0 }
 0x424   : > { %v2558_v23 = vmax.f32 %v2513_v13, 0.0  ;;  %v2783_v48 = vmax.f32 %v2717_v41, 0.0 }
 0x425   : > { %v3066_v9 = vadd.f32 %v3065_v24, %v3035_v33  ;;  %v3289_v34 = vadd.f32 %v3288_v42, %v3258_v63  ;;  %v3348_v20 = vpop.trf.xlu2 }
 0x426   : > { %v2589_v39 = vadd.f32 %v2588_v50, %v2558_v23  ;;  %v2814_v12 = vadd.f32 %v2813_v25, %v2783_v48 }
 0x428   : > { %v2990_v0 = vpop.f32.mrf.mxu2  ;;  %v3189_v53 = vpop.f32.mrf.mxu3 }
 0x429   : > { %v2991_v60 = vadd.f32 %v6265_v36, %v2990_v0  ;;  %v3190_v3 = vadd.f32 %v6265_v36, %v3189_v53  ;;  %v2515_v1 = vpop.f32.mrf.mxu0  ;;  %v2719_v17 = vpop.f32.mrf.mxu1 }
 0x42a   : > { %v2516_v21 = vadd.f32 %v6265_v36, %v2515_v1  ;;  %v2720_v32 = vadd.f32 %v6265_v36, %v2719_v17  ;;  %v6396_v54 = vpop.trf.xlu0 }
 0x42b   : > { %v3036_v62 = vmax.f32 %v2991_v60, 0.0  ;;  %v3259_v58 = vmax.f32 %v3190_v3, 0.0 }
 0x42c   : > { %v2559_v14 = vmax.f32 %v2516_v21, 0.0  ;;  %v2784_v57 = vmax.f32 %v2720_v32, 0.0  ;;  %4812 = vmatmul.msk.bf16.gmra.mxu1 %vm474_vm1, %v6186_v47  ;;  %4854 = vmatmul.msk.bf16.gmra.mxu0 %vm474_vm1, %v3346_v22 }
 0x42d   : > { %v3067_v35 = vadd.f32 %v3066_v9, %v3036_v62  ;;  %v3290_v37 = vadd.f32 %v3289_v34, %v3259_v58  ;;  %4845 = vmatmul.msk.bf16.gmra.mxu3 %vm474_vm1, %v6144_v52  ;;  %4888 = vmatmul.msk.bf16.gmra.mxu2 %vm474_vm1, %v6330_v18  ;;  %v6408_v63 = vpop.trf.xlu2 }
 0x42e   : > { %v2590_v8 = vadd.f32 %v2589_v39, %v2559_v14  ;;  %v2815_v16 = vadd.f32 %v2814_v12, %v2784_v57 }
 0x430   : > { %v2993_v24 = vpop.f32.mrf.mxu2  ;;  %v3192_v42 = vpop.f32.mrf.mxu3 }
 0x431   : > { %v2994_v50 = vadd.f32 %v6265_v36, %v2993_v24  ;;  %v3193_v47 = vadd.f32 %v6265_v36, %v3192_v42  ;;  %v2517_v22 = vpop.f32.mrf.mxu0  ;;  %v2721_v25 = vpop.f32.mrf.mxu1 }
 0x432   : > { %v2518_v7 = vadd.f32 %v6265_v36, %v2517_v22  ;;  %v2722_v19 = vadd.f32 %v6265_v36, %v2721_v25  ;;  %v6406_v18 = vpop.trf.xlu0 }
 0x433   : > { %v3037_v4 = vmax.f32 %v2994_v50, 0.0  ;;  %v3260_v52 = vmax.f32 %v3193_v47, 0.0 }
 0x434   : > { %v2560_v2 = vmax.f32 %v2518_v7, 0.0  ;;  %v2785_v44 = vmax.f32 %v2722_v19, 0.0 }
 0x435   : > { %v3068_v56 = vadd.f32 %v3067_v35, %v3037_v4  ;;  %v3291_v13 = vadd.f32 %v3290_v37, %v3260_v52 }
 0x436   : > { %v2591_v41 = vadd.f32 %v2590_v8, %v2560_v2  ;;  %v2816_v33 = vadd.f32 %v2815_v16, %v2785_v44 }
 0x438   : > { %v2995_v23 = vpop.f32.mrf.mxu2  ;;  %v3194_v48 = vpop.f32.mrf.mxu3 }
 0x439   : > { %v2996_v9 = vadd.f32 %v6265_v36, %v2995_v23  ;;  %v3195_v34 = vadd.f32 %v6265_v36, %v3194_v48  ;;  %v2520_v39 = vpop.f32.mrf.mxu0  ;;  %v2724_v12 = vpop.f32.mrf.mxu1 }
 0x43a   : > { %v2521_v0 = vadd.f32 %v6265_v36, %v2520_v39  ;;  %v2725_v53 = vadd.f32 %v6265_v36, %v2724_v12  ;;  %v6417_v21 = vpop.trf.xlu0 }
 0x43b   : > { %v3038_v60 = vmax.f32 %v2996_v9, 0.0  ;;  %v3261_v3 = vmax.f32 %v3195_v34, 0.0 }
 0x43c   : > { %v2561_v1 = vmax.f32 %v2521_v0, 0.0  ;;  %v2786_v17 = vmax.f32 %v2725_v53, 0.0  ;;  %4813 = vmatmul.msk.bf16.gmra.mxu1 %vm474_vm1, %v6212_v46  ;;  %4855 = vmatmul.msk.bf16.gmra.mxu0 %vm474_vm1, %v3348_v20 }
 0x43d   : > { %v3069_v32 = vadd.f32 %v3068_v56, %v3038_v60  ;;  %v3292_v62 = vadd.f32 %v3291_v13, %v3261_v3  ;;  %4846 = vmatmul.msk.bf16.gmra.mxu3 %vm474_vm1, %v6170_v6  ;;  %4889 = vmatmul.msk.bf16.gmra.mxu2 %vm474_vm1, %v6354_v31  ;;  %v3350_v6 = vpop.trf.xlu2 }
 0x43e   : > { %v2592_v58 = vadd.f32 %v2591_v41, %v2561_v1  ;;  %v2817_v14 = vadd.f32 %v2816_v33, %v2786_v17 }
 0x440   : > { %v2998_v57 = vpop.f32.mrf.mxu2  ;;  %v3197_v35 = vpop.f32.mrf.mxu3 }
 0x441   : > { %v2999_v37 = vadd.f32 %v6265_v36, %v2998_v57  ;;  %v3198_v46 = vadd.f32 %v6265_v36, %v3197_v35  ;;  %v2522_v8 = vpop.f32.mrf.mxu0  ;;  %v2726_v20 = vpop.f32.mrf.mxu1 }
 0x442   : > { %v2523_v16 = vadd.f32 %v6265_v36, %v2522_v8  ;;  %v2727_v24 = vadd.f32 %v6265_v36, %v2726_v20  ;;  %v6427_v31 = vpop.trf.xlu0 }
 0x443   : > { %v3039_v42 = vmax.f32 %v2999_v37, 0.0  ;;  %v3262_v50 = vmax.f32 %v3198_v46, 0.0  ;;  %v6438_v0 = vpop.trf.xlu1 }
 0x444   : > { %v2562_v47 = vmax.f32 %v2523_v16, 0.0  ;;  %v2787_v22 = vmax.f32 %v2727_v24, 0.0 }
 0x445   : > { %v3070_v25 = vadd.f32 %v3069_v32, %v3039_v42  ;;  %v3293_v7 = vadd.f32 %v3292_v62, %v3262_v50  ;;  %v6444_v3 = vpop.trf.xlu2 }
 0x446   : > { %v2593_v19 = vadd.f32 %v2592_v58, %v2562_v47  ;;  %v2818_v4 = vadd.f32 %v2817_v14, %v2787_v22 }
 0x448   : > { %v3000_v52 = vpop.f32.mrf.mxu2  ;;  %v3199_v2 = vpop.f32.mrf.mxu3 }
 0x449   : > { %v3001_v44 = vadd.f32 %v6265_v36, %v3000_v52  ;;  %v3200_v56 = vadd.f32 %v6265_v36, %v3199_v2  ;;  %v2525_v13 = vpop.f32.mrf.mxu0  ;;  %v2729_v41 = vpop.f32.mrf.mxu1 }
 0x44a   : > { %v2526_v33 = vadd.f32 %v6265_v36, %v2525_v13  ;;  %v2730_v23 = vadd.f32 %v6265_v36, %v2729_v41  ;;  %v6436_v12 = vpop.trf.xlu0 }
 0x44b   : > { %v3040_v48 = vmax.f32 %v3001_v44, 0.0  ;;  %v3263_v9 = vmax.f32 %v3200_v56, 0.0  ;;  %v6452_v16 = vpop.trf.xlu1 }
 0x44c   : > { %v2563_v34 = vmax.f32 %v2526_v33, 0.0  ;;  %v2788_v39 = vmax.f32 %v2730_v23, 0.0  ;;  %4814 = vmatmul.msk.bf16.gmra.mxu1 %vm474_vm1, %v6233_v55  ;;  %4856 = vmatmul.msk.bf16.gmra.mxu0 %vm474_vm1, %v3350_v6 }
 0x44d   : > { %v3071_v53 = vadd.f32 %v3070_v25, %v3040_v48  ;;  %v3294_v60 = vadd.f32 %v3293_v7, %v3263_v9  ;;  %4847 = vmatmul.msk.bf16.gmra.mxu3 %vm474_vm1, %v6192_v29  ;;  %4890 = vmatmul.msk.bf16.gmra.mxu2 %vm474_vm1, %v6375_v38  ;;  %v3352_v47 = vpop.trf.xlu2 }
 0x44e   : > { %v2594_v1 = vadd.f32 %v2593_v19, %v2563_v34  ;;  %v2819_v17 = vadd.f32 %v2818_v4, %v2788_v39 }
 0x450   : > { %v3003_v32 = vpop.f32.mrf.mxu2  ;;  %v3202_v55 = vpop.f32.mrf.mxu3 }
 0x451   : > { %v3004_v62 = vadd.f32 %v6265_v36, %v3003_v32  ;;  %v3203_v58 = vadd.f32 %v6265_v36, %v3202_v55  ;;  %v2527_v14 = vpop.f32.mrf.mxu0  ;;  %v2731_v57 = vpop.f32.mrf.mxu1 }
 0x452   : > { %v2528_v35 = vadd.f32 %v6265_v36, %v2527_v14  ;;  %v2732_v37 = vadd.f32 %v6265_v36, %v2731_v57  ;;  %v6450_v20 = vpop.trf.xlu0 }
 0x453   : > { %v3041_v29 = vmax.f32 %v3004_v62, 0.0  ;;  %v3264_v46 = vmax.f32 %v3203_v58, 0.0  ;;  %v6461_v23 = vpop.trf.xlu1 }
 0x454   : > { %v2564_v8 = vmax.f32 %v2528_v35, 0.0  ;;  %v2789_v38 = vmax.f32 %v2732_v37, 0.0 }
 0x455   : > { %v3072_v24 = vadd.f32 %v3071_v53, %v3041_v29  ;;  %v3295_v42 = vadd.f32 %v3294_v60, %v3264_v46 }
 0x456   : > { %v2595_v50 = vadd.f32 %v2594_v1, %v2564_v8  ;;  %v2820_v6 = vadd.f32 %v2819_v17, %v2789_v38 }
 0x458   : > { %v3005_v22 = vpop.f32.mrf.mxu2  ;;  %v3204_v25 = vpop.f32.mrf.mxu3 }
 0x459   : > { %v3006_v7 = vadd.f32 %v6265_v36, %v3005_v22  ;;  %v3205_v19 = vadd.f32 %v6265_v36, %v3204_v25  ;;  %v2530_v4 = vpop.f32.mrf.mxu0  ;;  %v2734_v52 = vpop.f32.mrf.mxu1 }
 0x45a   : > { %v2531_v2 = vadd.f32 %v6265_v36, %v2530_v4  ;;  %v2735_v44 = vadd.f32 %v6265_v36, %v2734_v52  ;;  %v6467_v34 = vpop.trf.xlu0 }
 0x45b   : > { %v3042_v56 = vmax.f32 %v3006_v7, 0.0  ;;  %v3265_v13 = vmax.f32 %v3205_v19, 0.0  ;;  %v6473_v29 = vpop.trf.xlu1 }
 0x45c   : > { %v2565_v41 = vmax.f32 %v2531_v2, 0.0  ;;  %v2790_v33 = vmax.f32 %v2735_v44, 0.0  ;;  %4857 = vmatmul.msk.bf16.gmra.mxu0 %vm474_vm1, %v3352_v47  ;;  %4867 = vmatmul.msk.bf16.vlgmr.msrb.gmra.mxu1 %vm474_vm1, %v6417_v21 }
 0x45d   : > { %v3073_v48 = vadd.f32 %v3072_v24, %v3042_v56  ;;  %v3296_v9 = vadd.f32 %v3295_v42, %v3265_v13  ;;  %4848 = vmatmul.msk.bf16.gmra.mxu3 %vm474_vm1, %v6214_v51  ;;  %4891 = vmatmul.msk.bf16.gmra.mxu2 %vm474_vm1, %v6396_v54 }
 0x45e   : > { %v2596_v39 = vadd.f32 %v2595_v50, %v2565_v41  ;;  %v2821_v53 = vadd.f32 %v2820_v6, %v2790_v33 }
 0x460   : > { %v3008_v60 = vpop.f32.mrf.mxu2  ;;  %v3207_v1 = vpop.f32.mrf.mxu3 }
 0x461   : > { %v3009_v17 = vadd.f32 %v6265_v36, %v3008_v60  ;;  %v3208_v21 = vadd.f32 %v6265_v36, %v3207_v1  ;;  %v2532_v32 = vpop.f32.mrf.mxu0  ;;  %v2736_v55 = vpop.f32.mrf.mxu1 }
 0x462   : > { %v2533_v62 = vadd.f32 %v6265_v36, %v2532_v32  ;;  %v2737_v58 = vadd.f32 %v6265_v36, %v2736_v55  ;;  %v6477_v38 = vpop.trf.xlu0 }
 0x463   : > { %v3043_v51 = vmax.f32 %v3009_v17, 0.0  ;;  %v3266_v14 = vmax.f32 %v3208_v21, 0.0  ;;  %v6493_v13 = vpop.trf.xlu1 }
 0x464   : > { %v2566_v57 = vmax.f32 %v2533_v62, 0.0  ;;  %v2791_v54 = vmax.f32 %v2737_v58, 0.0 }
 0x465   : > { %v3074_v35 = vadd.f32 %v3073_v48, %v3043_v51  ;;  %v3297_v37 = vadd.f32 %v3296_v9, %v3266_v14 }
 0x466   : > { %v6475_v46 = vadd.f32 %v2596_v39, %v2566_v57  ;;  %v2822_v8 = vadd.f32 %v2821_v53, %v2791_v54 }
 0x468   : > { %v3010_v24 = vpop.f32.mrf.mxu2  ;;  %v3209_v42 = vpop.f32.mrf.mxu3 }
 0x469   : > { %v3011_v50 = vadd.f32 %v6265_v36, %v3010_v24  ;;  %v3210_v6 = vadd.f32 %v6265_v36, %v3209_v42  ;;  %v2739_v47 = vpop.f32.mrf.mxu1  ;;  %v3411_v22 = vpop.f32.mrf.mxu0 }
 0x46a   : > { %v2740_v25 = vadd.f32 %v6265_v36, %v2739_v47  ;;  %v3412_v56 = vadd.f32 %v6265_v36, %v3411_v22  ;;  %v3583_v60 = vpop.trf.xlu0 }
 0x46b   : > { %v3044_v7 = vmax.f32 %v3011_v50, 0.0  ;;  %v3267_v19 = vmax.f32 %v3210_v6, 0.0  ;;  %v6503_v50 = vpop.trf.xlu1 }
 0x46c   : > { %v2792_v4 = vmax.f32 %v2740_v25, 0.0  ;;  %4858 = vmatmul.msk.bf16.gmra.mxu0 %vm474_vm1, %v6258_v43  ;;  %4868 = vmatmul.msk.bf16.gmra.mxu1 %vm474_vm1, %v6436_v12  ;;  %v3491_v9 = vmax.f32 %v3412_v56, 0.0 }
 0x46d   : > { %v6486_v52 = vadd.f32 %v3074_v35, %v3044_v7  ;;  %v3298_v2 = vadd.f32 %v3297_v37, %v3267_v19  ;;  %4892 = vmatmul.msk.bf16.gmra.mxu2 %vm474_vm1, %v6235_v15  ;;  %4901 = vmatmul.msk.bf16.vlgmr.msrb.gmra.mxu3 %vm474_vm1, %v6438_v0 }
 0x46e   : > { %v2823_v44 = vadd.f32 %v2822_v8, %v2792_v4 }
 0x470   : > { %v3212_v41 = vpop.f32.mrf.mxu3  ;;  %v3889_v33 = vpop.f32.mrf.mxu2 }
 0x471   : > { %v3213_v43 = vadd.f32 %v6265_v36, %v3212_v41  ;;  %v2741_v48 = vpop.f32.mrf.mxu1  ;;  %v3413_v12 = vpop.f32.mrf.mxu0  ;;  %v3890_v55 = vadd.f32 %v6265_v36, %v3889_v33 }
 0x472   : > { %v2742_v39 = vadd.f32 %v6265_v36, %v2741_v48  ;;  %v3414_v53 = vadd.f32 %v6265_v36, %v3413_v12  ;;  %v6513_v7 = vpop.trf.xlu0 }
 0x473   : > { %v3268_v15 = vmax.f32 %v3213_v43, 0.0  ;;  %v3969_v8 = vmax.f32 %v3890_v55, 0.0 }
 0x474   : > { %v2793_v1 = vmax.f32 %v2742_v39, 0.0  ;;  %v3492_v0 = vmax.f32 %v3414_v53, 0.0  ;;  %v4061_v53 = vpop.trf.xlu1 }
 0x475   : > { %v3299_v17 = vadd.f32 %v3298_v2, %v3268_v15 }
 0x476   : > { %v2824_v21 = vadd.f32 %v2823_v44, %v2793_v1  ;;  %v3523_v32 = vadd.f32 %v3492_v0, %v3491_v9 }
 0x478   : > { %v3214_v62 = vpop.f32.mrf.mxu3  ;;  %v3891_v58 = vpop.f32.mrf.mxu2 }
 0x479   : > { %v3215_v51 = vadd.f32 %v6265_v36, %v3214_v62  ;;  %v3892_v14 = vadd.f32 %v6265_v36, %v3891_v58  ;;  %v2744_v57 = vpop.f32.mrf.mxu1  ;;  %v3416_v54 = vpop.f32.mrf.mxu0 }
 0x47a   : > { %v2745_v35 = vadd.f32 %v6265_v36, %v2744_v57  ;;  %v3417_v37 = vadd.f32 %v6265_v36, %v3416_v54  ;;  %v3585_v0 = vpop.trf.xlu0 }
 0x47b   : > { %v3269_v24 = vmax.f32 %v3215_v51, 0.0  ;;  %v3970_v42 = vmax.f32 %v3892_v14, 0.0 }
 0x47c   : > { %v2794_v6 = vmax.f32 %v2745_v35, 0.0  ;;  %v3493_v47 = vmax.f32 %v3417_v37, 0.0  ;;  %4859 = vmatmul.msk.bf16.gmra.mxu0 %vm474_vm1, %v6287_v49  ;;  %4869 = vmatmul.msk.bf16.gmra.mxu1 %vm474_vm1, %v6467_v34 }
 0x47d   : > { %v3300_v22 = vadd.f32 %v3299_v17, %v3269_v24  ;;  %v4001_v25 = vadd.f32 %v3970_v42, %v3969_v8  ;;  %4893 = vmatmul.msk.bf16.gmra.mxu2 %vm474_vm1, %v6260_v45  ;;  %4902 = vmatmul.msk.bf16.gmra.mxu3 %vm474_vm1, %v6461_v23 }
 0x47e   : > { %v2825_v19 = vadd.f32 %v2824_v21, %v2794_v6  ;;  %v3524_v4 = vadd.f32 %v3523_v32, %v3493_v47  ;;  %v6530_v47 = vpop.trf.xlu1 }
 0x480   : > { %v3217_v2 = vpop.f32.mrf.mxu3  ;;  %v3894_v44 = vpop.f32.mrf.mxu2 }
 0x481   : > { %v3218_v56 = vadd.f32 %v6265_v36, %v3217_v2  ;;  %v3895_v49 = vadd.f32 %v6265_v36, %v3894_v44  ;;  %v2746_v41 = vpop.f32.mrf.mxu1  ;;  %v3418_v34 = vpop.f32.mrf.mxu0 }
 0x482   : > { %v2747_v33 = vadd.f32 %v6265_v36, %v2746_v41  ;;  %v3419_v43 = vadd.f32 %v6265_v36, %v3418_v34 }
 0x483   : > { %v3270_v45 = vmax.f32 %v3218_v56, 0.0  ;;  %v3971_v48 = vmax.f32 %v3895_v49, 0.0  ;;  %v6536_v49 = vpop.trf.xlu0 }
 0x484   : > { %v2795_v12 = vmax.f32 %v2747_v33, 0.0  ;;  %v3494_v23 = vmax.f32 %v3419_v43, 0.0 }
 0x485   : > { %v3301_v9 = vadd.f32 %v3300_v22, %v3270_v45  ;;  %v4002_v39 = vadd.f32 %v4001_v25, %v3971_v48 }
 0x486   : > { %v2826_v15 = vadd.f32 %v2825_v19, %v2795_v12  ;;  %v3525_v1 = vadd.f32 %v3524_v4, %v3494_v23 }
 0x488   : > { %v3219_v17 = vpop.f32.mrf.mxu3  ;;  %v3896_v21 = vpop.f32.mrf.mxu2 }
 0x489   : > { %v3220_v32 = vadd.f32 %v6265_v36, %v3219_v17  ;;  %v3897_v55 = vadd.f32 %v6265_v36, %v3896_v21  ;;  %v2749_v62 = vpop.f32.mrf.mxu1  ;;  %v3421_v58 = vpop.f32.mrf.mxu0 }
 0x48a   : > { %v2750_v51 = vadd.f32 %v6265_v36, %v2749_v62  ;;  %v3422_v14 = vadd.f32 %v6265_v36, %v3421_v58 }
 0x48b   : > { %v3271_v57 = vmax.f32 %v3220_v32, 0.0  ;;  %v3972_v54 = vmax.f32 %v3897_v55, 0.0  ;;  %v4063_v55 = vpop.trf.xlu1 }
 0x48c   : > { %v2796_v35 = vmax.f32 %v2750_v51, 0.0  ;;  %v3495_v37 = vmax.f32 %v3422_v14, 0.0  ;;  %4860 = vmatmul.msk.bf16.gmra.mxu0 %vm474_vm1, %v6319_v11  ;;  %4870 = vmatmul.msk.bf16.gmra.mxu1 %vm474_vm1, %v3583_v60 }
 0x48d   : > { %v3302_v8 = vadd.f32 %v3301_v9, %v3271_v57  ;;  %v4003_v24 = vadd.f32 %v4002_v39, %v3972_v54  ;;  %4894 = vmatmul.msk.bf16.gmra.mxu2 %vm474_vm1, %v6289_v59  ;;  %4903 = vmatmul.msk.bf16.gmra.mxu3 %vm474_vm1, %v6493_v13  ;;  %v3587_v57 = vpop.trf.xlu0 }
 0x48e   : > { %v2827_v42 = vadd.f32 %v2826_v15, %v2796_v35  ;;  %v3526_v6 = vadd.f32 %v3525_v1, %v3495_v37 }
 0x490   : > { %v3222_v22 = vpop.f32.mrf.mxu3  ;;  %v3899_v25 = vpop.f32.mrf.mxu2 }
 0x491   : > { %v3223_v19 = vadd.f32 %v6265_v36, %v3222_v22  ;;  %v3900_v11 = vadd.f32 %v6265_v36, %v3899_v25  ;;  %v2751_v4 = vpop.f32.mrf.mxu1  ;;  %v3423_v60 = vpop.f32.mrf.mxu0 }
 0x492   : > { %v2752_v2 = vadd.f32 %v6265_v36, %v2751_v4  ;;  %v3424_v44 = vadd.f32 %v6265_v36, %v3423_v60 }
 0x493   : > { %v3272_v59 = vmax.f32 %v3223_v19, 0.0  ;;  %v3973_v56 = vmax.f32 %v3900_v11, 0.0  ;;  %v6557_v60 = vpop.trf.xlu1 }
 0x494   : > { %v2797_v13 = vmax.f32 %v2752_v2, 0.0  ;;  %v3496_v41 = vmax.f32 %v3424_v44, 0.0 }
 0x495   : > { %v3303_v34 = vadd.f32 %v3302_v8, %v3272_v59  ;;  %v4004_v33 = vadd.f32 %v4003_v24, %v3973_v56  ;;  %v6551_v8 = vld [vmem:[%s6941_s2] ss:$0 sm:$0xff]  ;;  %v6559_v59 = vpop.trf.xlu0 }
 0x496   : > { %v2828_v43 = vadd.f32 %v2827_v42, %v2797_v13  ;;  %v3527_v45 = vadd.f32 %v3526_v6, %v3496_v41 }
 0x498   : > { %v3224_v48 = vpop.f32.mrf.mxu3  ;;  %v3901_v12 = vpop.f32.mrf.mxu2 }
 0x499   : > { %v3225_v23 = vadd.f32 %v6265_v36, %v3224_v48  ;;  %v3902_v9 = vadd.f32 %v6265_v36, %v3901_v12  ;;  %v2754_v39 = vpop.f32.mrf.mxu1  ;;  %v3426_v15 = vpop.f32.mrf.mxu0 }
 0x49a   : > { %v2755_v1 = vadd.f32 %v6265_v36, %v2754_v39  ;;  %v3427_v17 = vadd.f32 %v6265_v36, %v3426_v15 }
 0x49b   : > { %v3273_v21 = vmax.f32 %v3225_v23, 0.0  ;;  %v3974_v32 = vmax.f32 %v3902_v9, 0.0 }
 0x49c   : > { %v2798_v62 = vmax.f32 %v2755_v1, 0.0  ;;  %v3497_v58 = vmax.f32 %v3427_v17, 0.0  ;;  %4861 = vmatmul.msk.bf16.gmra.mxu0 %vm474_vm1, %v6360_v61  ;;  %4871 = vmatmul.msk.bf16.gmra.mxu1 %vm474_vm1, %v3585_v0 }
 0x49d   : > { %v3304_v51 = vadd.f32 %v3303_v34, %v3273_v21  ;;  %v4005_v14 = vadd.f32 %v4004_v33, %v3974_v32  ;;  %4895 = vmatmul.msk.bf16.gmra.mxu2 %vm474_vm1, %v6316_v40  ;;  %4904 = vmatmul.msk.bf16.gmra.mxu3 %vm474_vm1, %v4061_v53  ;;  %v4065_v32 = vpop.trf.xlu1 }
 0x49e   : > { %v2829_v54 = vadd.f32 %v2828_v43, %v2798_v62  ;;  %v3528_v36 = vadd.f32 %v3527_v45, %v3497_v58 }
 0x4a0   : > { %v3227_v35 = vpop.f32.mrf.mxu3  ;;  %v3904_v37 = vpop.f32.mrf.mxu2 }
 0x4a1   : > { %v3228_v61 = vadd.f32 %v6551_v8, %v3227_v35  ;;  %v3905_v0 = vadd.f32 %v6551_v8, %v3904_v37  ;;  %v2756_v24 = vpop.f32.mrf.mxu1  ;;  %v3428_v42 = vpop.f32.mrf.mxu0 }
 0x4a2   : > { %v2757_v40 = vadd.f32 %v6551_v8, %v2756_v24  ;;  %v3429_v53 = vadd.f32 %v6551_v8, %v3428_v42 }
 0x4a3   : > { %v3274_v6 = vmax.f32 %v3228_v61, 0.0  ;;  %v3975_v22 = vmax.f32 %v3905_v0, 0.0 }
 0x4a4   : > { %v2799_v25 = vmax.f32 %v2757_v40, 0.0  ;;  %v3498_v19 = vmax.f32 %v3429_v53, 0.0 }
 0x4a5   : > { %v3305_v11 = vadd.f32 %v3304_v51, %v3274_v6  ;;  %v4006_v4 = vadd.f32 %v4005_v14, %v3975_v22 }
 0x4a6   : > { %v2830_v2 = vadd.f32 %v2829_v54, %v2799_v25  ;;  %v3529_v44 = vadd.f32 %v3528_v36, %v3498_v19 }
 0x4a8   : > { %v3229_v56 = vpop.f32.mrf.mxu3  ;;  %v3906_v13 = vpop.f32.mrf.mxu2 }
 0x4a9   : > { %v3230_v41 = vadd.f32 %v6551_v8, %v3229_v56  ;;  %v3907_v34 = vadd.f32 %v6551_v8, %v3906_v13  ;;  %v2759_v33 = vpop.f32.mrf.mxu1  ;;  %v3431_v43 = vpop.f32.mrf.mxu0 }
 0x4aa   : > { %v2760_v45 = vadd.f32 %v6551_v8, %v2759_v33  ;;  %v3432_v48 = vadd.f32 %v6551_v8, %v3431_v43  ;;  %v6579_v56 = vpop.trf.xlu1 }
 0x4ab   : > { %v3275_v12 = vmax.f32 %v3230_v41, 0.0  ;;  %v3976_v23 = vmax.f32 %v3907_v34, 0.0 }
 0x4ac   : > { %v2800_v9 = vmax.f32 %v2760_v45, 0.0  ;;  %v3499_v39 = vmax.f32 %v3432_v48, 0.0  ;;  %4862 = vmatmul.msk.bf16.gmra.mxu0 %vm474_vm1, %v6385_v5  ;;  %4872 = vmatmul.msk.bf16.gmra.mxu1 %vm474_vm1, %v3587_v57 }
 0x4ad   : > { %v3306_v15 = vadd.f32 %v3305_v11, %v3275_v12  ;;  %v4007_v1 = vadd.f32 %v4006_v4, %v3976_v23  ;;  %4896 = vmatmul.msk.bf16.gmra.mxu2 %vm474_vm1, %v6344_v26  ;;  %4905 = vmatmul.msk.bf16.gmra.mxu3 %vm474_vm1, %v4063_v55  ;;  %v3589_v26 = vpop.trf.xlu0 }
 0x4ae   : > { %v2831_v17 = vadd.f32 %v2830_v2, %v2800_v9  ;;  %v3530_v21 = vadd.f32 %v3529_v44, %v3499_v39 }
 0x4b0   : > { %v3232_v62 = vpop.f32.mrf.mxu3  ;;  %v3909_v58 = vpop.f32.mrf.mxu2 }
 0x4b1   : > { %v3233_v51 = vadd.f32 %v6551_v8, %v3232_v62  ;;  %v3910_v14 = vadd.f32 %v6551_v8, %v3909_v58  ;;  %v2761_v54 = vpop.f32.mrf.mxu1  ;;  %v3433_v5 = vpop.f32.mrf.mxu0 }
 0x4b2   : > { %v2762_v57 = vadd.f32 %v6551_v8, %v2761_v54  ;;  %v3434_v36 = vadd.f32 %v6551_v8, %v3433_v5  ;;  %v4067_v54 = vpop.trf.xlu1 }
 0x4b3   : > { %v3276_v35 = vmax.f32 %v3233_v51, 0.0  ;;  %v3977_v37 = vmax.f32 %v3910_v14, 0.0 }
 0x4b4   : > { %v2801_v61 = vmax.f32 %v2762_v57, 0.0  ;;  %v3500_v42 = vmax.f32 %v3434_v36, 0.0 }
 0x4b5   : > { %v3307_v55 = vadd.f32 %v3306_v15, %v3276_v35  ;;  %v4008_v0 = vadd.f32 %v4007_v1, %v3977_v37  ;;  %v6587_v33 = vpop.trf.xlu0 }
 0x4b6   : > { %v2832_v24 = vadd.f32 %v2831_v17, %v2801_v61  ;;  %v3531_v19 = vadd.f32 %v3530_v21, %v3500_v42 }
 0x4b8   : > { %v3234_v40 = vpop.f32.mrf.mxu3  ;;  %v3911_v53 = vpop.f32.mrf.mxu2 }
 0x4b9   : > { %v3235_v6 = vadd.f32 %v6551_v8, %v3234_v40  ;;  %v2764_v22 = vpop.f32.mrf.mxu1  ;;  %v3436_v25 = vpop.f32.mrf.mxu0  ;;  %v3912_v44 = vadd.f32 %v6551_v8, %v3911_v53 }
 0x4ba   : > { %v2765_v11 = vadd.f32 %v6551_v8, %v2764_v22  ;;  %v3437_v4 = vadd.f32 %v6551_v8, %v3436_v25 }
 0x4bb   : > { %v3277_v2 = vmax.f32 %v3235_v6, 0.0  ;;  %v3978_v48 = vmax.f32 %v3912_v44, 0.0  ;;  %v2598_v6 = vrot.slane %v6475_v46, 4 }
 0x4bc   : > { %v2802_v13 = vmax.f32 %v2765_v11, 0.0  ;;  %v3501_v41 = vmax.f32 %v3437_v4, 0.0  ;;  %4863 = vmatmul.msk.bf16.gmra.mxu0 %vm474_vm1, %v6408_v63  ;;  %4873 = vmatmul.msk.bf16.gmra.mxu1 %vm474_vm1, %v3589_v26 }
 0x4bd   : > { %v3308_v34 = vadd.f32 %v3307_v55, %v3277_v2  ;;  %4897 = vmatmul.msk.bf16.gmra.mxu2 %vm474_vm1, %v6366_v27  ;;  %4906 = vmatmul.msk.bf16.gmra.mxu3 %vm474_vm1, %v4065_v32  ;;  %v4009_v27 = vadd.f32 %v4008_v0, %v3978_v48  ;;  %v3591_v36 = vpop.trf.xlu0 }
 0x4be   : > { %v2833_v43 = vadd.f32 %v2832_v24, %v2802_v13  ;;  %v3532_v45 = vadd.f32 %v3531_v19, %v3501_v41  ;;  %v3076_v19 = vrot.slane %v6486_v52, 4  ;;  %v6605_v13 = vpop.trf.xlu1  ;;  %v2599_v41 = vadd.f32 %v2598_v6, %v6475_v46 }
 0x4c0   : > { %v3237_v12 = vpop.f32.mrf.mxu3  ;;  %v3914_v23 = vpop.f32.mrf.mxu2 }
 0x4c1   : > { %v3238_v9 = vadd.f32 %v6551_v8, %v3237_v12  ;;  %v3915_v39 = vadd.f32 %v6551_v8, %v3914_v23  ;;  %v2766_v63 = vpop.f32.mrf.mxu1  ;;  %v3438_v15 = vpop.f32.mrf.mxu0 }
 0x4c2   : > { %v2767_v1 = vadd.f32 %v6551_v8, %v2766_v63  ;;  %v3439_v17 = vadd.f32 %v6551_v8, %v3438_v15  ;;  %v2600_v15 = vrot.slane %v2599_v41, 2 }
 0x4c3   : > { %v3278_v21 = vmax.f32 %v3238_v9, 0.0  ;;  %v3979_v32 = vmax.f32 %v3915_v39, 0.0 }
 0x4c4   : > { %v2803_v62 = vmax.f32 %v2767_v1, 0.0  ;;  %v3502_v58 = vmax.f32 %v3439_v17, 0.0 }
 0x4c5   : > { %v3309_v51 = vadd.f32 %v3308_v34, %v3278_v21  ;;  %v4010_v14 = vadd.f32 %v4009_v27, %v3979_v32 }
 0x4c6   : > { %v2834_v5 = vadd.f32 %v2833_v43, %v2803_v62  ;;  %v3533_v57 = vadd.f32 %v3532_v45, %v3502_v58  ;;  %v3353_v62 = vpop.trf.xlu2  ;;  %v2601_v58 = vadd.f32 %v2600_v15, %v2599_v41 }
 0x4c8   : > { %v3239_v35 = vpop.f32.mrf.mxu3  ;;  %v3916_v37 = vpop.f32.mrf.mxu2 }
 0x4c9   : > { %v3240_v26 = vadd.f32 %v6551_v8, %v3239_v35  ;;  %v3917_v61 = vadd.f32 %v6551_v8, %v3916_v37  ;;  %v2769_v55 = vpop.f32.mrf.mxu1  ;;  %v3441_v24 = vpop.f32.mrf.mxu0 }
 0x4ca   : > { %v2770_v0 = vadd.f32 %v6551_v8, %v2769_v55  ;;  %v3442_v42 = vadd.f32 %v6551_v8, %v3441_v24  ;;  %v4069_v55 = vpop.trf.xlu1 }
 0x4cb   : > { %v3279_v40 = vmax.f32 %v3240_v26, 0.0  ;;  %v3980_v53 = vmax.f32 %v3917_v61, 0.0 }
 0x4cc   : > { %v2804_v22 = vmax.f32 %v2770_v0, 0.0  ;;  %v3503_v25 = vmax.f32 %v3442_v42, 0.0  ;;  %4864 = vmatmul.msk.bf16.gmra.mxu0 %vm474_vm1, %v6444_v3  ;;  %4874 = vmatmul.msk.bf16.gmra.mxu1 %vm474_vm1, %v3591_v36  ;;  %v3077_v3 = vadd.f32 %v3076_v19, %v6486_v52  ;;  %v2602_v42 = vrot.slane %v2601_v58, 1 }
 0x4cd   : > { %v3310_v11 = vadd.f32 %v3309_v51, %v3279_v40  ;;  %v4011_v4 = vadd.f32 %v4010_v14, %v3980_v53  ;;  %4898 = vmatmul.msk.bf16.gmra.mxu2 %vm474_vm1, %v6387_v28  ;;  %4907 = vmatmul.msk.bf16.gmra.mxu3 %vm474_vm1, %v4067_v54 }
 0x4ce   : > { %v2835_v2 = vadd.f32 %v2834_v5, %v2804_v22  ;;  %v3534_v44 = vadd.f32 %v3533_v57, %v3503_v25  ;;  %v3078_v46 = vrot.slane %v3077_v3, 2 }
 0x4d0   : > { %v3242_v34 = vpop.f32.mrf.mxu3  ;;  %v3919_v43 = vpop.f32.mrf.mxu2  ;;  %v3079_v5 = vadd.f32 %v3078_v46, %v3077_v3 }
 0x4d1   : > { %v3243_v45 = vadd.f32 %v6551_v8, %v3242_v34  ;;  %v3920_v48 = vadd.f32 %v6551_v8, %v3919_v43  ;;  %v2771_v12 = vpop.f32.mrf.mxu1  ;;  %v3443_v23 = vpop.f32.mrf.mxu0 }
 0x4d2   : > { %v2772_v28 = vadd.f32 %v6551_v8, %v2771_v12  ;;  %v3444_v9 = vadd.f32 %v6551_v8, %v3443_v23  ;;  %v3080_v6 = vrot.slane %v3079_v5, 1 }
 0x4d3   : > { %v3280_v39 = vmax.f32 %v3243_v45, 0.0  ;;  %v3981_v63 = vmax.f32 %v3920_v48, 0.0 }
 0x4d4   : > { %v2805_v1 = vmax.f32 %v2772_v28, 0.0  ;;  %v3504_v17 = vmax.f32 %v3444_v9, 0.0  ;;  %v3081_v43 = vadd.f32 %v3080_v6, %v3079_v5 }
 0x4d5   : > { %v3311_v27 = vadd.f32 %v3310_v11, %v3280_v39  ;;  %v4012_v21 = vadd.f32 %v4011_v4, %v3981_v63 }
 0x4d6   : > { %v2836_v32 = vadd.f32 %v2835_v2, %v2805_v1  ;;  %v3535_v52 = vadd.f32 %v3534_v44, %v3504_v17  ;;  %v2603_v2 = vadd.f32 %v2602_v42, %v2601_v58  ;;  %v3082_v46 = vmul.f32 %v3081_v43, %v5881_v10 }
 0x4d8   : > { %v2837_v51 = vrot.slane %v2836_v32, 4  ;;  %v3244_v14 = vpop.f32.mrf.mxu3  ;;  %v3921_v54 = vpop.f32.mrf.mxu2  ;;  %v2604_v63 = vmul.f32 %v2603_v2, %v5881_v10 }
 0x4d9   : > { %v3245_v57 = vadd.f32 %v6551_v8, %v3244_v14  ;;  %v3922_v36 = vadd.f32 %v6551_v8, %v3921_v54  ;;  %v3446_v35 = vpop.f32.mrf.mxu0  ;;  %v3650_v37 = vpop.f32.mrf.mxu1 }
 0x4da   : > { %v2838_v26 = vadd.f32 %v2837_v51, %v2836_v32  ;;  %v3447_v61 = vadd.f32 %v6551_v8, %v3446_v35  ;;  %v3651_v4 = vadd.f32 %v6551_v8, %v3650_v37  ;;  %v5026_v32 = vld [vmem:[%s6942_s3 + $0x38] sm:$0xff] }
 0x4db   : > { %v3281_v24 = vmax.f32 %v3245_v57, 0.0  ;;  %v3982_v0 = vmax.f32 %v3922_v36, 0.0  ;;  %4367 = vmatpush.bf16.msra.mxu0 %v5026_v32 }
 0x4dc   : > { %v2839_v40 = vrot.slane %v2838_v26, 2  ;;  %v3505_v53 = vmax.f32 %v3447_v61, 0.0  ;;  %4865 = vmatmul.msk.bf16.gmra.mxu0 %vm474_vm1, %v3353_v62  ;;  %4875 = vmatmul.msk.bf16.gmra.mxu1 %vm474_vm1, %v6427_v31  ;;  %v3730_v23 = vmax.f32 %v3651_v4, 0.0 }
 0x4dd   : > { %v3312_v22 = vadd.f32 %v3311_v27, %v3281_v24  ;;  %v4013_v25 = vadd.f32 %v4012_v21, %v3982_v0  ;;  %4899 = vmatmul.msk.bf16.gmra.mxu2 %vm474_vm1, %v6406_v18  ;;  %4908 = vmatmul.msk.bf16.gmra.mxu3 %vm474_vm1, %v4069_v55 }
 0x4de   : > { %v2840_v19 = vadd.f32 %v2839_v40, %v2838_v26  ;;  %v3536_v11 = vadd.f32 %v3535_v52, %v3505_v53 }
 0x4e0   : > { %v2841_v44 = vrot.slane %v2840_v19, 1  ;;  %v3247_v41 = vpop.f32.mrf.mxu3  ;;  %v3924_v34 = vpop.f32.mrf.mxu2 }
 0x4e1   : > { %v3248_v3 = vadd.f32 %v6551_v8, %v3247_v41  ;;  %v3925_v31 = vadd.f32 %v6551_v8, %v3924_v34  ;;  %v3448_v45 = vpop.f32.mrf.mxu0  ;;  %v3652_v48 = vpop.f32.mrf.mxu1 }
 0x4e2   : > { %v2842_v12 = vadd.f32 %v2841_v44, %v2840_v19  ;;  %v3449_v18 = vadd.f32 %v6551_v8, %v3448_v45  ;;  %v3653_v28 = vadd.f32 %v6551_v8, %v3652_v48 }
 0x4e3   : > { %v3282_v9 = vmax.f32 %v3248_v3, 0.0  ;;  %v3983_v39 = vmax.f32 %v3925_v31, 0.0 }
 0x4e4   : > { %v2843_v15 = vmul.f32 %v2842_v12, %v5881_v10  ;;  %v3506_v1 = vmax.f32 %v3449_v18, 0.0  ;;  %v3731_v17 = vmax.f32 %v3653_v28, 0.0 }
 0x4e5   : > { %v3313_v27 = vadd.f32 %v3312_v22, %v3282_v9  ;;  %v4014_v21 = vadd.f32 %v4013_v25, %v3983_v39 }
 0x4e6   : > { %v4291_v52 = vsel %vm4278_vm3, %v2604_v63, %v2843_v15  ;;  %v3537_v62 = vadd.f32 %v3536_v11, %v3506_v1  ;;  %v3762_v58 = vadd.f32 %v3731_v17, %v3730_v23 }
 0x4e7   : > { %v4292_v51 = vsel %vm523_vm0, %v4291_v52, %v3082_v46 }
 0x4e8   : > { %v3249_v14 = vpop.f32.mrf.mxu3  ;;  %v3926_v54 = vpop.f32.mrf.mxu2 }
 0x4e9   : > { %v3250_v5 = vadd.f32 %v6551_v8, %v3249_v14  ;;  %v3927_v57 = vadd.f32 %v6551_v8, %v3926_v54  ;;  %v3451_v36 = vpop.f32.mrf.mxu0  ;;  %v3655_v35 = vpop.f32.mrf.mxu1 }
 0x4ea   : > { %v3452_v37 = vadd.f32 %v6551_v8, %v3451_v36  ;;  %v3656_v26 = vadd.f32 %v6551_v8, %v3655_v35 }
 0x4eb   : > { %v3283_v61 = vmax.f32 %v3250_v5, 0.0  ;;  %v3984_v55 = vmax.f32 %v3927_v57, 0.0 }
 0x4ec   : > { %v3507_v24 = vmax.f32 %v3452_v37, 0.0  ;;  %v3732_v0 = vmax.f32 %v3656_v26, 0.0  ;;  %4876 = vmatmul.msk.bf16.gmra.mxu1 %vm474_vm1, %v6450_v20 }
 0x4ed   : > { %v3314_v42 = vadd.f32 %v3313_v27, %v3283_v61  ;;  %v4015_v40 = vadd.f32 %v4014_v21, %v3984_v55  ;;  %4909 = vmatmul.msk.bf16.gmra.mxu3 %vm474_vm1, %v6452_v16 }
 0x4ee   : > { %v3538_v53 = vadd.f32 %v3537_v62, %v3507_v24  ;;  %v3763_v6 = vadd.f32 %v3762_v58, %v3732_v0 }
 0x4ef   : > { %v3315_v22 = vrot.slane %v3314_v42, 4 }
 0x4f0   : > { %v3929_v25 = vpop.f32.mrf.mxu2  ;;  %v4128_v19 = vpop.f32.mrf.mxu3 }
 0x4f1   : > { %v3316_v11 = vadd.f32 %v3315_v22, %v3314_v42  ;;  %v3930_v4 = vadd.f32 %v6551_v8, %v3929_v25  ;;  %v3453_v2 = vpop.f32.mrf.mxu0  ;;  %v3657_v44 = vpop.f32.mrf.mxu1  ;;  %v4129_v18 = vadd.f32 %v6551_v8, %v4128_v19  ;;  %v5025_v25 = vld [vmem:[%s6942_s3 + $0x30] sm:$0xff] }
 0x4f2   : > { %v3454_v41 = vadd.f32 %v6551_v8, %v3453_v2  ;;  %v3658_v34 = vadd.f32 %v6551_v8, %v3657_v44  ;;  %4368 = vmatpush.bf16.msra.mxu0 %v5025_v25 }
 0x4f3   : > { %v3317_v20 = vrot.slane %v3316_v11, 2  ;;  %v3985_v43 = vmax.f32 %v3930_v4, 0.0  ;;  %v4208_v32 = vmax.f32 %v4129_v18, 0.0 }
 0x4f4   : > { %v3508_v3 = vmax.f32 %v3454_v41, 0.0  ;;  %v3733_v31 = vmax.f32 %v3658_v34, 0.0 }
 0x4f5   : > { %v3318_v45 = vadd.f32 %v3317_v20, %v3316_v11  ;;  %v4016_v16 = vadd.f32 %v4015_v40, %v3985_v43 }
 0x4f6   : > { %v3539_v48 = vadd.f32 %v3538_v53, %v3508_v3  ;;  %v3764_v12 = vadd.f32 %v3763_v6, %v3733_v31 }
 0x4f7   : > { %v3319_v23 = vrot.slane %v3318_v45, 1 }
 0x4f8   : > { %v3931_v28 = vpop.f32.mrf.mxu2  ;;  %v4130_v9 = vpop.f32.mrf.mxu3 }
 0x4f9   : > { %v3320_v39 = vadd.f32 %v3319_v23, %v3318_v45  ;;  %v3932_v63 = vadd.f32 %v6551_v8, %v3931_v28  ;;  %v4131_v15 = vadd.f32 %v6551_v8, %v4130_v9  ;;  %v3456_v1 = vpop.f32.mrf.mxu0  ;;  %v3660_v17 = vpop.f32.mrf.mxu1 }
 0x4fa   : > { %v3457_v46 = vadd.f32 %v6551_v8, %v3456_v1  ;;  %v3661_v27 = vadd.f32 %v6551_v8, %v3660_v17 }
 0x4fb   : > { %v3321_v21 = vmul.f32 %v3320_v39, %v5881_v10  ;;  %v3986_v52 = vmax.f32 %v3932_v63, 0.0  ;;  %v4209_v62 = vmax.f32 %v4131_v15, 0.0 }
 0x4fc   : > { %v3509_v58 = vmax.f32 %v3457_v46, 0.0  ;;  %v3734_v14 = vmax.f32 %v3661_v27, 0.0  ;;  %4877 = vmatmul.msk.bf16.gmra.mxu1 %vm474_vm1, %v6477_v38 }
 0x4fd   : > { %v6655_v54 = vsel %vm4281_vm4, %v4292_v51, %v3321_v21  ;;  %v4017_v5 = vadd.f32 %v4016_v16, %v3986_v52  ;;  %v4240_v57 = vadd.f32 %v4209_v62, %v4208_v32  ;;  %4910 = vmatmul.msk.bf16.gmra.mxu3 %vm474_vm1, %v6473_v29 }
 0x4fe   : > { %v3540_v36 = vadd.f32 %v3539_v48, %v3509_v58  ;;  %v3765_v35 = vadd.f32 %v3764_v12, %v3734_v14 }
 0x500   : > { %v3934_v37 = vpop.f32.mrf.mxu2  ;;  %v4133_v26 = vpop.f32.mrf.mxu3 }
 0x501   : > { %v3935_v61 = vadd.f32 %v6551_v8, %v3934_v37  ;;  %v4134_v55 = vadd.f32 %v6551_v8, %v4133_v26  ;;  %v3458_v24 = vpop.f32.mrf.mxu0  ;;  %v3662_v0 = vpop.f32.mrf.mxu1 }
 0x502   : > { %v3459_v38 = vadd.f32 %v6551_v8, %v3458_v24  ;;  %v3663_v51 = vadd.f32 %v6551_v8, %v3662_v0 }
 0x503   : > { %v3987_v42 = vmax.f32 %v3935_v61, 0.0  ;;  %v4210_v40 = vmax.f32 %v4134_v55, 0.0 }
 0x504   : > { %v3510_v53 = vmax.f32 %v3459_v38, 0.0  ;;  %v3735_v6 = vmax.f32 %v3663_v51, 0.0 }
 0x505   : > { %v4018_v22 = vadd.f32 %v4017_v5, %v3987_v42  ;;  %v4241_v29 = vadd.f32 %v4240_v57, %v4210_v40  ;;  %v5024_v40 = vld [vmem:[%s6942_s3 + $0x28] sm:$0xff] }
 0x506   : > { %v3541_v19 = vadd.f32 %v3540_v36, %v3510_v53  ;;  %v3766_v11 = vadd.f32 %v3765_v35, %v3735_v6  ;;  %4369 = vmatpush.bf16.msra.mxu0 %v5024_v40 }
 0x508   : > { %v3936_v4 = vpop.f32.mrf.mxu2  ;;  %v4135_v2 = vpop.f32.mrf.mxu3 }
 0x509   : > { %v3937_v44 = vadd.f32 %v6551_v8, %v3936_v4  ;;  %v4136_v41 = vadd.f32 %v6551_v8, %v4135_v2  ;;  %v3461_v34 = vpop.f32.mrf.mxu0  ;;  %v3665_v20 = vpop.f32.mrf.mxu1 }
 0x50a   : > { %v3462_v43 = vadd.f32 %v6551_v8, %v3461_v34  ;;  %v3666_v3 = vadd.f32 %v6551_v8, %v3665_v20 }
 0x50b   : > { %v3988_v31 = vmax.f32 %v3937_v44, 0.0  ;;  %v4211_v45 = vmax.f32 %v4136_v41, 0.0 }
 0x50c   : > { %v3511_v16 = vmax.f32 %v3462_v43, 0.0  ;;  %v3736_v48 = vmax.f32 %v3666_v3, 0.0  ;;  %4878 = vmatmul.msk.bf16.gmra.mxu1 %vm474_vm1, %v6513_v7 }
 0x50d   : > { %v4019_v12 = vadd.f32 %v4018_v22, %v3988_v31  ;;  %v4242_v23 = vadd.f32 %v4241_v29, %v4211_v45  ;;  %4911 = vmatmul.msk.bf16.gmra.mxu3 %vm474_vm1, %v6503_v50 }
 0x50e   : > { %v6674_v18 = vadd.f32 %v3541_v19, %v3511_v16  ;;  %v3767_v28 = vadd.f32 %v3766_v11, %v3736_v48 }
 0x510   : > { %v3939_v9 = vpop.f32.mrf.mxu2  ;;  %v4138_v39 = vpop.f32.mrf.mxu3 }
 0x511   : > { %v3940_v63 = vadd.f32 %v6551_v8, %v3939_v9  ;;  %v4139_v15 = vadd.f32 %v6551_v8, %v4138_v39  ;;  %v6678_v1 = vpop.f32.mrf.mxu0  ;;  %v3667_v17 = vpop.f32.mrf.mxu1 }
 0x512   : > { %v3668_v46 = vadd.f32 %v6551_v8, %v3667_v17 }
 0x513   : > { %v3989_v7 = vmax.f32 %v3940_v63, 0.0  ;;  %v4212_v27 = vmax.f32 %v4139_v15, 0.0 }
 0x514   : > { %v3737_v21 = vmax.f32 %v3668_v46, 0.0 }
 0x515   : > { %v6681_v32 = vadd.f32 %v4019_v12, %v3989_v7  ;;  %v4243_v50 = vadd.f32 %v4242_v23, %v4212_v27 }
 0x516   : > { %v3768_v52 = vadd.f32 %v3767_v28, %v3737_v21 }
 0x518   : > { %v4140_v62 = vpop.f32.mrf.mxu3 }
 0x519   : > { %v4141_v58 = vadd.f32 %v6551_v8, %v4140_v62  ;;  %v6684_v14 = vpop.f32.mrf.mxu0  ;;  %v3670_v5 = vpop.f32.mrf.mxu1  ;;  %v5023_v62 = vld [vmem:[%s6942_s3 + $0x20] sm:$0xff] }
 0x51a   : > { %v3671_v57 = vadd.f32 %v6551_v8, %v3670_v5  ;;  %4370 = vmatpush.bf16.msra.mxu0 %v5023_v62  ;;  %v3592_v5 = vpop.trf.xlu0 }
 0x51b   : > { %v4213_v36 = vmax.f32 %v4141_v58, 0.0 }
 0x51c   : > { %v3738_v35 = vmax.f32 %v3671_v57, 0.0  ;;  %4879 = vmatmul.msk.bf16.gmra.mxu1 %vm474_vm1, %v6536_v49 }
 0x51d   : > { %v4244_v37 = vadd.f32 %v4243_v50, %v4213_v36  ;;  %4912 = vmatmul.msk.bf16.gmra.mxu3 %vm474_vm1, %v6530_v47 }
 0x51e   : > { %v3769_v26 = vadd.f32 %v3768_v52, %v3738_v35  ;;  %v3464_v35 = vadd.f32 %v6551_v8, %v6678_v1 }
 0x520   : > { %v4143_v61 = vpop.f32.mrf.mxu3 }
 0x521   : > { %v4144_v55 = vadd.f32 %v6551_v8, %v4143_v61  ;;  %v6692_v24 = vpop.f32.mrf.mxu0  ;;  %v3672_v0 = vpop.f32.mrf.mxu1  ;;  %v3467_v61 = vadd.f32 %v6551_v8, %v6684_v14 }
 0x522   : > { %v3673_v51 = vadd.f32 %v6551_v8, %v3672_v0 }
 0x523   : > { %v4214_v38 = vmax.f32 %v4144_v55, 0.0  ;;  %v3513_v40 = vmax.f32 %v3467_v61, 0.0 }
 0x524   : > { %v3739_v49 = vmax.f32 %v3673_v51, 0.0  ;;  %v3469_v51 = vadd.f32 %v6551_v8, %v6692_v24 }
 0x525   : > { %v4245_v42 = vadd.f32 %v4244_v37, %v4214_v38  ;;  %v3512_v38 = vmax.f32 %v3464_v35, 0.0 }
 0x526   : > { %v3770_v19 = vadd.f32 %v3769_v26, %v3739_v49 }
 0x528   : > { %v4145_v53 = vpop.f32.mrf.mxu3 }
 0x529   : > { %v4146_v47 = vadd.f32 %v6551_v8, %v4145_v53  ;;  %v3471_v6 = vpop.f32.mrf.mxu0  ;;  %v3675_v22 = vpop.f32.mrf.mxu1 }
 0x52a   : > { %v3676_v29 = vadd.f32 %v6551_v8, %v3675_v22  ;;  %v3472_v1 = vadd.f32 %v6551_v8, %v3471_v6  ;;  %v3543_v22 = vadd.f32 %v6674_v18, %v3512_v38 }
 0x52b   : > { %v4215_v25 = vmax.f32 %v4146_v47, 0.0 }
 0x52c   : > { %v3740_v11 = vmax.f32 %v3676_v29, 0.0  ;;  %4880 = vmatmul.msk.bf16.gmra.mxu1 %vm474_vm1, %v6559_v59  ;;  %v3514_v29 = vmax.f32 %v3469_v51, 0.0  ;;  %v5022_v51 = vld [vmem:[%s6942_s3 + $0x18] sm:$0xff] }
 0x52d   : > { %v4246_v4 = vadd.f32 %v4245_v42, %v4215_v25  ;;  %4913 = vmatmul.msk.bf16.gmra.mxu3 %vm474_vm1, %v6557_v60  ;;  %4371 = vmatpush.bf16.msra.mxu0 %v5022_v51 }
 0x52e   : > { %v3771_v2 = vadd.f32 %v3770_v19, %v3740_v11  ;;  %v3544_v11 = vadd.f32 %v3543_v22, %v3513_v40 }
 0x530   : > { %v4148_v44 = vpop.f32.mrf.mxu3  ;;  %v3545_v6 = vadd.f32 %v3544_v11, %v3514_v29 }
 0x531   : > { %v4149_v41 = vadd.f32 %v6551_v8, %v4148_v44  ;;  %v3473_v34 = vpop.f32.mrf.mxu0  ;;  %v3677_v20 = vpop.f32.mrf.mxu1 }
 0x532   : > { %v3678_v43 = vadd.f32 %v6551_v8, %v3677_v20  ;;  %v3474_v25 = vadd.f32 %v6551_v8, %v3473_v34 }
 0x533   : > { %v4216_v3 = vmax.f32 %v4149_v41, 0.0 }
 0x534   : > { %v3741_v31 = vmax.f32 %v3678_v43, 0.0  ;;  %v3516_v41 = vmax.f32 %v3474_v25, 0.0 }
 0x535   : > { %v4247_v45 = vadd.f32 %v4246_v4, %v4216_v3  ;;  %v3515_v4 = vmax.f32 %v3472_v1, 0.0 }
 0x536   : > { %v3772_v16 = vadd.f32 %v3771_v2, %v3741_v31 }
 0x537   : > { %v3546_v3 = vadd.f32 %v3545_v6, %v3515_v4 }
 0x538   : > { %v4150_v48 = vpop.f32.mrf.mxu3 }
 0x539   : > { %v4151_v12 = vadd.f32 %v6551_v8, %v4150_v48  ;;  %v3476_v59 = vpop.f32.mrf.mxu0  ;;  %v3680_v23 = vpop.f32.mrf.mxu1 }
 0x53a   : > { %v3681_v28 = vadd.f32 %v6551_v8, %v3680_v23  ;;  %v3477_v24 = vadd.f32 %v6551_v8, %v3476_v59  ;;  %v3547_v23 = vadd.f32 %v3546_v3, %v3516_v41 }
 0x53b   : > { %v4217_v60 = vmax.f32 %v4151_v12, 0.0  ;;  %v6737_v12 = vpop.f32.mrf.mxu2 }
 0x53c   : > { %v3742_v9 = vmax.f32 %v3681_v28, 0.0  ;;  %4881 = vmatmul.msk.bf16.gmra.mxu1 %vm474_vm1, %v6587_v33  ;;  %v3517_v31 = vmax.f32 %v3477_v24, 0.0 }
 0x53d   : > { %v4248_v39 = vadd.f32 %v4247_v45, %v4217_v60  ;;  %4914 = vmatmul.msk.bf16.gmra.mxu3 %vm474_vm1, %v6579_v56 }
 0x53e   : > { %v3773_v63 = vadd.f32 %v3772_v16, %v3742_v9  ;;  %v4070_v9 = vpop.trf.xlu1 }
 0x540   : > { %v4153_v15 = vpop.f32.mrf.mxu3 }
 0x541   : > { %v4154_v17 = vadd.f32 %v6551_v8, %v4153_v15  ;;  %v3478_v46 = vpop.f32.mrf.mxu0  ;;  %v3682_v7 = vpop.f32.mrf.mxu1 }
 0x542   : > { %v3683_v27 = vadd.f32 %v6551_v8, %v3682_v7  ;;  %v3479_v20 = vadd.f32 %v6551_v8, %v3478_v46 }
 0x543   : > { %v4218_v21 = vmax.f32 %v4154_v17, 0.0 }
 0x544   : > { %v3743_v50 = vmax.f32 %v3683_v27, 0.0  ;;  %v3518_v59 = vmax.f32 %v3479_v20, 0.0 }
 0x545   : > { %v4249_v52 = vadd.f32 %v4248_v39, %v4218_v21 }
 0x546   : > { %v3774_v33 = vadd.f32 %v3773_v63, %v3743_v50  ;;  %v3548_v63 = vadd.f32 %v3547_v23, %v3517_v31 }
 0x548   : > { %v4155_v58 = vpop.f32.mrf.mxu3  ;;  %v3549_v27 = vadd.f32 %v3548_v63, %v3518_v59 }
 0x549   : > { %v4156_v56 = vadd.f32 %v6551_v8, %v4155_v58  ;;  %v3481_v57 = vpop.f32.mrf.mxu0  ;;  %v3685_v36 = vpop.f32.mrf.mxu1 }
 0x54a   : > { %v3686_v37 = vadd.f32 %v6551_v8, %v3685_v36  ;;  %v3482_v18 = vadd.f32 %v6551_v8, %v3481_v57 }
 0x54b   : > { %v4219_v26 = vmax.f32 %v4156_v56, 0.0 }
 0x54c   : > { %v3744_v55 = vmax.f32 %v3686_v37, 0.0  ;;  %4882 = vmatmul.msk.bf16.gmra.mxu1 %vm474_vm1, %v3592_v5  ;;  %v3519_v15 = vmax.f32 %v3482_v18, 0.0 }
 0x54d   : > { %v4250_v0 = vadd.f32 %v4249_v52, %v4219_v26  ;;  %4915 = vmatmul.msk.bf16.gmra.mxu3 %vm474_vm1, %v6605_v13  ;;  %v6746_v26 = vpop.f32.mrf.mxu2 }
 0x54e   : > { %v3775_v42 = vadd.f32 %v3774_v33, %v3744_v55  ;;  %v3550_v52 = vadd.f32 %v3549_v27, %v3519_v15 }
 0x550   : > { %v4158_v49 = vpop.f32.mrf.mxu3 }
 0x551   : > { %v4159_v53 = vadd.f32 %v6551_v8, %v4158_v49  ;;  %v3483_v47 = vpop.f32.mrf.mxu0  ;;  %v3687_v14 = vpop.f32.mrf.mxu1 }
 0x552   : > { %v3688_v13 = vadd.f32 %v6551_v8, %v3687_v14  ;;  %v3484_v28 = vadd.f32 %v6551_v8, %v3483_v47 }
 0x553   : > { %v4220_v19 = vmax.f32 %v4159_v53, 0.0 }
 0x554   : > { %v3745_v2 = vmax.f32 %v3688_v13, 0.0  ;;  %v3520_v21 = vmax.f32 %v3484_v28, 0.0 }
 0x555   : > { %v4251_v44 = vadd.f32 %v4250_v0, %v4220_v19  ;;  %v6753_v11 = vpop.f32.mrf.mxu2 }
 0x556   : > { %v3776_v43 = vadd.f32 %v3775_v42, %v3745_v2  ;;  %v3551_v57 = vadd.f32 %v3550_v52, %v3520_v21  ;;  %v5034_v2 = vld [vmem:[%s6944_s5 + $0x38] sm:$0xff]  ;;  %v5021_v52 = vld [vmem:[%s6942_s3 + $0x10] sm:$0xff] }
 0x557   : > { %4452 = vmatpush.bf16.msra.mxu1 %v5034_v2  ;;  %4372 = vmatpush.bf16.msra.mxu0 %v5021_v52 }
 0x558   : > { %v4160_v45 = vpop.f32.mrf.mxu3 }
 0x559   : > { %v4161_v34 = vadd.f32 %v6551_v8, %v4160_v45  ;;  %v3486_v16 = vpop.f32.mrf.mxu0  ;;  %v3690_v48 = vpop.f32.mrf.mxu1 }
 0x55a   : > { %v3691_v60 = vadd.f32 %v6551_v8, %v3690_v48  ;;  %v3487_v17 = vadd.f32 %v6551_v8, %v3486_v16 }
 0x55b   : > { %v4221_v39 = vmax.f32 %v4161_v34, 0.0 }
 0x55c   : > { %v3746_v46 = vmax.f32 %v3691_v60, 0.0  ;;  %v3521_v62 = vmax.f32 %v3487_v17, 0.0 }
 0x55d   : > { %v4252_v7 = vadd.f32 %v4251_v44, %v4221_v39  ;;  %4916 = vmatmul.msk.bf16.gmra.mxu3 %vm474_vm1, %v4070_v9  ;;  %v3949_v23 = vpop.f32.mrf.mxu2 }
 0x55e   : > { %v3777_v50 = vadd.f32 %v3776_v43, %v3746_v46  ;;  %v3552_v61 = vadd.f32 %v3551_v57, %v3521_v62 }
 0x560   : > { %v4163_v33 = vpop.f32.mrf.mxu3 }
 0x561   : > { %v4164_v58 = vadd.f32 %v6551_v8, %v4163_v33  ;;  %v3488_v5 = vpop.f32.mrf.mxu0  ;;  %v3692_v56 = vpop.f32.mrf.mxu1 }
 0x562   : > { %v3489_v36 = vadd.f32 %v6551_v8, %v3488_v5  ;;  %v3693_v35 = vadd.f32 %v6551_v8, %v3692_v56 }
 0x563   : > { %v4222_v37 = vmax.f32 %v4164_v58, 0.0 }
 0x564   : > { %v3522_v55 = vmax.f32 %v3489_v36, 0.0  ;;  %v3747_v0 = vmax.f32 %v3693_v35, 0.0  ;;  %v5033_v36 = vld [vmem:[%s6944_s5 + $0x30] sm:$0xff] }
 0x565   : > { %v4253_v38 = vadd.f32 %v4252_v7, %v4222_v37  ;;  %v3951_v21 = vpop.f32.mrf.mxu2  ;;  %4453 = vmatpush.bf16.msra.mxu1 %v5033_v36 }
 0x566   : > { %v3553_v42 = vadd.f32 %v3552_v61, %v3522_v55  ;;  %v3778_v40 = vadd.f32 %v3777_v50, %v3747_v0 }
 0x568   : > { %v3554_v1 = vrot.slane %v3553_v42, 4  ;;  %v4165_v49 = vpop.f32.mrf.mxu3 }
 0x569   : > { %v4166_v53 = vadd.f32 %v6551_v8, %v4165_v49  ;;  %v3695_v47 = vpop.f32.mrf.mxu1 }
 0x56a   : > { %v3555_v14 = vadd.f32 %v3554_v1, %v3553_v42  ;;  %v3696_v22 = vadd.f32 %v6551_v8, %v3695_v47 }
 0x56b   : > { %v4223_v29 = vmax.f32 %v4166_v53, 0.0  ;;  %v5020_v53 = vld [vmem:[%s6942_s3 + $0x8] sm:$0xff] }
 0x56c   : > { %v3556_v25 = vrot.slane %v3555_v14, 2  ;;  %v3748_v13 = vmax.f32 %v3696_v22, 0.0  ;;  %4373 = vmatpush.bf16.msra.mxu0 %v5020_v53 }
 0x56d   : > { %v4254_v19 = vadd.f32 %v4253_v38, %v4223_v29  ;;  %v3954_v56 = vpop.f32.mrf.mxu2  ;;  %v3942_v29 = vadd.f32 %v6551_v8, %v6737_v12 }
 0x56e   : > { %v3557_v4 = vadd.f32 %v3556_v25, %v3555_v14  ;;  %v3779_v24 = vadd.f32 %v3778_v40, %v3748_v13  ;;  %v5032_v25 = vld [vmem:[%s6944_s5 + $0x28] sm:$0xff]  ;;  %v6797_v13 = vld [vmem:[%s6941_s2] ss:$0 sm:$0xff] }
 0x56f   : > { %4454 = vmatpush.bf16.msra.mxu1 %v5032_v25  ;;  %v3947_v2 = vadd.f32 %v6797_v13, %v6753_v11 }
 0x570   : > { %v3558_v44 = vrot.slane %v3557_v4, 1  ;;  %v4168_v6 = vpop.f32.mrf.mxu3 }
 0x571   : > { %v4169_v41 = vadd.f32 %v6551_v8, %v4168_v6  ;;  %v3697_v20 = vpop.f32.mrf.mxu1 }
 0x572   : > { %v3559_v43 = vadd.f32 %v3558_v44, %v3557_v4  ;;  %v3698_v3 = vadd.f32 %v6551_v8, %v3697_v20  ;;  %v3950_v44 = vadd.f32 %v6797_v13, %v3949_v23  ;;  %v3992_v20 = vmax.f32 %v3947_v2, 0.0 }
 0x573   : > { %v4224_v31 = vmax.f32 %v4169_v41, 0.0 }
 0x574   : > { %v3560_v18 = vmul.f32 %v3559_v43, %v5881_v10  ;;  %v3749_v45 = vmax.f32 %v3698_v3, 0.0  ;;  %v3952_v43 = vadd.f32 %v6797_v13, %v3951_v21 }
 0x575   : > { %v4255_v34 = vadd.f32 %v4254_v19, %v4224_v31  ;;  %v3956_v38 = vpop.f32.mrf.mxu2  ;;  %v3945_v19 = vadd.f32 %v6797_v13, %v6746_v26  ;;  %v3993_v31 = vmax.f32 %v3950_v44, 0.0  ;;  %v3955_v26 = vadd.f32 %v6797_v13, %v3954_v56 }
 0x576   : > { %v6763_v16 = vsel %vm4283_vm5, %v6655_v54, %v3560_v18  ;;  %v3780_v48 = vadd.f32 %v3779_v24, %v3749_v45  ;;  %v3990_v24 = vmax.f32 %v3942_v29, 0.0  ;;  %v3957_v11 = vadd.f32 %v6797_v13, %v3956_v38 }
 0x577   : > { %v3991_v12 = vmax.f32 %v3945_v19, 0.0  ;;  %v5019_v19 = vld [vmem:[%s6942_s3] sm:$0xff] }
 0x578   : > { %v4170_v59 = vpop.f32.mrf.mxu3  ;;  %v4021_v41 = vadd.f32 %v6681_v32, %v3990_v24  ;;  %4374 = vmatpush.bf16.msra.mxu0 %v5019_v19 }
 0x579   : > { %v4171_v28 = vadd.f32 %v6551_v8, %v4170_v59  ;;  %v3700_v60 = vpop.f32.mrf.mxu1 }
 0x57a   : > { %v3701_v9 = vadd.f32 %v6551_v8, %v3700_v60  ;;  %v4022_v3 = vadd.f32 %v4021_v41, %v3991_v12 }
 0x57b   : > { %v4225_v39 = vmax.f32 %v4171_v28, 0.0  ;;  %v3995_v28 = vmax.f32 %v3955_v26, 0.0 }
 0x57c   : > { %v3750_v63 = vmax.f32 %v3701_v9, 0.0  ;;  %v4023_v45 = vadd.f32 %v4022_v3, %v3992_v20 }
 0x57d   : > { %v4256_v15 = vadd.f32 %v4255_v34, %v4225_v39  ;;  %v3959_v40 = vpop.f32.mrf.mxu2  ;;  %v3994_v34 = vmax.f32 %v3952_v43, 0.0  ;;  %v3996_v39 = vmax.f32 %v3957_v11, 0.0 }
 0x57e   : > { %v6767_v17 = vadd.f32 %v3780_v48, %v3750_v63  ;;  %v4024_v23 = vadd.f32 %v4023_v45, %v3993_v31  ;;  %v3960_v32 = vadd.f32 %v6797_v13, %v3959_v40 }
 0x580   : > { %v4173_v46 = vpop.f32.mrf.mxu3  ;;  %v4025_v9 = vadd.f32 %v4024_v23, %v3994_v34 }
 0x581   : > { %v4174_v7 = vadd.f32 %v6551_v8, %v4173_v46  ;;  %v3702_v27 = vpop.f32.mrf.mxu1 }
 0x582   : > { %v3703_v59 = vadd.f32 %v6797_v13, %v3702_v27  ;;  %v4026_v21 = vadd.f32 %v4025_v9, %v3995_v28 }
 0x583   : > { %v4226_v54 = vmax.f32 %v4174_v7, 0.0 }
 0x584   : > { %v3751_v46 = vmax.f32 %v3703_v59, 0.0 }
 0x585   : > { %v4257_v50 = vadd.f32 %v4256_v15, %v4226_v54  ;;  %v3961_v22 = vpop.f32.mrf.mxu2  ;;  %v3997_v54 = vmax.f32 %v3960_v32, 0.0 }
 0x586   : > { %v3962_v63 = vadd.f32 %v6797_v13, %v3961_v22 }
 0x588   : > { %v4175_v62 = vpop.f32.mrf.mxu3 }
 0x589   : > { %v4176_v33 = vadd.f32 %v6551_v8, %v4175_v62  ;;  %v3705_v58 = vpop.f32.mrf.mxu1 }
 0x58a   : > { %v3706_v60 = vadd.f32 %v6797_v13, %v3705_v58 }
 0x58b   : > { %v4227_v5 = vmax.f32 %v4176_v33, 0.0  ;;  %v4027_v33 = vadd.f32 %v4026_v21, %v3996_v39 }
 0x58c   : > { %v3752_v52 = vmax.f32 %v3706_v60, 0.0 }
 0x58d   : > { %v4258_v57 = vadd.f32 %v4257_v50, %v4227_v5  ;;  %v3964_v6 = vpop.f32.mrf.mxu2  ;;  %v3998_v5 = vmax.f32 %v3962_v63, 0.0 }
 0x58e   : > { %v3965_v50 = vadd.f32 %v6797_v13, %v3964_v6 }
 0x590   : > { %v4178_v35 = vpop.f32.mrf.mxu3 }
 0x591   : > { %v4179_v37 = vadd.f32 %v6551_v8, %v4178_v35  ;;  %v3707_v61 = vpop.f32.mrf.mxu1 }
 0x592   : > { %v3708_v7 = vadd.f32 %v6797_v13, %v3707_v61  ;;  %v3999_v61 = vmax.f32 %v3965_v50, 0.0 }
 0x593   : > { %v4228_v55 = vmax.f32 %v4179_v37, 0.0  ;;  %v4028_v37 = vadd.f32 %v4027_v33, %v3997_v54 }
 0x594   : > { %v3753_v36 = vmax.f32 %v3708_v7, 0.0 }
 0x595   : > { %v6778_v0 = vadd.f32 %v4258_v57, %v4228_v55  ;;  %v3966_v15 = vpop.f32.mrf.mxu2  ;;  %v3782_v57 = vadd.f32 %v6767_v17, %v3751_v46  ;;  %v4029_v53 = vadd.f32 %v4028_v37, %v3998_v5 }
 0x596   : > { %v3967_v58 = vadd.f32 %v6797_v13, %v3966_v15 }
 0x597   : > { %v3783_v55 = vadd.f32 %v3782_v57, %v3752_v52  ;;  %v4030_v17 = vadd.f32 %v4029_v53, %v3999_v61 }
 0x598   : > { %v6780_v51 = vpop.f32.mrf.mxu3  ;;  %v4000_v22 = vmax.f32 %v3967_v58, 0.0 }
 0x599   : > { %v3710_v42 = vpop.f32.mrf.mxu1 }
 0x59a   : > { %v3711_v27 = vadd.f32 %v6797_v13, %v3710_v42  ;;  %v3784_v42 = vadd.f32 %v3783_v55, %v3753_v36  ;;  %v4031_v44 = vadd.f32 %v4030_v17, %v4000_v22 }
 0x59c   : > { %v3754_v38 = vmax.f32 %v3711_v27, 0.0  ;;  %v4032_v31 = vrot.slane %v4031_v44, 4 }
 0x59e   : > { %v3785_v24 = vadd.f32 %v3784_v42, %v3754_v38  ;;  %v4033_v23 = vadd.f32 %v4032_v31, %v4031_v44  ;;  %v5042_v42 = vld [vmem:[%s6946_s7 + $0x38] sm:$0xff]  ;;  %v5040_v31 = vld [vmem:[%s6946_s7 + $0x28] sm:$0xff] }
 0x59f   : > { %4537 = vmatpush.bf16.msra.mxu2 %v5042_v42 }
 0x5a0   : > { %v6782_v1 = vpop.f32.mrf.mxu3  ;;  %v4034_v15 = vrot.slane %v4033_v23, 2 }
 0x5a1   : > { %v3712_v49 = vpop.f32.mrf.mxu1  ;;  %v4184_v9 = vadd.f32 %v6797_v13, %v6782_v1 }
 0x5a2   : > { %v3713_v35 = vadd.f32 %v6797_v13, %v3712_v49  ;;  %v4035_v27 = vadd.f32 %v4034_v15, %v4033_v23 }
 0x5a3   : > { %v4230_v54 = vmax.f32 %v4184_v9, 0.0 }
 0x5a4   : > { %v3755_v29 = vmax.f32 %v3713_v35, 0.0 }
 0x5a8   : > { %v6787_v47 = vpop.f32.mrf.mxu3 }
 0x5a9   : > { %v3715_v14 = vpop.f32.mrf.mxu1  ;;  %v4186_v7 = vadd.f32 %v6797_v13, %v6787_v47  ;;  %v5031_v47 = vld [vmem:[%s6944_s5 + $0x20] sm:$0xff] }
 0x5aa   : > { %v3716_v40 = vadd.f32 %v6797_v13, %v3715_v14  ;;  %v3786_v14 = vadd.f32 %v3785_v24, %v3755_v29  ;;  %4455 = vmatpush.bf16.msra.mxu1 %v5031_v47  ;;  %v5089_v47 = vld [vmem:[%s6945_s6] ss:$0 sm:$0xff] }
 0x5ab   : > { %v4231_v5 = vmax.f32 %v4186_v7, 0.0 }
 0x5ac   : > { %v3756_v2 = vmax.f32 %v3716_v40, 0.0 }
 0x5ae   : > { %v3787_v43 = vadd.f32 %v3786_v14, %v3756_v2  ;;  %v5029_v2 = vld [vmem:[%s6944_s5 + $0x10] sm:$0xff] }
 0x5b0   : > { %v6801_v4 = vpop.f32.mrf.mxu3 }
 0x5b1   : > { %v3717_v8 = vpop.f32.mrf.mxu1  ;;  %v4189_v50 = vadd.f32 %v6797_v13, %v6801_v4  ;;  %v4036_v4 = vrot.slane %v4035_v27, 1 }
 0x5b2   : > { %v3718_v25 = vadd.f32 %v6797_v13, %v3717_v8 }
 0x5b3   : > { %v4232_v57 = vmax.f32 %v4189_v50, 0.0  ;;  %v4037_v29 = vadd.f32 %v4036_v4, %v4035_v27  ;;  %v5038_v50 = vld [vmem:[%s6946_s7 + $0x18] sm:$0xff]  ;;  %v5088_v27 = vld [vmem:[%s6943_s4] ss:$0 sm:$0xff] }
 0x5b4   : > { %v3757_v41 = vmax.f32 %v3718_v25, 0.0 }
 0x5b6   : > { %v3788_v26 = vadd.f32 %v3787_v43, %v3757_v41  ;;  %v4038_v41 = vmul.f32 %v4037_v29, %v5881_v10 }
 0x5b8   : > { %v6809_v18 = vpop.f32.mrf.mxu3 }
 0x5b9   : > { %v3720_v48 = vpop.f32.mrf.mxu1  ;;  %v4191_v1 = vadd.f32 %v6797_v13, %v6809_v18 }
 0x5ba   : > { %v3721_v49 = vadd.f32 %v6797_v13, %v3720_v48  ;;  %v4181_v48 = vadd.f32 %v6797_v13, %v6780_v51 }
 0x5bb   : > { %v4233_v61 = vmax.f32 %v4191_v1, 0.0 }
 0x5bc   : > { %v3758_v3 = vmax.f32 %v3721_v49, 0.0  ;;  %v4229_v46 = vmax.f32 %v4181_v48, 0.0  ;;  %v5041_v49 = vld [vmem:[%s6946_s7 + $0x30] sm:$0xff]  ;;  %v5039_v48 = vld [vmem:[%s6946_s7 + $0x20] sm:$0xff] }
 0x5bd   : > { %4538 = vmatpush.bf16.msra.mxu2 %v5041_v49 }
 0x5be   : > { %v3789_v34 = vadd.f32 %v3788_v26, %v3758_v3  ;;  %v4260_v33 = vadd.f32 %v6778_v0, %v4229_v46 }
 0x5c0   : > { %v4193_v62 = vpop.f32.mrf.mxu3 }
 0x5c1   : > { %v3722_v56 = vpop.f32.mrf.mxu1  ;;  %v4194_v36 = vadd.f32 %v6797_v13, %v4193_v62  ;;  %v5030_v62 = vld [vmem:[%s6944_s5 + $0x18] sm:$0xff]  ;;  %4539 = vmatpush.bf16.msra.mxu2 %v5040_v31 }
 0x5c2   : > { %v3723_v20 = vadd.f32 %v6797_v13, %v3722_v56  ;;  %v4261_v56 = vadd.f32 %v4260_v33, %v4230_v54  ;;  %4456 = vmatpush.bf16.msra.mxu1 %v5030_v62 }
 0x5c3   : > { %v4234_v40 = vmax.f32 %v4194_v36, 0.0 }
 0x5c4   : > { %v3759_v45 = vmax.f32 %v3723_v20, 0.0  ;;  %v4262_v37 = vadd.f32 %v4261_v56, %v4231_v5 }
 0x5c5   : > { %4540 = vmatpush.bf16.msra.mxu2 %v5039_v48 }
 0x5c6   : > { %v3790_v32 = vadd.f32 %v3789_v34, %v3759_v45  ;;  %v4263_v38 = vadd.f32 %v4262_v37, %v4232_v57  ;;  %4457 = vmatpush.bf16.msra.mxu1 %v5029_v2 }
 0x5c8   : > { %v4195_v12 = vpop.f32.mrf.mxu3  ;;  %v4264_v25 = vadd.f32 %v4263_v38, %v4233_v61  ;;  %v5090_v38 = vld [vmem:[%s6947_s8] ss:$0 sm:$0xff] }
 0x5c9   : > { %v3725_v6 = vpop.f32.mrf.mxu1  ;;  %v4196_v55 = vadd.f32 %v6797_v13, %v4195_v12  ;;  %4541 = vmatpush.bf16.msra.mxu2 %v5038_v50 }
 0x5ca   : > { %v3726_v8 = vadd.f32 %v6797_v13, %v3725_v6  ;;  %v4265_v12 = vadd.f32 %v4264_v25, %v4234_v40 }
 0x5cb   : > { %v4235_v19 = vmax.f32 %v4196_v55, 0.0 }
 0x5cc   : > { %v3760_v11 = vmax.f32 %v3726_v8, 0.0  ;;  %v5028_v8 = vld [vmem:[%s6944_s5 + $0x8] sm:$0xff] }
 0x5cd   : > { %v4266_v20 = vadd.f32 %v4265_v12, %v4235_v19  ;;  %4458 = vmatpush.bf16.msra.mxu1 %v5028_v8 }
 0x5ce   : > { %v3791_v39 = vadd.f32 %v3790_v32, %v3760_v11 }
 0x5d0   : > { %v4198_v59 = vpop.f32.mrf.mxu3 }
 0x5d1   : > { %v3727_v28 = vpop.f32.mrf.mxu1  ;;  %v4199_v18 = vadd.f32 %v6797_v13, %v4198_v59 }
 0x5d2   : > { %v3728_v60 = vadd.f32 %v6797_v13, %v3727_v28 }
 0x5d3   : > { %v4236_v44 = vmax.f32 %v4199_v18, 0.0 }
 0x5d4   : > { %v3761_v63 = vmax.f32 %v3728_v60, 0.0 }
 0x5d5   : > { %v4267_v26 = vadd.f32 %v4266_v20, %v4236_v44 }
 0x5d6   : > { %v3792_v21 = vadd.f32 %v3791_v39, %v3761_v63 }
 0x5d8   : > { %v3793_v51 = vrot.slane %v3792_v21, 4  ;;  %v4200_v52 = vpop.f32.mrf.mxu3 }
 0x5d9   : > { %v4201_v17 = vadd.f32 %v6797_v13, %v4200_v52  ;;  %v5036_v52 = vld [vmem:[%s6946_s7 + $0x8] sm:$0xff] }
 0x5da   : > { %v3794_v58 = vadd.f32 %v3793_v51, %v3792_v21  ;;  %v5037_v51 = vld [vmem:[%s6946_s7 + $0x10] sm:$0xff] }
 0x5db   : > { %v4237_v43 = vmax.f32 %v4201_v17, 0.0  ;;  %4542 = vmatpush.bf16.msra.mxu2 %v5037_v51 }
 0x5dc   : > { %v3795_v35 = vrot.slane %v3794_v58, 2 }
 0x5dd   : > { %v4268_v59 = vadd.f32 %v4267_v26, %v4237_v43 }
 0x5de   : > { %v3796_v0 = vadd.f32 %v3795_v35, %v3794_v58 }
 0x5df   : > { %4543 = vmatpush.bf16.msra.mxu2 %v5036_v52 }
 0x5e0   : > { %v3797_v53 = vrot.slane %v3796_v0, 1  ;;  %v4203_v22 = vpop.f32.mrf.mxu3 }
 0x5e1   : > { %v4204_v6 = vadd.f32 %v6797_v13, %v4203_v22 }
 0x5e2   : > { %v3798_v24 = vadd.f32 %v3797_v53, %v3796_v0 }
 0x5e3   : > { %v4238_v45 = vmax.f32 %v4204_v6, 0.0 }
 0x5e4   : > { %v3799_v14 = vmul.f32 %v3798_v24, %v5881_v10 }
 0x5e5   : > { %v4269_v28 = vadd.f32 %v4268_v59, %v4238_v45 }
 0x5e6   : > { %v4295_v3 = vsel %vm4285_vm6, %v6763_v16, %v3799_v14  ;;  %v5027_v16 = vld [vmem:[%s6944_s5] sm:$0xff] }
 0x5e7   : > { %v4296_v34 = vsel %vm4287_vm7, %v4295_v3, %v4038_v41  ;;  %4459 = vmatpush.bf16.msra.mxu1 %v5027_v16 }
 0x5e8   : > { %v4205_v11 = vpop.f32.mrf.mxu3 }
 0x5e9   : > { %v4206_v23 = vadd.f32 %v6797_v13, %v4205_v11 }
 0x5eb   : > { %v4239_v32 = vmax.f32 %v4206_v23, 0.0 }
 0x5ed   : > { %v4270_v60 = vadd.f32 %v4269_v28, %v4239_v32 }
 0x5ef   : > { %v4271_v9 = vrot.slane %v4270_v60, 4 }
 0x5f1   : > { %v4272_v39 = vadd.f32 %v4271_v9, %v4270_v60 }
 0x5f3   : > { %v4273_v63 = vrot.slane %v4272_v39, 2 }
 0x5f5   : > { %v4274_v15 = vadd.f32 %v4273_v63, %v4272_v39 }
 0x5f7   : > { %v4275_v13 = vrot.slane %v4274_v15, 1 }
 0x5f9   : > { %v4276_v46 = vadd.f32 %v4275_v13, %v4274_v15 }
 0x5fb   : > { %v4277_v7 = vmul.f32 %v4276_v46, %v5881_v10  ;;  %v5035_v10 = vld [vmem:[%s6946_s7] sm:$0xff] }
 0x5fc   : > { %4544 = vmatpush.bf16.msra.mxu2 %v5035_v10 }
 0x5fd   : > { %v4297_v21 = vsel %vm4289_vm8, %v4296_v34, %v4277_v7 }
 0x5fe   : > { %v4298_v54 = vpack.c.bf16 %v4297_v21, %v6338_v30 }
 0x600   : > { %4375 = vmatmul.bf16.vlgmr.msra.gmra.mxu0 %v4298_v54 }
 0x67d   : > { %v4376_v30 = vpop.f32.mrf.mxu0 }
 0x67e   : > { %v4377_v33 = vadd.f32 %v5088_v27, %v4376_v30 }
 0x680   : > { %v4381_v58 = vmax.f32 %v4377_v33, 0.0 }
 0x685   : > { %v4378_v5 = vpop.f32.mrf.mxu0 }
 0x686   : > { %v4379_v1 = vadd.f32 %v5088_v27, %v4378_v5 }
 0x688   : > { %v4382_v56 = vmax.f32 %v4379_v1, 0.0 }
 0x68a   : > { %v4383_v57 = vpack.c.bf16 %v4382_v56, %v4381_v58 }
 0x68c   : > { %4460 = vmatmul.bf16.vlgmr.msra.gmra.mxu1 %v4383_v57 }
 0x709   : > { %v4461_v36 = vpop.f32.mrf.mxu1 }
 0x70a   : > { %v4462_v35 = vadd.f32 %v5089_v47, %v4461_v36 }
 0x70c   : > { %v4466_v61 = vmax.f32 %v4462_v35, 0.0 }
 0x711   : > { %v4463_v4 = vpop.f32.mrf.mxu1 }
 0x712   : > { %v4464_v37 = vadd.f32 %v5089_v47, %v4463_v4 }
 0x714   : > { %v4467_v55 = vmax.f32 %v4464_v37, 0.0 }
 0x716   : > { %v4468_v0 = vpack.c.bf16 %v4467_v55, %v4466_v61 }
 0x718   : > { %4545 = vmatmul.bf16.vlgmr.msra.gmra.mxu2 %v4468_v0 }
 0x79b   : > { %v4546_v40 = vpop.f32.mrf.mxu2 }
 0x79c   : > { %v4547_v18 = vadd.f32 %v5090_v38, %v4546_v40 }
 0x79e   : > { %4551 = vst [vmem:[%s435_s26] sm:$0xff] %v4547_v18 }
 0x7a3   : > { %v4548_v53 = vpop.f32.mrf.mxu2 }
 0x7a4   : > { %v4549_v22 = vadd.f32 %v5090_v38, %v4548_v53 }
 0x7a6   : > { %4552 = vst [vmem:[%s435_s26 + $0x8] sm:$0xff] %v4549_v22 }
 0x7a7   : > { %5125 = shalt.err (!%p5122_p5)
}
 0x7a8   : > { %s5163_s28 = smov 128   ;;  %s5164_s25 = smov 256  }
 0x7a9   : > { %s5165_s26 = smov 8  }
 0x7aa   : > { %5043 = dma.vmem_to_hbm [thread:$0]  (%p5254_p6), %s4566_s27, 256, %s4568_s29, %s4554_s14, %s5163_s28, %s5164_s25, %s5165_s26  }
 0x7ab PF: > { %s4582_s21 = sand.u32 1, %s5148_s30   ;;  %p5046_p7 = pnand %p4638_p9, %p5258_p8 }
 0x7ac   : > { %s4583_s17 = scalar_lea.sflag [#allocation4], %s4582_s21 }
 0x7ad   : > { %p5047_p10 = pneg %p5046_p7 }
 0x7af   : > { %5143 = dma.done.wait (%p5047_p10), %s4583_s17, 256  }
 0x7b0   : > { %5145 = vsyncadd (%p5047_p10), %s4583_s17, 4294967040  ;;  %p19_p11 = scmp.ge.s32.totalorder %s5239_s15, 4   ;;  %s6951_s30 = smov %s5152_s10 }
 0x7b1   : > { %s6952_s10 = smov %s5156_s11  ;;  %s6953_s11 = smov %s5252_s18 }
 0x7b2   : > { %s6954_s12 = smov %s5239_s15  ;;  %21 = sbr.rel (!%p19_p11) target bundleno = 3 (0x3), region = 152 }
 0x7b7   :  { %4589 = vsyncpa [#allocation4], 1 }
 0x7b8   :  { %4591 = vsyncpa [#allocation4 + $0x1], 1 }

</bundles_post_ra>
